<compile_context>
chip_gen: v5e
topology: v5e:2x2
jax: 0.10.0
libtpu: 0.0.40
codegen_flags: <defaults>
</compile_context>

<pallas_src>
import jax
import jax.numpy as jnp
from jax.experimental import pallas as pl
from jax.experimental.pallas import tpu as pltpu

# Small deterministic stand-ins for the module constants
VOCAB_SIZE = 128
MAXLEN = 8
WORD_SIZE = 32       # Encoder.word_size   (620 in the original)
THOUGHT_SIZE = 64    # Encoder.thought_size (1200 in the original)
BATCH = 4


def _lstm_gates(pre, H):
    """pre: (rows, 4H) pre-activations, gate order (i, f, g, o) like torch LSTM."""
    i = jax.nn.sigmoid(pre[:, 0 * H:1 * H])
    f = jax.nn.sigmoid(pre[:, 1 * H:2 * H])
    g = jnp.tanh(pre[:, 2 * H:3 * H])
    o = jax.nn.sigmoid(pre[:, 3 * H:4 * H])
    return i, f, g, o


def _masked_ce(logits, mask, tgt, col_iota):
    """sum_b F.cross_entropy((logits*mask)[b], tgt[b]).

    Mirrors the torch module: the *logits* are masked (zeroed rows for padded
    timesteps contribute log(V) each), not the per-token loss."""
    masked = logits * mask
    m = jnp.max(masked, axis=-1, keepdims=True)
    z = masked - m
    lse = jnp.log(jnp.sum(jnp.exp(z), axis=-1, keepdims=True))
    logp = z - lse
    sel = col_iota == tgt                       # (rows, V) one-hot of the target
    return -jnp.sum(jnp.where(sel, logp, jnp.float32(0.0)))


def _uniskip_kernel(
        we_ref,                                     # (T, B, W) f32 raw embeddings (pre-tanh)
        ewih_ref, ewhh_ref, eb_ref,                 # encoder:  (W,4He) (He,4He) bf16, (1,4He) f32
        pwih_t_ref, pwih_w_ref, pwhh_ref, pb_ref,   # prev dec: (He,4Hd) (W,4Hd) (Hd,4Hd) bf16, (1,4Hd) f32
        nwih_t_ref, nwih_w_ref, nwhh_ref, nb_ref,   # next dec: same shapes
        wv_ref, bv_ref,                             # worder:   (Hd,V) bf16, (1,V) f32
        tgtp_ref, tgtn_ref,                         # (T, B-1, 1) int32 targets
        lenp_ref, lenn_ref,                         # (B-1, 1) int32 lengths
        plog_ref, nlog_ref, loss_ref):              # (T,B-1,V) f32 x2 (VMEM), (1,1) f32 (SMEM)
    T, B, W = we_ref.shape
    He = ewhh_ref.shape[0]
    Hd = pwhh_ref.shape[0]
    Bm1 = B - 1
    V = wv_ref.shape[1]

    # tanh(embedding) once; tiny, stays in vregs/VMEM for both encoder & decoders.
    we = jnp.tanh(we_ref[...])                      # (T, B, W) f32

    # ---------------- Encoder: reversed-time LSTM; only h_T is needed -------
    ewih = ewih_ref[...]
    ewhh = ewhh_ref[...]
    eb = eb_ref[...]
    h = jnp.zeros((B, He), jnp.float32)
    c = jnp.zeros((B, He), jnp.float32)
    for t in range(T):                              # fully unrolled (T=8)
        x = we[T - 1 - t].astype(jnp.bfloat16)      # reversal by static index, no copy
        pre = (jnp.dot(x, ewih, preferred_element_type=jnp.float32)
               + jnp.dot(h.astype(jnp.bfloat16), ewhh,
                         preferred_element_type=jnp.float32)
               + eb)
        i, f, g, o = _lstm_gates(pre, He)
        c = f * c + i * g
        h = o * jnp.tanh(c)
    thoughts = h                                    # (B, He) == enc_seq[-1]

    # ------------- Fused dual decoder LSTM + worder + cross-entropy ---------
    pwhh = pwhh_ref[...]
    nwhh = nwhh_ref[...]
    pb = pb_ref[...]
    nb = nb_ref[...]
    wv = wv_ref[...]                                # TODO(synk): at real vocab (20k) tile V instead
    bv = bv_ref[...]
    lenp = lenp_ref[...]                            # (Bm1, 1) int32
    lenn = lenn_ref[...]
    col = jax.lax.broadcasted_iota(jnp.int32, (Bm1, V), 1)

    # The thought half of the decoder input is time-invariant: fold its gate
    # contribution (plus bias) in once.  prev decoder conditions on thoughts[1:],
    # next decoder on thoughts[:-1] (matches the torch slicing).
    tg_p = (jnp.dot(thoughts[1:].astype(jnp.bfloat16), pwih_t_ref[...],
                    preferred_element_type=jnp.float32) + pb)        # (Bm1, 4Hd)
    tg_n = (jnp.dot(thoughts[:-1].astype(jnp.bfloat16), nwih_t_ref[...],
                    preferred_element_type=jnp.float32) + nb)

    hp = jnp.zeros((Bm1, Hd), jnp.float32)
    cp = jnp.zeros((Bm1, Hd), jnp.float32)
    hn = jnp.zeros((Bm1, Hd), jnp.float32)
    cn = jnp.zeros((Bm1, Hd), jnp.float32)
    acc = jnp.zeros((), jnp.float32)

    for t in range(T):                              # fully unrolled (T=8)
        # delayed word embeddings: zeros at t == 0, else embeddings of step t-1
        if t == 0:
            xg_p, xg_n = tg_p, tg_n
        else:
            wep = we[t - 1, :Bm1].astype(jnp.bfloat16)    # prev branch: sentences[:-1]
            wen = we[t - 1, 1:].astype(jnp.bfloat16)      # next branch: sentences[1:]
            xg_p = tg_p + jnp.dot(wep, pwih_w_ref[...],
                                  preferred_element_type=jnp.float32)
            xg_n = tg_n + jnp.dot(wen, nwih_w_ref[...],
                                  preferred_element_type=jnp.float32)

        pre_p = xg_p + jnp.dot(hp.astype(jnp.bfloat16), pwhh,
                               preferred_element_type=jnp.float32)
        pre_n = xg_n + jnp.dot(hn.astype(jnp.bfloat16), nwhh,
                               preferred_element_type=jnp.float32)

        i, f, g, o = _lstm_gates(pre_p, Hd)
        cp = f * cp + i * g
        hp = o * jnp.tanh(cp)
        i, f, g, o = _lstm_gates(pre_n, Hd)
        cn = f * cn + i * g
        hn = o * jnp.tanh(cn)

        # worder projection: lane-dense (Bm1, V=128) written straight from
        # vregs; the 32-wide hidden states never hit HBM.
        logits_p = (jnp.dot(hp.astype(jnp.bfloat16), wv,
                            preferred_element_type=jnp.float32) + bv)
        logits_n = (jnp.dot(hn.astype(jnp.bfloat16), wv,
                            preferred_element_type=jnp.float32) + bv)
        plog_ref[t] = logits_p
        nlog_ref[t] = logits_n

        # create_mask semantics: mask[b, t] = 1 iff t < lengths[b]
        mask_p = (lenp > t).astype(jnp.float32)      # (Bm1, 1)
        mask_n = (lenn > t).astype(jnp.float32)
        acc = acc + _masked_ce(logits_p, mask_p, tgtp_ref[t], col)
        acc = acc + _masked_ce(logits_n, mask_n, tgtn_ref[t], col)

    loss_ref[0, 0] = acc                             # scalar CE sum -> SMEM


def uniskip_forward(params, sentences, lengths):
    B, T = sentences.shape
    Bm1 = B - 1
    He = THOUGHT_SIZE
    V = VOCAB_SIZE

    # TODO(synk): embedding gather is data-dependent (index_select); kept in JAX.
    we_raw = params['emb'][sentences.T]                              # (T, B, W), pre-tanh

    bf = lambda a: a.astype(jnp.bfloat16)
    enc_wih, enc_whh = bf(params['enc_wih']), bf(params['enc_whh'])
    p_wih, p_whh = bf(params['prev_wih']), bf(params['prev_whh'])
    n_wih, n_whh = bf(params['next_wih']), bf(params['next_whh'])
    wv = bf(params['wv'])

    tgt_prev = sentences[:-1, :].T[:, :, None].astype(jnp.int32)     # (T, Bm1, 1)
    tgt_next = sentences[1:, :].T[:, :, None].astype(jnp.int32)
    len_prev = lengths[:-1][:, None].astype(jnp.int32)               # (Bm1, 1)
    len_next = lengths[1:][:, None].astype(jnp.int32)

    vmem = pl.BlockSpec(memory_space=pltpu.MemorySpace.VMEM)
    smem = pl.BlockSpec(memory_space=pltpu.MemorySpace.SMEM)

    prev_logits, next_logits, loss_sum = pl.pallas_call(
        _uniskip_kernel,
        out_shape=(
            jax.ShapeDtypeStruct((T, Bm1, V), jnp.float32),
            jax.ShapeDtypeStruct((T, Bm1, V), jnp.float32),
            jax.ShapeDtypeStruct((1, 1), jnp.float32),
        ),
        in_specs=[vmem] * 18,
        out_specs=(vmem, vmem, smem),
    )(we_raw,
      enc_wih, enc_whh, params['enc_b'],
      p_wih[:He], p_wih[He:], p_whh, params['prev_b'],
      n_wih[:He], n_wih[He:], n_whh, params['next_b'],
      wv, params['bv'],
      tgt_prev, tgt_next, len_prev, len_next)

    # F.cross_entropy 'mean' reduction per branch, then summed (prev + next).
    loss = loss_sum[0, 0] / (T * Bm1)
    # prev_pred[0].max(1): argmax over vocab of the UNMASKED logits, batch row 0.
    prev_pred_ids = jnp.argmax(prev_logits[:, 0, :], axis=1)
    next_pred_ids = jnp.argmax(next_logits[:, 0, :], axis=1)
    return loss, sentences[0], sentences[1], prev_pred_ids, next_pred_ids


def init_params(key):
    ks = jax.random.split(key, 12)

    def init(k, shape, scale=0.1):
        return scale * jax.random.normal(k, shape, dtype=jnp.float32)

    D_dec = THOUGHT_SIZE + WORD_SIZE
    # LSTM weights stored pre-transposed and gate-stacked along the lane dim:
    # (D_in, 4H), gate order (i, f, g, o).  The single bias per LSTM stands for
    # the pre-summed torch b_ih + b_hh.
    return {
        'emb':       init(ks[0], (VOCAB_SIZE, WORD_SIZE)),
        'enc_wih':   init(ks[1], (WORD_SIZE, 4 * THOUGHT_SIZE)),
        'enc_whh':   init(ks[2], (THOUGHT_SIZE, 4 * THOUGHT_SIZE)),
        'enc_b':     init(ks[3], (1, 4 * THOUGHT_SIZE)),
        'prev_wih':  init(ks[4], (D_dec, 4 * WORD_SIZE)),
        'prev_whh':  init(ks[5], (WORD_SIZE, 4 * WORD_SIZE)),
        'prev_b':    init(ks[6], (1, 4 * WORD_SIZE)),
        'next_wih':  init(ks[7], (D_dec, 4 * WORD_SIZE)),
        'next_whh':  init(ks[8], (WORD_SIZE, 4 * WORD_SIZE)),
        'next_b':    init(ks[9], (1, 4 * WORD_SIZE)),
        'wv':        init(ks[10], (WORD_SIZE, VOCAB_SIZE)),
        'bv':        init(ks[11], (1, VOCAB_SIZE)),
    }


if __name__ == "__main__":
    root = jax.random.PRNGKey(0)
    k_param, k_sent = jax.random.split(root)

    params = init_params(k_param)
    sentences = jax.random.randint(k_sent, (BATCH, MAXLEN), 0, VOCAB_SIZE,
                                   dtype=jnp.int32)
    lengths = jnp.array([8, 5, 7, 3], dtype=jnp.int32)

    fwd = jax.jit(uniskip_forward)
    out = jax.block_until_ready(fwd(params, sentences, lengths))
    loss, s0, s1, prev_ids, next_ids = out
    assert loss.shape == ()
    assert s0.shape == (MAXLEN,) and s1.shape == (MAXLEN,)
    assert prev_ids.shape == (MAXLEN,) and next_ids.shape == (MAXLEN,)
    assert bool(jnp.isfinite(loss))
    print("KERNEL_OK")
</pallas_src>

<mosaic_0001>
module attributes {stable_mosaic.version = 11 : i64} {
  func.func @_uniskip_kernel(%arg0: memref<8x4x32xf32, #tpu.memory_space<vmem>>, %arg1: memref<32x256xbf16, #tpu.memory_space<vmem>>, %arg2: memref<64x256xbf16, #tpu.memory_space<vmem>>, %arg3: memref<1x256xf32, #tpu.memory_space<vmem>>, %arg4: memref<64x128xbf16, #tpu.memory_space<vmem>>, %arg5: memref<32x128xbf16, #tpu.memory_space<vmem>>, %arg6: memref<32x128xbf16, #tpu.memory_space<vmem>>, %arg7: memref<1x128xf32, #tpu.memory_space<vmem>>, %arg8: memref<64x128xbf16, #tpu.memory_space<vmem>>, %arg9: memref<32x128xbf16, #tpu.memory_space<vmem>>, %arg10: memref<32x128xbf16, #tpu.memory_space<vmem>>, %arg11: memref<1x128xf32, #tpu.memory_space<vmem>>, %arg12: memref<32x128xbf16, #tpu.memory_space<vmem>>, %arg13: memref<1x128xf32, #tpu.memory_space<vmem>>, %arg14: memref<8x3x1xi32, #tpu.memory_space<vmem>>, %arg15: memref<8x3x1xi32, #tpu.memory_space<vmem>>, %arg16: memref<3x1xi32, #tpu.memory_space<vmem>>, %arg17: memref<3x1xi32, #tpu.memory_space<vmem>>, %arg18: memref<8x3x128xf32, #tpu.memory_space<vmem>>, %arg19: memref<8x3x128xf32, #tpu.memory_space<vmem>>, %arg20: memref<1x1xf32, #tpu.memory_space<smem>>) attributes {dimension_semantics = [], scalar_prefetch = 0 : i64, scratch_operands = 0 : i64, tpu.core_type = #tpu.core_type<tc>} {
    %c0 = arith.constant 0 : index
    %c0_0 = arith.constant 0 : index
    %c0_1 = arith.constant 0 : index
    %0 = vector.load %arg0[%c0, %c0_0, %c0_1] : memref<8x4x32xf32, #tpu.memory_space<vmem>>, vector<8x4x32xf32>
    %1 = math.tanh %0 : vector<8x4x32xf32>
    %c0_2 = arith.constant 0 : index
    %c0_3 = arith.constant 0 : index
    %2 = vector.load %arg1[%c0_2, %c0_3] : memref<32x256xbf16, #tpu.memory_space<vmem>>, vector<32x256xbf16>
    %c0_4 = arith.constant 0 : index
    %c0_5 = arith.constant 0 : index
    %3 = vector.load %arg2[%c0_4, %c0_5] : memref<64x256xbf16, #tpu.memory_space<vmem>>, vector<64x256xbf16>
    %c0_6 = arith.constant 0 : index
    %c0_7 = arith.constant 0 : index
    %4 = vector.load %arg3[%c0_6, %c0_7] : memref<1x256xf32, #tpu.memory_space<vmem>>, vector<1x256xf32>
    %cst = arith.constant 0.000000e+00 : f32
    %5 = vector.broadcast %cst : f32 to vector<4x64xf32>
    %cst_8 = arith.constant 0.000000e+00 : f32
    %6 = vector.broadcast %cst_8 : f32 to vector<4x64xf32>
    %7 = vector.extract_strided_slice %1 {offsets = [7, 0, 0], sizes = [1, 4, 32], strides = [1, 1, 1]} : vector<8x4x32xf32> to vector<1x4x32xf32>
    %8 = vector.shape_cast %7 : vector<1x4x32xf32> to vector<4x32xf32>
    %9 = arith.truncf %8 : vector<4x32xf32> to vector<4x32xbf16>
    %cst_9 = arith.constant dense<0.000000e+00> : vector<4x256xf32>
    %10 = tpu.matmul %9, %2, %cst_9 {dimension_numbers = #tpu.dot_dimension_numbers<[1], [0], [0], [1], [0, 0, 1, 1], [], []>} : vector<4x32xbf16>, vector<32x256xbf16>, vector<4x256xf32> -> vector<4x256xf32>
    %11 = arith.truncf %5 : vector<4x64xf32> to vector<4x64xbf16>
    %cst_10 = arith.constant dense<0.000000e+00> : vector<4x256xf32>
    %12 = tpu.matmul %11, %3, %cst_10 {dimension_numbers = #tpu.dot_dimension_numbers<[1], [0], [0], [1], [0, 0, 1, 1], [], []>} : vector<4x64xbf16>, vector<64x256xbf16>, vector<4x256xf32> -> vector<4x256xf32>
    %13 = arith.addf %10, %12 : vector<4x256xf32>
    %14 = vector.broadcast %4 : vector<1x256xf32> to vector<4x256xf32>
    %15 = arith.addf %13, %14 : vector<4x256xf32>
    %16 = vector.extract_strided_slice %15 {offsets = [0, 0], sizes = [4, 64], strides = [1, 1]} : vector<4x256xf32> to vector<4x64xf32>
    %17 = arith.negf %16 : vector<4x64xf32>
    %18 = math.exp %17 : vector<4x64xf32>
    %cst_11 = arith.constant 1.000000e+00 : f32
    %19 = vector.broadcast %cst_11 : f32 to vector<4x64xf32>
    %20 = arith.addf %19, %18 : vector<4x64xf32>
    %21 = arith.divf %19, %20 : vector<4x64xf32>
    %22 = vector.extract_strided_slice %15 {offsets = [0, 64], sizes = [4, 64], strides = [1, 1]} : vector<4x256xf32> to vector<4x64xf32>
    %23 = arith.negf %22 : vector<4x64xf32>
    %24 = math.exp %23 : vector<4x64xf32>
    %cst_12 = arith.constant 1.000000e+00 : f32
    %25 = vector.broadcast %cst_12 : f32 to vector<4x64xf32>
    %26 = arith.addf %25, %24 : vector<4x64xf32>
    %27 = arith.divf %25, %26 : vector<4x64xf32>
    %28 = vector.extract_strided_slice %15 {offsets = [0, 128], sizes = [4, 64], strides = [1, 1]} : vector<4x256xf32> to vector<4x64xf32>
    %29 = math.tanh %28 : vector<4x64xf32>
    %30 = vector.extract_strided_slice %15 {offsets = [0, 192], sizes = [4, 64], strides = [1, 1]} : vector<4x256xf32> to vector<4x64xf32>
    %31 = arith.negf %30 : vector<4x64xf32>
    %32 = math.exp %31 : vector<4x64xf32>
    %cst_13 = arith.constant 1.000000e+00 : f32
    %33 = vector.broadcast %cst_13 : f32 to vector<4x64xf32>
    %34 = arith.addf %33, %32 : vector<4x64xf32>
    %35 = arith.divf %33, %34 : vector<4x64xf32>
    %36 = arith.mulf %27, %6 : vector<4x64xf32>
    %37 = arith.mulf %21, %29 : vector<4x64xf32>
    %38 = arith.addf %36, %37 : vector<4x64xf32>
    %39 = math.tanh %38 : vector<4x64xf32>
    %40 = arith.mulf %35, %39 : vector<4x64xf32>
    %41 = vector.extract_strided_slice %1 {offsets = [6, 0, 0], sizes = [1, 4, 32], strides = [1, 1, 1]} : vector<8x4x32xf32> to vector<1x4x32xf32>
    %42 = vector.shape_cast %41 : vector<1x4x32xf32> to vector<4x32xf32>
    %43 = arith.truncf %42 : vector<4x32xf32> to vector<4x32xbf16>
    %cst_14 = arith.constant dense<0.000000e+00> : vector<4x256xf32>
    %44 = tpu.matmul %43, %2, %cst_14 {dimension_numbers = #tpu.dot_dimension_numbers<[1], [0], [0], [1], [0, 0, 1, 1], [], []>} : vector<4x32xbf16>, vector<32x256xbf16>, vector<4x256xf32> -> vector<4x256xf32>
    %45 = arith.truncf %40 : vector<4x64xf32> to vector<4x64xbf16>
    %cst_15 = arith.constant dense<0.000000e+00> : vector<4x256xf32>
    %46 = tpu.matmul %45, %3, %cst_15 {dimension_numbers = #tpu.dot_dimension_numbers<[1], [0], [0], [1], [0, 0, 1, 1], [], []>} : vector<4x64xbf16>, vector<64x256xbf16>, vector<4x256xf32> -> vector<4x256xf32>
    %47 = arith.addf %44, %46 : vector<4x256xf32>
    %48 = vector.broadcast %4 : vector<1x256xf32> to vector<4x256xf32>
    %49 = arith.addf %47, %48 : vector<4x256xf32>
    %50 = vector.extract_strided_slice %49 {offsets = [0, 0], sizes = [4, 64], strides = [1, 1]} : vector<4x256xf32> to vector<4x64xf32>
    %51 = arith.negf %50 : vector<4x64xf32>
    %52 = math.exp %51 : vector<4x64xf32>
    %cst_16 = arith.constant 1.000000e+00 : f32
    %53 = vector.broadcast %cst_16 : f32 to vector<4x64xf32>
    %54 = arith.addf %53, %52 : vector<4x64xf32>
    %55 = arith.divf %53, %54 : vector<4x64xf32>
    %56 = vector.extract_strided_slice %49 {offsets = [0, 64], sizes = [4, 64], strides = [1, 1]} : vector<4x256xf32> to vector<4x64xf32>
    %57 = arith.negf %56 : vector<4x64xf32>
    %58 = math.exp %57 : vector<4x64xf32>
    %cst_17 = arith.constant 1.000000e+00 : f32
    %59 = vector.broadcast %cst_17 : f32 to vector<4x64xf32>
    %60 = arith.addf %59, %58 : vector<4x64xf32>
    %61 = arith.divf %59, %60 : vector<4x64xf32>
    %62 = vector.extract_strided_slice %49 {offsets = [0, 128], sizes = [4, 64], strides = [1, 1]} : vector<4x256xf32> to vector<4x64xf32>
    %63 = math.tanh %62 : vector<4x64xf32>
    %64 = vector.extract_strided_slice %49 {offsets = [0, 192], sizes = [4, 64], strides = [1, 1]} : vector<4x256xf32> to vector<4x64xf32>
    %65 = arith.negf %64 : vector<4x64xf32>
    %66 = math.exp %65 : vector<4x64xf32>
    %cst_18 = arith.constant 1.000000e+00 : f32
    %67 = vector.broadcast %cst_18 : f32 to vector<4x64xf32>
    %68 = arith.addf %67, %66 : vector<4x64xf32>
    %69 = arith.divf %67, %68 : vector<4x64xf32>
    %70 = arith.mulf %61, %38 : vector<4x64xf32>
    %71 = arith.mulf %55, %63 : vector<4x64xf32>
    %72 = arith.addf %70, %71 : vector<4x64xf32>
    %73 = math.tanh %72 : vector<4x64xf32>
    %74 = arith.mulf %69, %73 : vector<4x64xf32>
    %75 = vector.extract_strided_slice %1 {offsets = [5, 0, 0], sizes = [1, 4, 32], strides = [1, 1, 1]} : vector<8x4x32xf32> to vector<1x4x32xf32>
    %76 = vector.shape_cast %75 : vector<1x4x32xf32> to vector<4x32xf32>
    %77 = arith.truncf %76 : vector<4x32xf32> to vector<4x32xbf16>
    %cst_19 = arith.constant dense<0.000000e+00> : vector<4x256xf32>
    %78 = tpu.matmul %77, %2, %cst_19 {dimension_numbers = #tpu.dot_dimension_numbers<[1], [0], [0], [1], [0, 0, 1, 1], [], []>} : vector<4x32xbf16>, vector<32x256xbf16>, vector<4x256xf32> -> vector<4x256xf32>
    %79 = arith.truncf %74 : vector<4x64xf32> to vector<4x64xbf16>
    %cst_20 = arith.constant dense<0.000000e+00> : vector<4x256xf32>
    %80 = tpu.matmul %79, %3, %cst_20 {dimension_numbers = #tpu.dot_dimension_numbers<[1], [0], [0], [1], [0, 0, 1, 1], [], []>} : vector<4x64xbf16>, vector<64x256xbf16>, vector<4x256xf32> -> vector<4x256xf32>
    %81 = arith.addf %78, %80 : vector<4x256xf32>
    %82 = vector.broadcast %4 : vector<1x256xf32> to vector<4x256xf32>
    %83 = arith.addf %81, %82 : vector<4x256xf32>
    %84 = vector.extract_strided_slice %83 {offsets = [0, 0], sizes = [4, 64], strides = [1, 1]} : vector<4x256xf32> to vector<4x64xf32>
    %85 = arith.negf %84 : vector<4x64xf32>
    %86 = math.exp %85 : vector<4x64xf32>
    %cst_21 = arith.constant 1.000000e+00 : f32
    %87 = vector.broadcast %cst_21 : f32 to vector<4x64xf32>
    %88 = arith.addf %87, %86 : vector<4x64xf32>
    %89 = arith.divf %87, %88 : vector<4x64xf32>
    %90 = vector.extract_strided_slice %83 {offsets = [0, 64], sizes = [4, 64], strides = [1, 1]} : vector<4x256xf32> to vector<4x64xf32>
    %91 = arith.negf %90 : vector<4x64xf32>
    %92 = math.exp %91 : vector<4x64xf32>
    %cst_22 = arith.constant 1.000000e+00 : f32
    %93 = vector.broadcast %cst_22 : f32 to vector<4x64xf32>
    %94 = arith.addf %93, %92 : vector<4x64xf32>
    %95 = arith.divf %93, %94 : vector<4x64xf32>
    %96 = vector.extract_strided_slice %83 {offsets = [0, 128], sizes = [4, 64], strides = [1, 1]} : vector<4x256xf32> to vector<4x64xf32>
    %97 = math.tanh %96 : vector<4x64xf32>
    %98 = vector.extract_strided_slice %83 {offsets = [0, 192], sizes = [4, 64], strides = [1, 1]} : vector<4x256xf32> to vector<4x64xf32>
    %99 = arith.negf %98 : vector<4x64xf32>
    %100 = math.exp %99 : vector<4x64xf32>
    %cst_23 = arith.constant 1.000000e+00 : f32
    %101 = vector.broadcast %cst_23 : f32 to vector<4x64xf32>
    %102 = arith.addf %101, %100 : vector<4x64xf32>
    %103 = arith.divf %101, %102 : vector<4x64xf32>
    %104 = arith.mulf %95, %72 : vector<4x64xf32>
    %105 = arith.mulf %89, %97 : vector<4x64xf32>
    %106 = arith.addf %104, %105 : vector<4x64xf32>
    %107 = math.tanh %106 : vector<4x64xf32>
    %108 = arith.mulf %103, %107 : vector<4x64xf32>
    %109 = vector.extract_strided_slice %1 {offsets = [4, 0, 0], sizes = [1, 4, 32], strides = [1, 1, 1]} : vector<8x4x32xf32> to vector<1x4x32xf32>
    %110 = vector.shape_cast %109 : vector<1x4x32xf32> to vector<4x32xf32>
    %111 = arith.truncf %110 : vector<4x32xf32> to vector<4x32xbf16>
    %cst_24 = arith.constant dense<0.000000e+00> : vector<4x256xf32>
    %112 = tpu.matmul %111, %2, %cst_24 {dimension_numbers = #tpu.dot_dimension_numbers<[1], [0], [0], [1], [0, 0, 1, 1], [], []>} : vector<4x32xbf16>, vector<32x256xbf16>, vector<4x256xf32> -> vector<4x256xf32>
    %113 = arith.truncf %108 : vector<4x64xf32> to vector<4x64xbf16>
    %cst_25 = arith.constant dense<0.000000e+00> : vector<4x256xf32>
    %114 = tpu.matmul %113, %3, %cst_25 {dimension_numbers = #tpu.dot_dimension_numbers<[1], [0], [0], [1], [0, 0, 1, 1], [], []>} : vector<4x64xbf16>, vector<64x256xbf16>, vector<4x256xf32> -> vector<4x256xf32>
    %115 = arith.addf %112, %114 : vector<4x256xf32>
    %116 = vector.broadcast %4 : vector<1x256xf32> to vector<4x256xf32>
    %117 = arith.addf %115, %116 : vector<4x256xf32>
    %118 = vector.extract_strided_slice %117 {offsets = [0, 0], sizes = [4, 64], strides = [1, 1]} : vector<4x256xf32> to vector<4x64xf32>
    %119 = arith.negf %118 : vector<4x64xf32>
    %120 = math.exp %119 : vector<4x64xf32>
    %cst_26 = arith.constant 1.000000e+00 : f32
    %121 = vector.broadcast %cst_26 : f32 to vector<4x64xf32>
    %122 = arith.addf %121, %120 : vector<4x64xf32>
    %123 = arith.divf %121, %122 : vector<4x64xf32>
    %124 = vector.extract_strided_slice %117 {offsets = [0, 64], sizes = [4, 64], strides = [1, 1]} : vector<4x256xf32> to vector<4x64xf32>
    %125 = arith.negf %124 : vector<4x64xf32>
    %126 = math.exp %125 : vector<4x64xf32>
    %cst_27 = arith.constant 1.000000e+00 : f32
    %127 = vector.broadcast %cst_27 : f32 to vector<4x64xf32>
    %128 = arith.addf %127, %126 : vector<4x64xf32>
    %129 = arith.divf %127, %128 : vector<4x64xf32>
    %130 = vector.extract_strided_slice %117 {offsets = [0, 128], sizes = [4, 64], strides = [1, 1]} : vector<4x256xf32> to vector<4x64xf32>
    %131 = math.tanh %130 : vector<4x64xf32>
    %132 = vector.extract_strided_slice %117 {offsets = [0, 192], sizes = [4, 64], strides = [1, 1]} : vector<4x256xf32> to vector<4x64xf32>
    %133 = arith.negf %132 : vector<4x64xf32>
    %134 = math.exp %133 : vector<4x64xf32>
    %cst_28 = arith.constant 1.000000e+00 : f32
    %135 = vector.broadcast %cst_28 : f32 to vector<4x64xf32>
    %136 = arith.addf %135, %134 : vector<4x64xf32>
    %137 = arith.divf %135, %136 : vector<4x64xf32>
    %138 = arith.mulf %129, %106 : vector<4x64xf32>
    %139 = arith.mulf %123, %131 : vector<4x64xf32>
    %140 = arith.addf %138, %139 : vector<4x64xf32>
    %141 = math.tanh %140 : vector<4x64xf32>
    %142 = arith.mulf %137, %141 : vector<4x64xf32>
    %143 = vector.extract_strided_slice %1 {offsets = [3, 0, 0], sizes = [1, 4, 32], strides = [1, 1, 1]} : vector<8x4x32xf32> to vector<1x4x32xf32>
    %144 = vector.shape_cast %143 : vector<1x4x32xf32> to vector<4x32xf32>
    %145 = arith.truncf %144 : vector<4x32xf32> to vector<4x32xbf16>
    %cst_29 = arith.constant dense<0.000000e+00> : vector<4x256xf32>
    %146 = tpu.matmul %145, %2, %cst_29 {dimension_numbers = #tpu.dot_dimension_numbers<[1], [0], [0], [1], [0, 0, 1, 1], [], []>} : vector<4x32xbf16>, vector<32x256xbf16>, vector<4x256xf32> -> vector<4x256xf32>
    %147 = arith.truncf %142 : vector<4x64xf32> to vector<4x64xbf16>
    %cst_30 = arith.constant dense<0.000000e+00> : vector<4x256xf32>
    %148 = tpu.matmul %147, %3, %cst_30 {dimension_numbers = #tpu.dot_dimension_numbers<[1], [0], [0], [1], [0, 0, 1, 1], [], []>} : vector<4x64xbf16>, vector<64x256xbf16>, vector<4x256xf32> -> vector<4x256xf32>
    %149 = arith.addf %146, %148 : vector<4x256xf32>
    %150 = vector.broadcast %4 : vector<1x256xf32> to vector<4x256xf32>
    %151 = arith.addf %149, %150 : vector<4x256xf32>
    %152 = vector.extract_strided_slice %151 {offsets = [0, 0], sizes = [4, 64], strides = [1, 1]} : vector<4x256xf32> to vector<4x64xf32>
    %153 = arith.negf %152 : vector<4x64xf32>
    %154 = math.exp %153 : vector<4x64xf32>
    %cst_31 = arith.constant 1.000000e+00 : f32
    %155 = vector.broadcast %cst_31 : f32 to vector<4x64xf32>
    %156 = arith.addf %155, %154 : vector<4x64xf32>
    %157 = arith.divf %155, %156 : vector<4x64xf32>
    %158 = vector.extract_strided_slice %151 {offsets = [0, 64], sizes = [4, 64], strides = [1, 1]} : vector<4x256xf32> to vector<4x64xf32>
    %159 = arith.negf %158 : vector<4x64xf32>
    %160 = math.exp %159 : vector<4x64xf32>
    %cst_32 = arith.constant 1.000000e+00 : f32
    %161 = vector.broadcast %cst_32 : f32 to vector<4x64xf32>
    %162 = arith.addf %161, %160 : vector<4x64xf32>
    %163 = arith.divf %161, %162 : vector<4x64xf32>
    %164 = vector.extract_strided_slice %151 {offsets = [0, 128], sizes = [4, 64], strides = [1, 1]} : vector<4x256xf32> to vector<4x64xf32>
    %165 = math.tanh %164 : vector<4x64xf32>
    %166 = vector.extract_strided_slice %151 {offsets = [0, 192], sizes = [4, 64], strides = [1, 1]} : vector<4x256xf32> to vector<4x64xf32>
    %167 = arith.negf %166 : vector<4x64xf32>
    %168 = math.exp %167 : vector<4x64xf32>
    %cst_33 = arith.constant 1.000000e+00 : f32
    %169 = vector.broadcast %cst_33 : f32 to vector<4x64xf32>
    %170 = arith.addf %169, %168 : vector<4x64xf32>
    %171 = arith.divf %169, %170 : vector<4x64xf32>
    %172 = arith.mulf %163, %140 : vector<4x64xf32>
    %173 = arith.mulf %157, %165 : vector<4x64xf32>
    %174 = arith.addf %172, %173 : vector<4x64xf32>
    %175 = math.tanh %174 : vector<4x64xf32>
    %176 = arith.mulf %171, %175 : vector<4x64xf32>
    %177 = vector.extract_strided_slice %1 {offsets = [2, 0, 0], sizes = [1, 4, 32], strides = [1, 1, 1]} : vector<8x4x32xf32> to vector<1x4x32xf32>
    %178 = vector.shape_cast %177 : vector<1x4x32xf32> to vector<4x32xf32>
    %179 = arith.truncf %178 : vector<4x32xf32> to vector<4x32xbf16>
    %cst_34 = arith.constant dense<0.000000e+00> : vector<4x256xf32>
    %180 = tpu.matmul %179, %2, %cst_34 {dimension_numbers = #tpu.dot_dimension_numbers<[1], [0], [0], [1], [0, 0, 1, 1], [], []>} : vector<4x32xbf16>, vector<32x256xbf16>, vector<4x256xf32> -> vector<4x256xf32>
    %181 = arith.truncf %176 : vector<4x64xf32> to vector<4x64xbf16>
    %cst_35 = arith.constant dense<0.000000e+00> : vector<4x256xf32>
    %182 = tpu.matmul %181, %3, %cst_35 {dimension_numbers = #tpu.dot_dimension_numbers<[1], [0], [0], [1], [0, 0, 1, 1], [], []>} : vector<4x64xbf16>, vector<64x256xbf16>, vector<4x256xf32> -> vector<4x256xf32>
    %183 = arith.addf %180, %182 : vector<4x256xf32>
    %184 = vector.broadcast %4 : vector<1x256xf32> to vector<4x256xf32>
    %185 = arith.addf %183, %184 : vector<4x256xf32>
    %186 = vector.extract_strided_slice %185 {offsets = [0, 0], sizes = [4, 64], strides = [1, 1]} : vector<4x256xf32> to vector<4x64xf32>
    %187 = arith.negf %186 : vector<4x64xf32>
    %188 = math.exp %187 : vector<4x64xf32>
    %cst_36 = arith.constant 1.000000e+00 : f32
    %189 = vector.broadcast %cst_36 : f32 to vector<4x64xf32>
    %190 = arith.addf %189, %188 : vector<4x64xf32>
    %191 = arith.divf %189, %190 : vector<4x64xf32>
    %192 = vector.extract_strided_slice %185 {offsets = [0, 64], sizes = [4, 64], strides = [1, 1]} : vector<4x256xf32> to vector<4x64xf32>
    %193 = arith.negf %192 : vector<4x64xf32>
    %194 = math.exp %193 : vector<4x64xf32>
    %cst_37 = arith.constant 1.000000e+00 : f32
    %195 = vector.broadcast %cst_37 : f32 to vector<4x64xf32>
    %196 = arith.addf %195, %194 : vector<4x64xf32>
    %197 = arith.divf %195, %196 : vector<4x64xf32>
    %198 = vector.extract_strided_slice %185 {offsets = [0, 128], sizes = [4, 64], strides = [1, 1]} : vector<4x256xf32> to vector<4x64xf32>
    %199 = math.tanh %198 : vector<4x64xf32>
    %200 = vector.extract_strided_slice %185 {offsets = [0, 192], sizes = [4, 64], strides = [1, 1]} : vector<4x256xf32> to vector<4x64xf32>
    %201 = arith.negf %200 : vector<4x64xf32>
    %202 = math.exp %201 : vector<4x64xf32>
    %cst_38 = arith.constant 1.000000e+00 : f32
    %203 = vector.broadcast %cst_38 : f32 to vector<4x64xf32>
    %204 = arith.addf %203, %202 : vector<4x64xf32>
    %205 = arith.divf %203, %204 : vector<4x64xf32>
    %206 = arith.mulf %197, %174 : vector<4x64xf32>
    %207 = arith.mulf %191, %199 : vector<4x64xf32>
    %208 = arith.addf %206, %207 : vector<4x64xf32>
    %209 = math.tanh %208 : vector<4x64xf32>
    %210 = arith.mulf %205, %209 : vector<4x64xf32>
    %211 = vector.extract_strided_slice %1 {offsets = [1, 0, 0], sizes = [1, 4, 32], strides = [1, 1, 1]} : vector<8x4x32xf32> to vector<1x4x32xf32>
    %212 = vector.shape_cast %211 : vector<1x4x32xf32> to vector<4x32xf32>
    %213 = arith.truncf %212 : vector<4x32xf32> to vector<4x32xbf16>
    %cst_39 = arith.constant dense<0.000000e+00> : vector<4x256xf32>
    %214 = tpu.matmul %213, %2, %cst_39 {dimension_numbers = #tpu.dot_dimension_numbers<[1], [0], [0], [1], [0, 0, 1, 1], [], []>} : vector<4x32xbf16>, vector<32x256xbf16>, vector<4x256xf32> -> vector<4x256xf32>
    %215 = arith.truncf %210 : vector<4x64xf32> to vector<4x64xbf16>
    %cst_40 = arith.constant dense<0.000000e+00> : vector<4x256xf32>
    %216 = tpu.matmul %215, %3, %cst_40 {dimension_numbers = #tpu.dot_dimension_numbers<[1], [0], [0], [1], [0, 0, 1, 1], [], []>} : vector<4x64xbf16>, vector<64x256xbf16>, vector<4x256xf32> -> vector<4x256xf32>
    %217 = arith.addf %214, %216 : vector<4x256xf32>
    %218 = vector.broadcast %4 : vector<1x256xf32> to vector<4x256xf32>
    %219 = arith.addf %217, %218 : vector<4x256xf32>
    %220 = vector.extract_strided_slice %219 {offsets = [0, 0], sizes = [4, 64], strides = [1, 1]} : vector<4x256xf32> to vector<4x64xf32>
    %221 = arith.negf %220 : vector<4x64xf32>
    %222 = math.exp %221 : vector<4x64xf32>
    %cst_41 = arith.constant 1.000000e+00 : f32
    %223 = vector.broadcast %cst_41 : f32 to vector<4x64xf32>
    %224 = arith.addf %223, %222 : vector<4x64xf32>
    %225 = arith.divf %223, %224 : vector<4x64xf32>
    %226 = vector.extract_strided_slice %219 {offsets = [0, 64], sizes = [4, 64], strides = [1, 1]} : vector<4x256xf32> to vector<4x64xf32>
    %227 = arith.negf %226 : vector<4x64xf32>
    %228 = math.exp %227 : vector<4x64xf32>
    %cst_42 = arith.constant 1.000000e+00 : f32
    %229 = vector.broadcast %cst_42 : f32 to vector<4x64xf32>
    %230 = arith.addf %229, %228 : vector<4x64xf32>
    %231 = arith.divf %229, %230 : vector<4x64xf32>
    %232 = vector.extract_strided_slice %219 {offsets = [0, 128], sizes = [4, 64], strides = [1, 1]} : vector<4x256xf32> to vector<4x64xf32>
    %233 = math.tanh %232 : vector<4x64xf32>
    %234 = vector.extract_strided_slice %219 {offsets = [0, 192], sizes = [4, 64], strides = [1, 1]} : vector<4x256xf32> to vector<4x64xf32>
    %235 = arith.negf %234 : vector<4x64xf32>
    %236 = math.exp %235 : vector<4x64xf32>
    %cst_43 = arith.constant 1.000000e+00 : f32
    %237 = vector.broadcast %cst_43 : f32 to vector<4x64xf32>
    %238 = arith.addf %237, %236 : vector<4x64xf32>
    %239 = arith.divf %237, %238 : vector<4x64xf32>
    %240 = arith.mulf %231, %208 : vector<4x64xf32>
    %241 = arith.mulf %225, %233 : vector<4x64xf32>
    %242 = arith.addf %240, %241 : vector<4x64xf32>
    %243 = math.tanh %242 : vector<4x64xf32>
    %244 = arith.mulf %239, %243 : vector<4x64xf32>
    %245 = vector.extract_strided_slice %1 {offsets = [0, 0, 0], sizes = [1, 4, 32], strides = [1, 1, 1]} : vector<8x4x32xf32> to vector<1x4x32xf32>
    %246 = vector.shape_cast %245 : vector<1x4x32xf32> to vector<4x32xf32>
    %247 = arith.truncf %246 : vector<4x32xf32> to vector<4x32xbf16>
    %cst_44 = arith.constant dense<0.000000e+00> : vector<4x256xf32>
    %248 = tpu.matmul %247, %2, %cst_44 {dimension_numbers = #tpu.dot_dimension_numbers<[1], [0], [0], [1], [0, 0, 1, 1], [], []>} : vector<4x32xbf16>, vector<32x256xbf16>, vector<4x256xf32> -> vector<4x256xf32>
    %249 = arith.truncf %244 : vector<4x64xf32> to vector<4x64xbf16>
    %cst_45 = arith.constant dense<0.000000e+00> : vector<4x256xf32>
    %250 = tpu.matmul %249, %3, %cst_45 {dimension_numbers = #tpu.dot_dimension_numbers<[1], [0], [0], [1], [0, 0, 1, 1], [], []>} : vector<4x64xbf16>, vector<64x256xbf16>, vector<4x256xf32> -> vector<4x256xf32>
    %251 = arith.addf %248, %250 : vector<4x256xf32>
    %252 = vector.broadcast %4 : vector<1x256xf32> to vector<4x256xf32>
    %253 = arith.addf %251, %252 : vector<4x256xf32>
    %254 = vector.extract_strided_slice %253 {offsets = [0, 0], sizes = [4, 64], strides = [1, 1]} : vector<4x256xf32> to vector<4x64xf32>
    %255 = arith.negf %254 : vector<4x64xf32>
    %256 = math.exp %255 : vector<4x64xf32>
    %cst_46 = arith.constant 1.000000e+00 : f32
    %257 = vector.broadcast %cst_46 : f32 to vector<4x64xf32>
    %258 = arith.addf %257, %256 : vector<4x64xf32>
    %259 = arith.divf %257, %258 : vector<4x64xf32>
    %260 = vector.extract_strided_slice %253 {offsets = [0, 64], sizes = [4, 64], strides = [1, 1]} : vector<4x256xf32> to vector<4x64xf32>
    %261 = arith.negf %260 : vector<4x64xf32>
    %262 = math.exp %261 : vector<4x64xf32>
    %cst_47 = arith.constant 1.000000e+00 : f32
    %263 = vector.broadcast %cst_47 : f32 to vector<4x64xf32>
    %264 = arith.addf %263, %262 : vector<4x64xf32>
    %265 = arith.divf %263, %264 : vector<4x64xf32>
    %266 = vector.extract_strided_slice %253 {offsets = [0, 128], sizes = [4, 64], strides = [1, 1]} : vector<4x256xf32> to vector<4x64xf32>
    %267 = math.tanh %266 : vector<4x64xf32>
    %268 = vector.extract_strided_slice %253 {offsets = [0, 192], sizes = [4, 64], strides = [1, 1]} : vector<4x256xf32> to vector<4x64xf32>
    %269 = arith.negf %268 : vector<4x64xf32>
    %270 = math.exp %269 : vector<4x64xf32>
    %cst_48 = arith.constant 1.000000e+00 : f32
    %271 = vector.broadcast %cst_48 : f32 to vector<4x64xf32>
    %272 = arith.addf %271, %270 : vector<4x64xf32>
    %273 = arith.divf %271, %272 : vector<4x64xf32>
    %274 = arith.mulf %265, %242 : vector<4x64xf32>
    %275 = arith.mulf %259, %267 : vector<4x64xf32>
    %276 = arith.addf %274, %275 : vector<4x64xf32>
    %277 = math.tanh %276 : vector<4x64xf32>
    %278 = arith.mulf %273, %277 : vector<4x64xf32>
    %c0_49 = arith.constant 0 : index
    %c0_50 = arith.constant 0 : index
    %279 = vector.load %arg6[%c0_49, %c0_50] : memref<32x128xbf16, #tpu.memory_space<vmem>>, vector<32x128xbf16>
    %c0_51 = arith.constant 0 : index
    %c0_52 = arith.constant 0 : index
    %280 = vector.load %arg10[%c0_51, %c0_52] : memref<32x128xbf16, #tpu.memory_space<vmem>>, vector<32x128xbf16>
    %c0_53 = arith.constant 0 : index
    %c0_54 = arith.constant 0 : index
    %281 = vector.load %arg7[%c0_53, %c0_54] : memref<1x128xf32, #tpu.memory_space<vmem>>, vector<1x128xf32>
    %c0_55 = arith.constant 0 : index
    %c0_56 = arith.constant 0 : index
    %282 = vector.load %arg11[%c0_55, %c0_56] : memref<1x128xf32, #tpu.memory_space<vmem>>, vector<1x128xf32>
    %c0_57 = arith.constant 0 : index
    %c0_58 = arith.constant 0 : index
    %283 = vector.load %arg12[%c0_57, %c0_58] : memref<32x128xbf16, #tpu.memory_space<vmem>>, vector<32x128xbf16>
    %c0_59 = arith.constant 0 : index
    %c0_60 = arith.constant 0 : index
    %284 = vector.load %arg13[%c0_59, %c0_60] : memref<1x128xf32, #tpu.memory_space<vmem>>, vector<1x128xf32>
    %c0_61 = arith.constant 0 : index
    %c0_62 = arith.constant 0 : index
    %285 = vector.load %arg16[%c0_61, %c0_62] : memref<3x1xi32, #tpu.memory_space<vmem>>, vector<3x1xi32>
    %c0_63 = arith.constant 0 : index
    %c0_64 = arith.constant 0 : index
    %286 = vector.load %arg17[%c0_63, %c0_64] : memref<3x1xi32, #tpu.memory_space<vmem>>, vector<3x1xi32>
    %287 = tpu.iota {dimensions = array<i32: 1>} : vector<3x128xi32>
    %288 = vector.extract_strided_slice %278 {offsets = [1, 0], sizes = [3, 64], strides = [1, 1]} : vector<4x64xf32> to vector<3x64xf32>
    %289 = arith.truncf %288 : vector<3x64xf32> to vector<3x64xbf16>
    %c0_65 = arith.constant 0 : index
    %c0_66 = arith.constant 0 : index
    %290 = vector.load %arg4[%c0_65, %c0_66] : memref<64x128xbf16, #tpu.memory_space<vmem>>, vector<64x128xbf16>
    %cst_67 = arith.constant dense<0.000000e+00> : vector<3x128xf32>
    %291 = tpu.matmul %289, %290, %cst_67 {dimension_numbers = #tpu.dot_dimension_numbers<[1], [0], [0], [1], [0, 0, 1, 1], [], []>} : vector<3x64xbf16>, vector<64x128xbf16>, vector<3x128xf32> -> vector<3x128xf32>
    %292 = vector.broadcast %281 : vector<1x128xf32> to vector<3x128xf32>
    %293 = arith.addf %291, %292 : vector<3x128xf32>
    %294 = vector.extract_strided_slice %278 {offsets = [0, 0], sizes = [3, 64], strides = [1, 1]} : vector<4x64xf32> to vector<3x64xf32>
    %295 = arith.truncf %294 : vector<3x64xf32> to vector<3x64xbf16>
    %c0_68 = arith.constant 0 : index
    %c0_69 = arith.constant 0 : index
    %296 = vector.load %arg8[%c0_68, %c0_69] : memref<64x128xbf16, #tpu.memory_space<vmem>>, vector<64x128xbf16>
    %cst_70 = arith.constant dense<0.000000e+00> : vector<3x128xf32>
    %297 = tpu.matmul %295, %296, %cst_70 {dimension_numbers = #tpu.dot_dimension_numbers<[1], [0], [0], [1], [0, 0, 1, 1], [], []>} : vector<3x64xbf16>, vector<64x128xbf16>, vector<3x128xf32> -> vector<3x128xf32>
    %298 = vector.broadcast %282 : vector<1x128xf32> to vector<3x128xf32>
    %299 = arith.addf %297, %298 : vector<3x128xf32>
    %cst_71 = arith.constant 0.000000e+00 : f32
    %300 = vector.broadcast %cst_71 : f32 to vector<3x32xf32>
    %cst_72 = arith.constant 0.000000e+00 : f32
    %301 = vector.broadcast %cst_72 : f32 to vector<3x32xf32>
    %cst_73 = arith.constant 0.000000e+00 : f32
    %302 = vector.broadcast %cst_73 : f32 to vector<3x32xf32>
    %cst_74 = arith.constant 0.000000e+00 : f32
    %303 = vector.broadcast %cst_74 : f32 to vector<3x32xf32>
    %304 = arith.truncf %300 : vector<3x32xf32> to vector<3x32xbf16>
    %cst_75 = arith.constant dense<0.000000e+00> : vector<3x128xf32>
    %305 = tpu.matmul %304, %279, %cst_75 {dimension_numbers = #tpu.dot_dimension_numbers<[1], [0], [0], [1], [0, 0, 1, 1], [], []>} : vector<3x32xbf16>, vector<32x128xbf16>, vector<3x128xf32> -> vector<3x128xf32>
    %306 = arith.addf %293, %305 : vector<3x128xf32>
    %307 = arith.truncf %302 : vector<3x32xf32> to vector<3x32xbf16>
    %cst_76 = arith.constant dense<0.000000e+00> : vector<3x128xf32>
    %308 = tpu.matmul %307, %280, %cst_76 {dimension_numbers = #tpu.dot_dimension_numbers<[1], [0], [0], [1], [0, 0, 1, 1], [], []>} : vector<3x32xbf16>, vector<32x128xbf16>, vector<3x128xf32> -> vector<3x128xf32>
    %309 = arith.addf %299, %308 : vector<3x128xf32>
    %310 = vector.extract_strided_slice %306 {offsets = [0, 0], sizes = [3, 32], strides = [1, 1]} : vector<3x128xf32> to vector<3x32xf32>
    %311 = arith.negf %310 : vector<3x32xf32>
    %312 = math.exp %311 : vector<3x32xf32>
    %cst_77 = arith.constant 1.000000e+00 : f32
    %313 = vector.broadcast %cst_77 : f32 to vector<3x32xf32>
    %314 = arith.addf %313, %312 : vector<3x32xf32>
    %315 = arith.divf %313, %314 : vector<3x32xf32>
    %316 = vector.extract_strided_slice %306 {offsets = [0, 32], sizes = [3, 32], strides = [1, 1]} : vector<3x128xf32> to vector<3x32xf32>
    %317 = arith.negf %316 : vector<3x32xf32>
    %318 = math.exp %317 : vector<3x32xf32>
    %cst_78 = arith.constant 1.000000e+00 : f32
    %319 = vector.broadcast %cst_78 : f32 to vector<3x32xf32>
    %320 = arith.addf %319, %318 : vector<3x32xf32>
    %321 = arith.divf %319, %320 : vector<3x32xf32>
    %322 = vector.extract_strided_slice %306 {offsets = [0, 64], sizes = [3, 32], strides = [1, 1]} : vector<3x128xf32> to vector<3x32xf32>
    %323 = math.tanh %322 : vector<3x32xf32>
    %324 = vector.extract_strided_slice %306 {offsets = [0, 96], sizes = [3, 32], strides = [1, 1]} : vector<3x128xf32> to vector<3x32xf32>
    %325 = arith.negf %324 : vector<3x32xf32>
    %326 = math.exp %325 : vector<3x32xf32>
    %cst_79 = arith.constant 1.000000e+00 : f32
    %327 = vector.broadcast %cst_79 : f32 to vector<3x32xf32>
    %328 = arith.addf %327, %326 : vector<3x32xf32>
    %329 = arith.divf %327, %328 : vector<3x32xf32>
    %330 = arith.mulf %321, %301 : vector<3x32xf32>
    %331 = arith.mulf %315, %323 : vector<3x32xf32>
    %332 = arith.addf %330, %331 : vector<3x32xf32>
    %333 = math.tanh %332 : vector<3x32xf32>
    %334 = arith.mulf %329, %333 : vector<3x32xf32>
    %335 = vector.extract_strided_slice %309 {offsets = [0, 0], sizes = [3, 32], strides = [1, 1]} : vector<3x128xf32> to vector<3x32xf32>
    %336 = arith.negf %335 : vector<3x32xf32>
    %337 = math.exp %336 : vector<3x32xf32>
    %cst_80 = arith.constant 1.000000e+00 : f32
    %338 = vector.broadcast %cst_80 : f32 to vector<3x32xf32>
    %339 = arith.addf %338, %337 : vector<3x32xf32>
    %340 = arith.divf %338, %339 : vector<3x32xf32>
    %341 = vector.extract_strided_slice %309 {offsets = [0, 32], sizes = [3, 32], strides = [1, 1]} : vector<3x128xf32> to vector<3x32xf32>
    %342 = arith.negf %341 : vector<3x32xf32>
    %343 = math.exp %342 : vector<3x32xf32>
    %cst_81 = arith.constant 1.000000e+00 : f32
    %344 = vector.broadcast %cst_81 : f32 to vector<3x32xf32>
    %345 = arith.addf %344, %343 : vector<3x32xf32>
    %346 = arith.divf %344, %345 : vector<3x32xf32>
    %347 = vector.extract_strided_slice %309 {offsets = [0, 64], sizes = [3, 32], strides = [1, 1]} : vector<3x128xf32> to vector<3x32xf32>
    %348 = math.tanh %347 : vector<3x32xf32>
    %349 = vector.extract_strided_slice %309 {offsets = [0, 96], sizes = [3, 32], strides = [1, 1]} : vector<3x128xf32> to vector<3x32xf32>
    %350 = arith.negf %349 : vector<3x32xf32>
    %351 = math.exp %350 : vector<3x32xf32>
    %cst_82 = arith.constant 1.000000e+00 : f32
    %352 = vector.broadcast %cst_82 : f32 to vector<3x32xf32>
    %353 = arith.addf %352, %351 : vector<3x32xf32>
    %354 = arith.divf %352, %353 : vector<3x32xf32>
    %355 = arith.mulf %346, %303 : vector<3x32xf32>
    %356 = arith.mulf %340, %348 : vector<3x32xf32>
    %357 = arith.addf %355, %356 : vector<3x32xf32>
    %358 = math.tanh %357 : vector<3x32xf32>
    %359 = arith.mulf %354, %358 : vector<3x32xf32>
    %360 = arith.truncf %334 : vector<3x32xf32> to vector<3x32xbf16>
    %cst_83 = arith.constant dense<0.000000e+00> : vector<3x128xf32>
    %361 = tpu.matmul %360, %283, %cst_83 {dimension_numbers = #tpu.dot_dimension_numbers<[1], [0], [0], [1], [0, 0, 1, 1], [], []>} : vector<3x32xbf16>, vector<32x128xbf16>, vector<3x128xf32> -> vector<3x128xf32>
    %362 = vector.broadcast %284 : vector<1x128xf32> to vector<3x128xf32>
    %363 = arith.addf %361, %362 : vector<3x128xf32>
    %364 = arith.truncf %359 : vector<3x32xf32> to vector<3x32xbf16>
    %cst_84 = arith.constant dense<0.000000e+00> : vector<3x128xf32>
    %365 = tpu.matmul %364, %283, %cst_84 {dimension_numbers = #tpu.dot_dimension_numbers<[1], [0], [0], [1], [0, 0, 1, 1], [], []>} : vector<3x32xbf16>, vector<32x128xbf16>, vector<3x128xf32> -> vector<3x128xf32>
    %366 = vector.broadcast %284 : vector<1x128xf32> to vector<3x128xf32>
    %367 = arith.addf %365, %366 : vector<3x128xf32>
    %c0_85 = arith.constant 0 : index
    %c0_86 = arith.constant 0 : index
    %c0_87 = arith.constant 0 : index
    %368 = vector.load %arg18[%c0_85, %c0_86, %c0_87] : memref<8x3x128xf32, #tpu.memory_space<vmem>>, vector<1x3x128xf32>
    %369 = vector.shape_cast %368 : vector<1x3x128xf32> to vector<3x128xf32>
    %370 = vector.shape_cast %363 : vector<3x128xf32> to vector<1x3x128xf32>
    tpu.vector_store %arg18[%c0_85, %c0_86, %c0_87], %370 {strides = array<i32>} : memref<8x3x128xf32, #tpu.memory_space<vmem>>, vector<1x3x128xf32>,
    %c0_88 = arith.constant 0 : index
    %c0_89 = arith.constant 0 : index
    %c0_90 = arith.constant 0 : index
    %371 = vector.load %arg19[%c0_88, %c0_89, %c0_90] : memref<8x3x128xf32, #tpu.memory_space<vmem>>, vector<1x3x128xf32>
    %372 = vector.shape_cast %371 : vector<1x3x128xf32> to vector<3x128xf32>
    %373 = vector.shape_cast %367 : vector<3x128xf32> to vector<1x3x128xf32>
    tpu.vector_store %arg19[%c0_88, %c0_89, %c0_90], %373 {strides = array<i32>} : memref<8x3x128xf32, #tpu.memory_space<vmem>>, vector<1x3x128xf32>,
    %c0_i32 = arith.constant 0 : i32
    %374 = vector.broadcast %c0_i32 : i32 to vector<3x1xi32>
    %375 = arith.cmpi sgt, %285, %374 : vector<3x1xi32>
    %376 = arith.extui %375 : vector<3x1xi1> to vector<3x1xi32>
    %377 = arith.sitofp %376 : vector<3x1xi32> to vector<3x1xf32>
    %c0_i32_91 = arith.constant 0 : i32
    %378 = vector.broadcast %c0_i32_91 : i32 to vector<3x1xi32>
    %379 = arith.cmpi sgt, %286, %378 : vector<3x1xi32>
    %380 = arith.extui %379 : vector<3x1xi1> to vector<3x1xi32>
    %381 = arith.sitofp %380 : vector<3x1xi32> to vector<3x1xf32>
    %c0_92 = arith.constant 0 : index
    %c0_93 = arith.constant 0 : index
    %c0_94 = arith.constant 0 : index
    %382 = vector.load %arg14[%c0_92, %c0_93, %c0_94] : memref<8x3x1xi32, #tpu.memory_space<vmem>>, vector<1x3x1xi32>
    %383 = vector.shape_cast %382 : vector<1x3x1xi32> to vector<3x1xi32>
    %384 = vector.broadcast %377 : vector<3x1xf32> to vector<3x128xf32>
    %385 = arith.mulf %363, %384 : vector<3x128xf32>
    %cst_95 = arith.constant dense<0xFF800000> : vector<3xf32>
    %386 = vector.multi_reduction <maximumf>, %385, %cst_95 [1] : vector<3x128xf32> to vector<3xf32>
    %387 = vector.shape_cast %386 : vector<3xf32> to vector<3x1xf32>
    %388 = vector.broadcast %387 : vector<3x1xf32> to vector<3x128xf32>
    %389 = arith.subf %385, %388 : vector<3x128xf32>
    %390 = math.exp %389 : vector<3x128xf32>
    %cst_96 = arith.constant dense<0.000000e+00> : vector<3xf32>
    %391 = vector.multi_reduction <add>, %390, %cst_96 [1] : vector<3x128xf32> to vector<3xf32>
    %392 = vector.shape_cast %391 : vector<3xf32> to vector<3x1xf32>
    %393 = math.log %392 : vector<3x1xf32>
    %394 = vector.broadcast %393 : vector<3x1xf32> to vector<3x128xf32>
    %395 = arith.subf %389, %394 : vector<3x128xf32>
    %396 = vector.broadcast %383 : vector<3x1xi32> to vector<3x128xi32>
    %397 = arith.cmpi eq, %287, %396 : vector<3x128xi32>
    %cst_97 = arith.constant 0.000000e+00 : f32
    %398 = vector.broadcast %cst_97 : f32 to vector<3x128xf32>
    %399 = arith.select %397, %395, %398 : vector<3x128xi1>, vector<3x128xf32>
    %400 = vector.shape_cast %399 : vector<3x128xf32> to vector<1x3x128xf32>
    %cst_98 = arith.constant dense<0.000000e+00> : vector<1xf32>
    %401 = vector.multi_reduction <add>, %400, %cst_98 [1, 2] : vector<1x3x128xf32> to vector<1xf32>
    %402 = vector.shape_cast %401 : vector<1xf32> to vector<1x1x1xf32>
    %403 = vector.extract %402[0, 0, 0] : f32 from vector<1x1x1xf32>
    %cst_99 = arith.constant 0.000000e+00 : f32
    %404 = arith.subf %cst_99, %403 : f32
    %cst_100 = arith.constant 0.000000e+00 : f32
    %405 = arith.addf %cst_100, %404 : f32
    %c0_101 = arith.constant 0 : index
    %c0_102 = arith.constant 0 : index
    %c0_103 = arith.constant 0 : index
    %406 = vector.load %arg15[%c0_101, %c0_102, %c0_103] : memref<8x3x1xi32, #tpu.memory_space<vmem>>, vector<1x3x1xi32>
    %407 = vector.shape_cast %406 : vector<1x3x1xi32> to vector<3x1xi32>
    %408 = vector.broadcast %381 : vector<3x1xf32> to vector<3x128xf32>
    %409 = arith.mulf %367, %408 : vector<3x128xf32>
    %cst_104 = arith.constant dense<0xFF800000> : vector<3xf32>
    %410 = vector.multi_reduction <maximumf>, %409, %cst_104 [1] : vector<3x128xf32> to vector<3xf32>
    %411 = vector.shape_cast %410 : vector<3xf32> to vector<3x1xf32>
    %412 = vector.broadcast %411 : vector<3x1xf32> to vector<3x128xf32>
    %413 = arith.subf %409, %412 : vector<3x128xf32>
    %414 = math.exp %413 : vector<3x128xf32>
    %cst_105 = arith.constant dense<0.000000e+00> : vector<3xf32>
    %415 = vector.multi_reduction <add>, %414, %cst_105 [1] : vector<3x128xf32> to vector<3xf32>
    %416 = vector.shape_cast %415 : vector<3xf32> to vector<3x1xf32>
    %417 = math.log %416 : vector<3x1xf32>
    %418 = vector.broadcast %417 : vector<3x1xf32> to vector<3x128xf32>
    %419 = arith.subf %413, %418 : vector<3x128xf32>
    %420 = vector.broadcast %407 : vector<3x1xi32> to vector<3x128xi32>
    %421 = arith.cmpi eq, %287, %420 : vector<3x128xi32>
    %cst_106 = arith.constant 0.000000e+00 : f32
    %422 = vector.broadcast %cst_106 : f32 to vector<3x128xf32>
    %423 = arith.select %421, %419, %422 : vector<3x128xi1>, vector<3x128xf32>
    %424 = vector.shape_cast %423 : vector<3x128xf32> to vector<1x3x128xf32>
    %cst_107 = arith.constant dense<0.000000e+00> : vector<1xf32>
    %425 = vector.multi_reduction <add>, %424, %cst_107 [1, 2] : vector<1x3x128xf32> to vector<1xf32>
    %426 = vector.shape_cast %425 : vector<1xf32> to vector<1x1x1xf32>
    %427 = vector.extract %426[0, 0, 0] : f32 from vector<1x1x1xf32>
    %cst_108 = arith.constant 0.000000e+00 : f32
    %428 = arith.subf %cst_108, %427 : f32
    %429 = arith.addf %405, %428 : f32
    %430 = vector.extract_strided_slice %1 {offsets = [0, 0, 0], sizes = [1, 3, 32], strides = [1, 1, 1]} : vector<8x4x32xf32> to vector<1x3x32xf32>
    %431 = vector.shape_cast %430 : vector<1x3x32xf32> to vector<3x32xf32>
    %432 = arith.truncf %431 : vector<3x32xf32> to vector<3x32xbf16>
    %433 = vector.extract_strided_slice %1 {offsets = [0, 1, 0], sizes = [1, 3, 32], strides = [1, 1, 1]} : vector<8x4x32xf32> to vector<1x3x32xf32>
    %434 = vector.shape_cast %433 : vector<1x3x32xf32> to vector<3x32xf32>
    %435 = arith.truncf %434 : vector<3x32xf32> to vector<3x32xbf16>
    %c0_109 = arith.constant 0 : index
    %c0_110 = arith.constant 0 : index
    %436 = vector.load %arg5[%c0_109, %c0_110] : memref<32x128xbf16, #tpu.memory_space<vmem>>, vector<32x128xbf16>
    %cst_111 = arith.constant dense<0.000000e+00> : vector<3x128xf32>
    %437 = tpu.matmul %432, %436, %cst_111 {dimension_numbers = #tpu.dot_dimension_numbers<[1], [0], [0], [1], [0, 0, 1, 1], [], []>} : vector<3x32xbf16>, vector<32x128xbf16>, vector<3x128xf32> -> vector<3x128xf32>
    %438 = arith.addf %293, %437 : vector<3x128xf32>
    %c0_112 = arith.constant 0 : index
    %c0_113 = arith.constant 0 : index
    %439 = vector.load %arg9[%c0_112, %c0_113] : memref<32x128xbf16, #tpu.memory_space<vmem>>, vector<32x128xbf16>
    %cst_114 = arith.constant dense<0.000000e+00> : vector<3x128xf32>
    %440 = tpu.matmul %435, %439, %cst_114 {dimension_numbers = #tpu.dot_dimension_numbers<[1], [0], [0], [1], [0, 0, 1, 1], [], []>} : vector<3x32xbf16>, vector<32x128xbf16>, vector<3x128xf32> -> vector<3x128xf32>
    %441 = arith.addf %299, %440 : vector<3x128xf32>
    %442 = arith.truncf %334 : vector<3x32xf32> to vector<3x32xbf16>
    %cst_115 = arith.constant dense<0.000000e+00> : vector<3x128xf32>
    %443 = tpu.matmul %442, %279, %cst_115 {dimension_numbers = #tpu.dot_dimension_numbers<[1], [0], [0], [1], [0, 0, 1, 1], [], []>} : vector<3x32xbf16>, vector<32x128xbf16>, vector<3x128xf32> -> vector<3x128xf32>
    %444 = arith.addf %438, %443 : vector<3x128xf32>
    %445 = arith.truncf %359 : vector<3x32xf32> to vector<3x32xbf16>
    %cst_116 = arith.constant dense<0.000000e+00> : vector<3x128xf32>
    %446 = tpu.matmul %445, %280, %cst_116 {dimension_numbers = #tpu.dot_dimension_numbers<[1], [0], [0], [1], [0, 0, 1, 1], [], []>} : vector<3x32xbf16>, vector<32x128xbf16>, vector<3x128xf32> -> vector<3x128xf32>
    %447 = arith.addf %441, %446 : vector<3x128xf32>
    %448 = vector.extract_strided_slice %444 {offsets = [0, 0], sizes = [3, 32], strides = [1, 1]} : vector<3x128xf32> to vector<3x32xf32>
    %449 = arith.negf %448 : vector<3x32xf32>
    %450 = math.exp %449 : vector<3x32xf32>
    %cst_117 = arith.constant 1.000000e+00 : f32
    %451 = vector.broadcast %cst_117 : f32 to vector<3x32xf32>
    %452 = arith.addf %451, %450 : vector<3x32xf32>
    %453 = arith.divf %451, %452 : vector<3x32xf32>
    %454 = vector.extract_strided_slice %444 {offsets = [0, 32], sizes = [3, 32], strides = [1, 1]} : vector<3x128xf32> to vector<3x32xf32>
    %455 = arith.negf %454 : vector<3x32xf32>
    %456 = math.exp %455 : vector<3x32xf32>
    %cst_118 = arith.constant 1.000000e+00 : f32
    %457 = vector.broadcast %cst_118 : f32 to vector<3x32xf32>
    %458 = arith.addf %457, %456 : vector<3x32xf32>
    %459 = arith.divf %457, %458 : vector<3x32xf32>
    %460 = vector.extract_strided_slice %444 {offsets = [0, 64], sizes = [3, 32], strides = [1, 1]} : vector<3x128xf32> to vector<3x32xf32>
    %461 = math.tanh %460 : vector<3x32xf32>
    %462 = vector.extract_strided_slice %444 {offsets = [0, 96], sizes = [3, 32], strides = [1, 1]} : vector<3x128xf32> to vector<3x32xf32>
    %463 = arith.negf %462 : vector<3x32xf32>
    %464 = math.exp %463 : vector<3x32xf32>
    %cst_119 = arith.constant 1.000000e+00 : f32
    %465 = vector.broadcast %cst_119 : f32 to vector<3x32xf32>
    %466 = arith.addf %465, %464 : vector<3x32xf32>
    %467 = arith.divf %465, %466 : vector<3x32xf32>
    %468 = arith.mulf %459, %332 : vector<3x32xf32>
    %469 = arith.mulf %453, %461 : vector<3x32xf32>
    %470 = arith.addf %468, %469 : vector<3x32xf32>
    %471 = math.tanh %470 : vector<3x32xf32>
    %472 = arith.mulf %467, %471 : vector<3x32xf32>
    %473 = vector.extract_strided_slice %447 {offsets = [0, 0], sizes = [3, 32], strides = [1, 1]} : vector<3x128xf32> to vector<3x32xf32>
    %474 = arith.negf %473 : vector<3x32xf32>
    %475 = math.exp %474 : vector<3x32xf32>
    %cst_120 = arith.constant 1.000000e+00 : f32
    %476 = vector.broadcast %cst_120 : f32 to vector<3x32xf32>
    %477 = arith.addf %476, %475 : vector<3x32xf32>
    %478 = arith.divf %476, %477 : vector<3x32xf32>
    %479 = vector.extract_strided_slice %447 {offsets = [0, 32], sizes = [3, 32], strides = [1, 1]} : vector<3x128xf32> to vector<3x32xf32>
    %480 = arith.negf %479 : vector<3x32xf32>
    %481 = math.exp %480 : vector<3x32xf32>
    %cst_121 = arith.constant 1.000000e+00 : f32
    %482 = vector.broadcast %cst_121 : f32 to vector<3x32xf32>
    %483 = arith.addf %482, %481 : vector<3x32xf32>
    %484 = arith.divf %482, %483 : vector<3x32xf32>
    %485 = vector.extract_strided_slice %447 {offsets = [0, 64], sizes = [3, 32], strides = [1, 1]} : vector<3x128xf32> to vector<3x32xf32>
    %486 = math.tanh %485 : vector<3x32xf32>
    %487 = vector.extract_strided_slice %447 {offsets = [0, 96], sizes = [3, 32], strides = [1, 1]} : vector<3x128xf32> to vector<3x32xf32>
    %488 = arith.negf %487 : vector<3x32xf32>
    %489 = math.exp %488 : vector<3x32xf32>
    %cst_122 = arith.constant 1.000000e+00 : f32
    %490 = vector.broadcast %cst_122 : f32 to vector<3x32xf32>
    %491 = arith.addf %490, %489 : vector<3x32xf32>
    %492 = arith.divf %490, %491 : vector<3x32xf32>
    %493 = arith.mulf %484, %357 : vector<3x32xf32>
    %494 = arith.mulf %478, %486 : vector<3x32xf32>
    %495 = arith.addf %493, %494 : vector<3x32xf32>
    %496 = math.tanh %495 : vector<3x32xf32>
    %497 = arith.mulf %492, %496 : vector<3x32xf32>
    %498 = arith.truncf %472 : vector<3x32xf32> to vector<3x32xbf16>
    %cst_123 = arith.constant dense<0.000000e+00> : vector<3x128xf32>
    %499 = tpu.matmul %498, %283, %cst_123 {dimension_numbers = #tpu.dot_dimension_numbers<[1], [0], [0], [1], [0, 0, 1, 1], [], []>} : vector<3x32xbf16>, vector<32x128xbf16>, vector<3x128xf32> -> vector<3x128xf32>
    %500 = vector.broadcast %284 : vector<1x128xf32> to vector<3x128xf32>
    %501 = arith.addf %499, %500 : vector<3x128xf32>
    %502 = arith.truncf %497 : vector<3x32xf32> to vector<3x32xbf16>
    %cst_124 = arith.constant dense<0.000000e+00> : vector<3x128xf32>
    %503 = tpu.matmul %502, %283, %cst_124 {dimension_numbers = #tpu.dot_dimension_numbers<[1], [0], [0], [1], [0, 0, 1, 1], [], []>} : vector<3x32xbf16>, vector<32x128xbf16>, vector<3x128xf32> -> vector<3x128xf32>
    %504 = vector.broadcast %284 : vector<1x128xf32> to vector<3x128xf32>
    %505 = arith.addf %503, %504 : vector<3x128xf32>
    %c1 = arith.constant 1 : index
    %c0_125 = arith.constant 0 : index
    %c0_126 = arith.constant 0 : index
    %506 = vector.load %arg18[%c1, %c0_125, %c0_126] : memref<8x3x128xf32, #tpu.memory_space<vmem>>, vector<1x3x128xf32>
    %507 = vector.shape_cast %506 : vector<1x3x128xf32> to vector<3x128xf32>
    %508 = vector.shape_cast %501 : vector<3x128xf32> to vector<1x3x128xf32>
    tpu.vector_store %arg18[%c1, %c0_125, %c0_126], %508 {strides = array<i32>} : memref<8x3x128xf32, #tpu.memory_space<vmem>>, vector<1x3x128xf32>,
    %c1_127 = arith.constant 1 : index
    %c0_128 = arith.constant 0 : index
    %c0_129 = arith.constant 0 : index
    %509 = vector.load %arg19[%c1_127, %c0_128, %c0_129] : memref<8x3x128xf32, #tpu.memory_space<vmem>>, vector<1x3x128xf32>
    %510 = vector.shape_cast %509 : vector<1x3x128xf32> to vector<3x128xf32>
    %511 = vector.shape_cast %505 : vector<3x128xf32> to vector<1x3x128xf32>
    tpu.vector_store %arg19[%c1_127, %c0_128, %c0_129], %511 {strides = array<i32>} : memref<8x3x128xf32, #tpu.memory_space<vmem>>, vector<1x3x128xf32>,
    %c1_i32 = arith.constant 1 : i32
    %512 = vector.broadcast %c1_i32 : i32 to vector<3x1xi32>
    %513 = arith.cmpi sgt, %285, %512 : vector<3x1xi32>
    %514 = arith.extui %513 : vector<3x1xi1> to vector<3x1xi32>
    %515 = arith.sitofp %514 : vector<3x1xi32> to vector<3x1xf32>
    %c1_i32_130 = arith.constant 1 : i32
    %516 = vector.broadcast %c1_i32_130 : i32 to vector<3x1xi32>
    %517 = arith.cmpi sgt, %286, %516 : vector<3x1xi32>
    %518 = arith.extui %517 : vector<3x1xi1> to vector<3x1xi32>
    %519 = arith.sitofp %518 : vector<3x1xi32> to vector<3x1xf32>
    %c1_131 = arith.constant 1 : index
    %c0_132 = arith.constant 0 : index
    %c0_133 = arith.constant 0 : index
    %520 = vector.load %arg14[%c1_131, %c0_132, %c0_133] : memref<8x3x1xi32, #tpu.memory_space<vmem>>, vector<1x3x1xi32>
    %521 = vector.shape_cast %520 : vector<1x3x1xi32> to vector<3x1xi32>
    %522 = vector.broadcast %515 : vector<3x1xf32> to vector<3x128xf32>
    %523 = arith.mulf %501, %522 : vector<3x128xf32>
    %cst_134 = arith.constant dense<0xFF800000> : vector<3xf32>
    %524 = vector.multi_reduction <maximumf>, %523, %cst_134 [1] : vector<3x128xf32> to vector<3xf32>
    %525 = vector.shape_cast %524 : vector<3xf32> to vector<3x1xf32>
    %526 = vector.broadcast %525 : vector<3x1xf32> to vector<3x128xf32>
    %527 = arith.subf %523, %526 : vector<3x128xf32>
    %528 = math.exp %527 : vector<3x128xf32>
    %cst_135 = arith.constant dense<0.000000e+00> : vector<3xf32>
    %529 = vector.multi_reduction <add>, %528, %cst_135 [1] : vector<3x128xf32> to vector<3xf32>
    %530 = vector.shape_cast %529 : vector<3xf32> to vector<3x1xf32>
    %531 = math.log %530 : vector<3x1xf32>
    %532 = vector.broadcast %531 : vector<3x1xf32> to vector<3x128xf32>
    %533 = arith.subf %527, %532 : vector<3x128xf32>
    %534 = vector.broadcast %521 : vector<3x1xi32> to vector<3x128xi32>
    %535 = arith.cmpi eq, %287, %534 : vector<3x128xi32>
    %cst_136 = arith.constant 0.000000e+00 : f32
    %536 = vector.broadcast %cst_136 : f32 to vector<3x128xf32>
    %537 = arith.select %535, %533, %536 : vector<3x128xi1>, vector<3x128xf32>
    %538 = vector.shape_cast %537 : vector<3x128xf32> to vector<1x3x128xf32>
    %cst_137 = arith.constant dense<0.000000e+00> : vector<1xf32>
    %539 = vector.multi_reduction <add>, %538, %cst_137 [1, 2] : vector<1x3x128xf32> to vector<1xf32>
    %540 = vector.shape_cast %539 : vector<1xf32> to vector<1x1x1xf32>
    %541 = vector.extract %540[0, 0, 0] : f32 from vector<1x1x1xf32>
    %cst_138 = arith.constant 0.000000e+00 : f32
    %542 = arith.subf %cst_138, %541 : f32
    %543 = arith.addf %429, %542 : f32
    %c1_139 = arith.constant 1 : index
    %c0_140 = arith.constant 0 : index
    %c0_141 = arith.constant 0 : index
    %544 = vector.load %arg15[%c1_139, %c0_140, %c0_141] : memref<8x3x1xi32, #tpu.memory_space<vmem>>, vector<1x3x1xi32>
    %545 = vector.shape_cast %544 : vector<1x3x1xi32> to vector<3x1xi32>
    %546 = vector.broadcast %519 : vector<3x1xf32> to vector<3x128xf32>
    %547 = arith.mulf %505, %546 : vector<3x128xf32>
    %cst_142 = arith.constant dense<0xFF800000> : vector<3xf32>
    %548 = vector.multi_reduction <maximumf>, %547, %cst_142 [1] : vector<3x128xf32> to vector<3xf32>
    %549 = vector.shape_cast %548 : vector<3xf32> to vector<3x1xf32>
    %550 = vector.broadcast %549 : vector<3x1xf32> to vector<3x128xf32>
    %551 = arith.subf %547, %550 : vector<3x128xf32>
    %552 = math.exp %551 : vector<3x128xf32>
    %cst_143 = arith.constant dense<0.000000e+00> : vector<3xf32>
    %553 = vector.multi_reduction <add>, %552, %cst_143 [1] : vector<3x128xf32> to vector<3xf32>
    %554 = vector.shape_cast %553 : vector<3xf32> to vector<3x1xf32>
    %555 = math.log %554 : vector<3x1xf32>
    %556 = vector.broadcast %555 : vector<3x1xf32> to vector<3x128xf32>
    %557 = arith.subf %551, %556 : vector<3x128xf32>
    %558 = vector.broadcast %545 : vector<3x1xi32> to vector<3x128xi32>
    %559 = arith.cmpi eq, %287, %558 : vector<3x128xi32>
    %cst_144 = arith.constant 0.000000e+00 : f32
    %560 = vector.broadcast %cst_144 : f32 to vector<3x128xf32>
    %561 = arith.select %559, %557, %560 : vector<3x128xi1>, vector<3x128xf32>
    %562 = vector.shape_cast %561 : vector<3x128xf32> to vector<1x3x128xf32>
    %cst_145 = arith.constant dense<0.000000e+00> : vector<1xf32>
    %563 = vector.multi_reduction <add>, %562, %cst_145 [1, 2] : vector<1x3x128xf32> to vector<1xf32>
    %564 = vector.shape_cast %563 : vector<1xf32> to vector<1x1x1xf32>
    %565 = vector.extract %564[0, 0, 0] : f32 from vector<1x1x1xf32>
    %cst_146 = arith.constant 0.000000e+00 : f32
    %566 = arith.subf %cst_146, %565 : f32
    %567 = arith.addf %543, %566 : f32
    %568 = vector.extract_strided_slice %1 {offsets = [1, 0, 0], sizes = [1, 3, 32], strides = [1, 1, 1]} : vector<8x4x32xf32> to vector<1x3x32xf32>
    %569 = vector.shape_cast %568 : vector<1x3x32xf32> to vector<3x32xf32>
    %570 = arith.truncf %569 : vector<3x32xf32> to vector<3x32xbf16>
    %571 = vector.extract_strided_slice %1 {offsets = [1, 1, 0], sizes = [1, 3, 32], strides = [1, 1, 1]} : vector<8x4x32xf32> to vector<1x3x32xf32>
    %572 = vector.shape_cast %571 : vector<1x3x32xf32> to vector<3x32xf32>
    %573 = arith.truncf %572 : vector<3x32xf32> to vector<3x32xbf16>
    %c0_147 = arith.constant 0 : index
    %c0_148 = arith.constant 0 : index
    %574 = vector.load %arg5[%c0_147, %c0_148] : memref<32x128xbf16, #tpu.memory_space<vmem>>, vector<32x128xbf16>
    %cst_149 = arith.constant dense<0.000000e+00> : vector<3x128xf32>
    %575 = tpu.matmul %570, %574, %cst_149 {dimension_numbers = #tpu.dot_dimension_numbers<[1], [0], [0], [1], [0, 0, 1, 1], [], []>} : vector<3x32xbf16>, vector<32x128xbf16>, vector<3x128xf32> -> vector<3x128xf32>
    %576 = arith.addf %293, %575 : vector<3x128xf32>
    %c0_150 = arith.constant 0 : index
    %c0_151 = arith.constant 0 : index
    %577 = vector.load %arg9[%c0_150, %c0_151] : memref<32x128xbf16, #tpu.memory_space<vmem>>, vector<32x128xbf16>
    %cst_152 = arith.constant dense<0.000000e+00> : vector<3x128xf32>
    %578 = tpu.matmul %573, %577, %cst_152 {dimension_numbers = #tpu.dot_dimension_numbers<[1], [0], [0], [1], [0, 0, 1, 1], [], []>} : vector<3x32xbf16>, vector<32x128xbf16>, vector<3x128xf32> -> vector<3x128xf32>
    %579 = arith.addf %299, %578 : vector<3x128xf32>
    %580 = arith.truncf %472 : vector<3x32xf32> to vector<3x32xbf16>
    %cst_153 = arith.constant dense<0.000000e+00> : vector<3x128xf32>
    %581 = tpu.matmul %580, %279, %cst_153 {dimension_numbers = #tpu.dot_dimension_numbers<[1], [0], [0], [1], [0, 0, 1, 1], [], []>} : vector<3x32xbf16>, vector<32x128xbf16>, vector<3x128xf32> -> vector<3x128xf32>
    %582 = arith.addf %576, %581 : vector<3x128xf32>
    %583 = arith.truncf %497 : vector<3x32xf32> to vector<3x32xbf16>
    %cst_154 = arith.constant dense<0.000000e+00> : vector<3x128xf32>
    %584 = tpu.matmul %583, %280, %cst_154 {dimension_numbers = #tpu.dot_dimension_numbers<[1], [0], [0], [1], [0, 0, 1, 1], [], []>} : vector<3x32xbf16>, vector<32x128xbf16>, vector<3x128xf32> -> vector<3x128xf32>
    %585 = arith.addf %579, %584 : vector<3x128xf32>
    %586 = vector.extract_strided_slice %582 {offsets = [0, 0], sizes = [3, 32], strides = [1, 1]} : vector<3x128xf32> to vector<3x32xf32>
    %587 = arith.negf %586 : vector<3x32xf32>
    %588 = math.exp %587 : vector<3x32xf32>
    %cst_155 = arith.constant 1.000000e+00 : f32
    %589 = vector.broadcast %cst_155 : f32 to vector<3x32xf32>
    %590 = arith.addf %589, %588 : vector<3x32xf32>
    %591 = arith.divf %589, %590 : vector<3x32xf32>
    %592 = vector.extract_strided_slice %582 {offsets = [0, 32], sizes = [3, 32], strides = [1, 1]} : vector<3x128xf32> to vector<3x32xf32>
    %593 = arith.negf %592 : vector<3x32xf32>
    %594 = math.exp %593 : vector<3x32xf32>
    %cst_156 = arith.constant 1.000000e+00 : f32
    %595 = vector.broadcast %cst_156 : f32 to vector<3x32xf32>
    %596 = arith.addf %595, %594 : vector<3x32xf32>
    %597 = arith.divf %595, %596 : vector<3x32xf32>
    %598 = vector.extract_strided_slice %582 {offsets = [0, 64], sizes = [3, 32], strides = [1, 1]} : vector<3x128xf32> to vector<3x32xf32>
    %599 = math.tanh %598 : vector<3x32xf32>
    %600 = vector.extract_strided_slice %582 {offsets = [0, 96], sizes = [3, 32], strides = [1, 1]} : vector<3x128xf32> to vector<3x32xf32>
    %601 = arith.negf %600 : vector<3x32xf32>
    %602 = math.exp %601 : vector<3x32xf32>
    %cst_157 = arith.constant 1.000000e+00 : f32
    %603 = vector.broadcast %cst_157 : f32 to vector<3x32xf32>
    %604 = arith.addf %603, %602 : vector<3x32xf32>
    %605 = arith.divf %603, %604 : vector<3x32xf32>
    %606 = arith.mulf %597, %470 : vector<3x32xf32>
    %607 = arith.mulf %591, %599 : vector<3x32xf32>
    %608 = arith.addf %606, %607 : vector<3x32xf32>
    %609 = math.tanh %608 : vector<3x32xf32>
    %610 = arith.mulf %605, %609 : vector<3x32xf32>
    %611 = vector.extract_strided_slice %585 {offsets = [0, 0], sizes = [3, 32], strides = [1, 1]} : vector<3x128xf32> to vector<3x32xf32>
    %612 = arith.negf %611 : vector<3x32xf32>
    %613 = math.exp %612 : vector<3x32xf32>
    %cst_158 = arith.constant 1.000000e+00 : f32
    %614 = vector.broadcast %cst_158 : f32 to vector<3x32xf32>
    %615 = arith.addf %614, %613 : vector<3x32xf32>
    %616 = arith.divf %614, %615 : vector<3x32xf32>
    %617 = vector.extract_strided_slice %585 {offsets = [0, 32], sizes = [3, 32], strides = [1, 1]} : vector<3x128xf32> to vector<3x32xf32>
    %618 = arith.negf %617 : vector<3x32xf32>
    %619 = math.exp %618 : vector<3x32xf32>
    %cst_159 = arith.constant 1.000000e+00 : f32
    %620 = vector.broadcast %cst_159 : f32 to vector<3x32xf32>
    %621 = arith.addf %620, %619 : vector<3x32xf32>
    %622 = arith.divf %620, %621 : vector<3x32xf32>
    %623 = vector.extract_strided_slice %585 {offsets = [0, 64], sizes = [3, 32], strides = [1, 1]} : vector<3x128xf32> to vector<3x32xf32>
    %624 = math.tanh %623 : vector<3x32xf32>
    %625 = vector.extract_strided_slice %585 {offsets = [0, 96], sizes = [3, 32], strides = [1, 1]} : vector<3x128xf32> to vector<3x32xf32>
    %626 = arith.negf %625 : vector<3x32xf32>
    %627 = math.exp %626 : vector<3x32xf32>
    %cst_160 = arith.constant 1.000000e+00 : f32
    %628 = vector.broadcast %cst_160 : f32 to vector<3x32xf32>
    %629 = arith.addf %628, %627 : vector<3x32xf32>
    %630 = arith.divf %628, %629 : vector<3x32xf32>
    %631 = arith.mulf %622, %495 : vector<3x32xf32>
    %632 = arith.mulf %616, %624 : vector<3x32xf32>
    %633 = arith.addf %631, %632 : vector<3x32xf32>
    %634 = math.tanh %633 : vector<3x32xf32>
    %635 = arith.mulf %630, %634 : vector<3x32xf32>
    %636 = arith.truncf %610 : vector<3x32xf32> to vector<3x32xbf16>
    %cst_161 = arith.constant dense<0.000000e+00> : vector<3x128xf32>
    %637 = tpu.matmul %636, %283, %cst_161 {dimension_numbers = #tpu.dot_dimension_numbers<[1], [0], [0], [1], [0, 0, 1, 1], [], []>} : vector<3x32xbf16>, vector<32x128xbf16>, vector<3x128xf32> -> vector<3x128xf32>
    %638 = vector.broadcast %284 : vector<1x128xf32> to vector<3x128xf32>
    %639 = arith.addf %637, %638 : vector<3x128xf32>
    %640 = arith.truncf %635 : vector<3x32xf32> to vector<3x32xbf16>
    %cst_162 = arith.constant dense<0.000000e+00> : vector<3x128xf32>
    %641 = tpu.matmul %640, %283, %cst_162 {dimension_numbers = #tpu.dot_dimension_numbers<[1], [0], [0], [1], [0, 0, 1, 1], [], []>} : vector<3x32xbf16>, vector<32x128xbf16>, vector<3x128xf32> -> vector<3x128xf32>
    %642 = vector.broadcast %284 : vector<1x128xf32> to vector<3x128xf32>
    %643 = arith.addf %641, %642 : vector<3x128xf32>
    %c2 = arith.constant 2 : index
    %c0_163 = arith.constant 0 : index
    %c0_164 = arith.constant 0 : index
    %644 = vector.load %arg18[%c2, %c0_163, %c0_164] : memref<8x3x128xf32, #tpu.memory_space<vmem>>, vector<1x3x128xf32>
    %645 = vector.shape_cast %644 : vector<1x3x128xf32> to vector<3x128xf32>
    %646 = vector.shape_cast %639 : vector<3x128xf32> to vector<1x3x128xf32>
    tpu.vector_store %arg18[%c2, %c0_163, %c0_164], %646 {strides = array<i32>} : memref<8x3x128xf32, #tpu.memory_space<vmem>>, vector<1x3x128xf32>,
    %c2_165 = arith.constant 2 : index
    %c0_166 = arith.constant 0 : index
    %c0_167 = arith.constant 0 : index
    %647 = vector.load %arg19[%c2_165, %c0_166, %c0_167] : memref<8x3x128xf32, #tpu.memory_space<vmem>>, vector<1x3x128xf32>
    %648 = vector.shape_cast %647 : vector<1x3x128xf32> to vector<3x128xf32>
    %649 = vector.shape_cast %643 : vector<3x128xf32> to vector<1x3x128xf32>
    tpu.vector_store %arg19[%c2_165, %c0_166, %c0_167], %649 {strides = array<i32>} : memref<8x3x128xf32, #tpu.memory_space<vmem>>, vector<1x3x128xf32>,
    %c2_i32 = arith.constant 2 : i32
    %650 = vector.broadcast %c2_i32 : i32 to vector<3x1xi32>
    %651 = arith.cmpi sgt, %285, %650 : vector<3x1xi32>
    %652 = arith.extui %651 : vector<3x1xi1> to vector<3x1xi32>
    %653 = arith.sitofp %652 : vector<3x1xi32> to vector<3x1xf32>
    %c2_i32_168 = arith.constant 2 : i32
    %654 = vector.broadcast %c2_i32_168 : i32 to vector<3x1xi32>
    %655 = arith.cmpi sgt, %286, %654 : vector<3x1xi32>
    %656 = arith.extui %655 : vector<3x1xi1> to vector<3x1xi32>
    %657 = arith.sitofp %656 : vector<3x1xi32> to vector<3x1xf32>
    %c2_169 = arith.constant 2 : index
    %c0_170 = arith.constant 0 : index
    %c0_171 = arith.constant 0 : index
    %658 = vector.load %arg14[%c2_169, %c0_170, %c0_171] : memref<8x3x1xi32, #tpu.memory_space<vmem>>, vector<1x3x1xi32>
    %659 = vector.shape_cast %658 : vector<1x3x1xi32> to vector<3x1xi32>
    %660 = vector.broadcast %653 : vector<3x1xf32> to vector<3x128xf32>
    %661 = arith.mulf %639, %660 : vector<3x128xf32>
    %cst_172 = arith.constant dense<0xFF800000> : vector<3xf32>
    %662 = vector.multi_reduction <maximumf>, %661, %cst_172 [1] : vector<3x128xf32> to vector<3xf32>
    %663 = vector.shape_cast %662 : vector<3xf32> to vector<3x1xf32>
    %664 = vector.broadcast %663 : vector<3x1xf32> to vector<3x128xf32>
    %665 = arith.subf %661, %664 : vector<3x128xf32>
    %666 = math.exp %665 : vector<3x128xf32>
    %cst_173 = arith.constant dense<0.000000e+00> : vector<3xf32>
    %667 = vector.multi_reduction <add>, %666, %cst_173 [1] : vector<3x128xf32> to vector<3xf32>
    %668 = vector.shape_cast %667 : vector<3xf32> to vector<3x1xf32>
    %669 = math.log %668 : vector<3x1xf32>
    %670 = vector.broadcast %669 : vector<3x1xf32> to vector<3x128xf32>
    %671 = arith.subf %665, %670 : vector<3x128xf32>
    %672 = vector.broadcast %659 : vector<3x1xi32> to vector<3x128xi32>
    %673 = arith.cmpi eq, %287, %672 : vector<3x128xi32>
    %cst_174 = arith.constant 0.000000e+00 : f32
    %674 = vector.broadcast %cst_174 : f32 to vector<3x128xf32>
    %675 = arith.select %673, %671, %674 : vector<3x128xi1>, vector<3x128xf32>
    %676 = vector.shape_cast %675 : vector<3x128xf32> to vector<1x3x128xf32>
    %cst_175 = arith.constant dense<0.000000e+00> : vector<1xf32>
    %677 = vector.multi_reduction <add>, %676, %cst_175 [1, 2] : vector<1x3x128xf32> to vector<1xf32>
    %678 = vector.shape_cast %677 : vector<1xf32> to vector<1x1x1xf32>
    %679 = vector.extract %678[0, 0, 0] : f32 from vector<1x1x1xf32>
    %cst_176 = arith.constant 0.000000e+00 : f32
    %680 = arith.subf %cst_176, %679 : f32
    %681 = arith.addf %567, %680 : f32
    %c2_177 = arith.constant 2 : index
    %c0_178 = arith.constant 0 : index
    %c0_179 = arith.constant 0 : index
    %682 = vector.load %arg15[%c2_177, %c0_178, %c0_179] : memref<8x3x1xi32, #tpu.memory_space<vmem>>, vector<1x3x1xi32>
    %683 = vector.shape_cast %682 : vector<1x3x1xi32> to vector<3x1xi32>
    %684 = vector.broadcast %657 : vector<3x1xf32> to vector<3x128xf32>
    %685 = arith.mulf %643, %684 : vector<3x128xf32>
    %cst_180 = arith.constant dense<0xFF800000> : vector<3xf32>
    %686 = vector.multi_reduction <maximumf>, %685, %cst_180 [1] : vector<3x128xf32> to vector<3xf32>
    %687 = vector.shape_cast %686 : vector<3xf32> to vector<3x1xf32>
    %688 = vector.broadcast %687 : vector<3x1xf32> to vector<3x128xf32>
    %689 = arith.subf %685, %688 : vector<3x128xf32>
    %690 = math.exp %689 : vector<3x128xf32>
    %cst_181 = arith.constant dense<0.000000e+00> : vector<3xf32>
    %691 = vector.multi_reduction <add>, %690, %cst_181 [1] : vector<3x128xf32> to vector<3xf32>
    %692 = vector.shape_cast %691 : vector<3xf32> to vector<3x1xf32>
    %693 = math.log %692 : vector<3x1xf32>
    %694 = vector.broadcast %693 : vector<3x1xf32> to vector<3x128xf32>
    %695 = arith.subf %689, %694 : vector<3x128xf32>
    %696 = vector.broadcast %683 : vector<3x1xi32> to vector<3x128xi32>
    %697 = arith.cmpi eq, %287, %696 : vector<3x128xi32>
    %cst_182 = arith.constant 0.000000e+00 : f32
    %698 = vector.broadcast %cst_182 : f32 to vector<3x128xf32>
    %699 = arith.select %697, %695, %698 : vector<3x128xi1>, vector<3x128xf32>
    %700 = vector.shape_cast %699 : vector<3x128xf32> to vector<1x3x128xf32>
    %cst_183 = arith.constant dense<0.000000e+00> : vector<1xf32>
    %701 = vector.multi_reduction <add>, %700, %cst_183 [1, 2] : vector<1x3x128xf32> to vector<1xf32>
    %702 = vector.shape_cast %701 : vector<1xf32> to vector<1x1x1xf32>
    %703 = vector.extract %702[0, 0, 0] : f32 from vector<1x1x1xf32>
    %cst_184 = arith.constant 0.000000e+00 : f32
    %704 = arith.subf %cst_184, %703 : f32
    %705 = arith.addf %681, %704 : f32
    %706 = vector.extract_strided_slice %1 {offsets = [2, 0, 0], sizes = [1, 3, 32], strides = [1, 1, 1]} : vector<8x4x32xf32> to vector<1x3x32xf32>
    %707 = vector.shape_cast %706 : vector<1x3x32xf32> to vector<3x32xf32>
    %708 = arith.truncf %707 : vector<3x32xf32> to vector<3x32xbf16>
    %709 = vector.extract_strided_slice %1 {offsets = [2, 1, 0], sizes = [1, 3, 32], strides = [1, 1, 1]} : vector<8x4x32xf32> to vector<1x3x32xf32>
    %710 = vector.shape_cast %709 : vector<1x3x32xf32> to vector<3x32xf32>
    %711 = arith.truncf %710 : vector<3x32xf32> to vector<3x32xbf16>
    %c0_185 = arith.constant 0 : index
    %c0_186 = arith.constant 0 : index
    %712 = vector.load %arg5[%c0_185, %c0_186] : memref<32x128xbf16, #tpu.memory_space<vmem>>, vector<32x128xbf16>
    %cst_187 = arith.constant dense<0.000000e+00> : vector<3x128xf32>
    %713 = tpu.matmul %708, %712, %cst_187 {dimension_numbers = #tpu.dot_dimension_numbers<[1], [0], [0], [1], [0, 0, 1, 1], [], []>} : vector<3x32xbf16>, vector<32x128xbf16>, vector<3x128xf32> -> vector<3x128xf32>
    %714 = arith.addf %293, %713 : vector<3x128xf32>
    %c0_188 = arith.constant 0 : index
    %c0_189 = arith.constant 0 : index
    %715 = vector.load %arg9[%c0_188, %c0_189] : memref<32x128xbf16, #tpu.memory_space<vmem>>, vector<32x128xbf16>
    %cst_190 = arith.constant dense<0.000000e+00> : vector<3x128xf32>
    %716 = tpu.matmul %711, %715, %cst_190 {dimension_numbers = #tpu.dot_dimension_numbers<[1], [0], [0], [1], [0, 0, 1, 1], [], []>} : vector<3x32xbf16>, vector<32x128xbf16>, vector<3x128xf32> -> vector<3x128xf32>
    %717 = arith.addf %299, %716 : vector<3x128xf32>
    %718 = arith.truncf %610 : vector<3x32xf32> to vector<3x32xbf16>
    %cst_191 = arith.constant dense<0.000000e+00> : vector<3x128xf32>
    %719 = tpu.matmul %718, %279, %cst_191 {dimension_numbers = #tpu.dot_dimension_numbers<[1], [0], [0], [1], [0, 0, 1, 1], [], []>} : vector<3x32xbf16>, vector<32x128xbf16>, vector<3x128xf32> -> vector<3x128xf32>
    %720 = arith.addf %714, %719 : vector<3x128xf32>
    %721 = arith.truncf %635 : vector<3x32xf32> to vector<3x32xbf16>
    %cst_192 = arith.constant dense<0.000000e+00> : vector<3x128xf32>
    %722 = tpu.matmul %721, %280, %cst_192 {dimension_numbers = #tpu.dot_dimension_numbers<[1], [0], [0], [1], [0, 0, 1, 1], [], []>} : vector<3x32xbf16>, vector<32x128xbf16>, vector<3x128xf32> -> vector<3x128xf32>
    %723 = arith.addf %717, %722 : vector<3x128xf32>
    %724 = vector.extract_strided_slice %720 {offsets = [0, 0], sizes = [3, 32], strides = [1, 1]} : vector<3x128xf32> to vector<3x32xf32>
    %725 = arith.negf %724 : vector<3x32xf32>
    %726 = math.exp %725 : vector<3x32xf32>
    %cst_193 = arith.constant 1.000000e+00 : f32
    %727 = vector.broadcast %cst_193 : f32 to vector<3x32xf32>
    %728 = arith.addf %727, %726 : vector<3x32xf32>
    %729 = arith.divf %727, %728 : vector<3x32xf32>
    %730 = vector.extract_strided_slice %720 {offsets = [0, 32], sizes = [3, 32], strides = [1, 1]} : vector<3x128xf32> to vector<3x32xf32>
    %731 = arith.negf %730 : vector<3x32xf32>
    %732 = math.exp %731 : vector<3x32xf32>
    %cst_194 = arith.constant 1.000000e+00 : f32
    %733 = vector.broadcast %cst_194 : f32 to vector<3x32xf32>
    %734 = arith.addf %733, %732 : vector<3x32xf32>
    %735 = arith.divf %733, %734 : vector<3x32xf32>
    %736 = vector.extract_strided_slice %720 {offsets = [0, 64], sizes = [3, 32], strides = [1, 1]} : vector<3x128xf32> to vector<3x32xf32>
    %737 = math.tanh %736 : vector<3x32xf32>
    %738 = vector.extract_strided_slice %720 {offsets = [0, 96], sizes = [3, 32], strides = [1, 1]} : vector<3x128xf32> to vector<3x32xf32>
    %739 = arith.negf %738 : vector<3x32xf32>
    %740 = math.exp %739 : vector<3x32xf32>
    %cst_195 = arith.constant 1.000000e+00 : f32
    %741 = vector.broadcast %cst_195 : f32 to vector<3x32xf32>
    %742 = arith.addf %741, %740 : vector<3x32xf32>
    %743 = arith.divf %741, %742 : vector<3x32xf32>
    %744 = arith.mulf %735, %608 : vector<3x32xf32>
    %745 = arith.mulf %729, %737 : vector<3x32xf32>
    %746 = arith.addf %744, %745 : vector<3x32xf32>
    %747 = math.tanh %746 : vector<3x32xf32>
    %748 = arith.mulf %743, %747 : vector<3x32xf32>
    %749 = vector.extract_strided_slice %723 {offsets = [0, 0], sizes = [3, 32], strides = [1, 1]} : vector<3x128xf32> to vector<3x32xf32>
    %750 = arith.negf %749 : vector<3x32xf32>
    %751 = math.exp %750 : vector<3x32xf32>
    %cst_196 = arith.constant 1.000000e+00 : f32
    %752 = vector.broadcast %cst_196 : f32 to vector<3x32xf32>
    %753 = arith.addf %752, %751 : vector<3x32xf32>
    %754 = arith.divf %752, %753 : vector<3x32xf32>
    %755 = vector.extract_strided_slice %723 {offsets = [0, 32], sizes = [3, 32], strides = [1, 1]} : vector<3x128xf32> to vector<3x32xf32>
    %756 = arith.negf %755 : vector<3x32xf32>
    %757 = math.exp %756 : vector<3x32xf32>
    %cst_197 = arith.constant 1.000000e+00 : f32
    %758 = vector.broadcast %cst_197 : f32 to vector<3x32xf32>
    %759 = arith.addf %758, %757 : vector<3x32xf32>
    %760 = arith.divf %758, %759 : vector<3x32xf32>
    %761 = vector.extract_strided_slice %723 {offsets = [0, 64], sizes = [3, 32], strides = [1, 1]} : vector<3x128xf32> to vector<3x32xf32>
    %762 = math.tanh %761 : vector<3x32xf32>
    %763 = vector.extract_strided_slice %723 {offsets = [0, 96], sizes = [3, 32], strides = [1, 1]} : vector<3x128xf32> to vector<3x32xf32>
    %764 = arith.negf %763 : vector<3x32xf32>
    %765 = math.exp %764 : vector<3x32xf32>
    %cst_198 = arith.constant 1.000000e+00 : f32
    %766 = vector.broadcast %cst_198 : f32 to vector<3x32xf32>
    %767 = arith.addf %766, %765 : vector<3x32xf32>
    %768 = arith.divf %766, %767 : vector<3x32xf32>
    %769 = arith.mulf %760, %633 : vector<3x32xf32>
    %770 = arith.mulf %754, %762 : vector<3x32xf32>
    %771 = arith.addf %769, %770 : vector<3x32xf32>
    %772 = math.tanh %771 : vector<3x32xf32>
    %773 = arith.mulf %768, %772 : vector<3x32xf32>
    %774 = arith.truncf %748 : vector<3x32xf32> to vector<3x32xbf16>
    %cst_199 = arith.constant dense<0.000000e+00> : vector<3x128xf32>
    %775 = tpu.matmul %774, %283, %cst_199 {dimension_numbers = #tpu.dot_dimension_numbers<[1], [0], [0], [1], [0, 0, 1, 1], [], []>} : vector<3x32xbf16>, vector<32x128xbf16>, vector<3x128xf32> -> vector<3x128xf32>
    %776 = vector.broadcast %284 : vector<1x128xf32> to vector<3x128xf32>
    %777 = arith.addf %775, %776 : vector<3x128xf32>
    %778 = arith.truncf %773 : vector<3x32xf32> to vector<3x32xbf16>
    %cst_200 = arith.constant dense<0.000000e+00> : vector<3x128xf32>
    %779 = tpu.matmul %778, %283, %cst_200 {dimension_numbers = #tpu.dot_dimension_numbers<[1], [0], [0], [1], [0, 0, 1, 1], [], []>} : vector<3x32xbf16>, vector<32x128xbf16>, vector<3x128xf32> -> vector<3x128xf32>
    %780 = vector.broadcast %284 : vector<1x128xf32> to vector<3x128xf32>
    %781 = arith.addf %779, %780 : vector<3x128xf32>
    %c3 = arith.constant 3 : index
    %c0_201 = arith.constant 0 : index
    %c0_202 = arith.constant 0 : index
    %782 = vector.load %arg18[%c3, %c0_201, %c0_202] : memref<8x3x128xf32, #tpu.memory_space<vmem>>, vector<1x3x128xf32>
    %783 = vector.shape_cast %782 : vector<1x3x128xf32> to vector<3x128xf32>
    %784 = vector.shape_cast %777 : vector<3x128xf32> to vector<1x3x128xf32>
    tpu.vector_store %arg18[%c3, %c0_201, %c0_202], %784 {strides = array<i32>} : memref<8x3x128xf32, #tpu.memory_space<vmem>>, vector<1x3x128xf32>,
    %c3_203 = arith.constant 3 : index
    %c0_204 = arith.constant 0 : index
    %c0_205 = arith.constant 0 : index
    %785 = vector.load %arg19[%c3_203, %c0_204, %c0_205] : memref<8x3x128xf32, #tpu.memory_space<vmem>>, vector<1x3x128xf32>
    %786 = vector.shape_cast %785 : vector<1x3x128xf32> to vector<3x128xf32>
    %787 = vector.shape_cast %781 : vector<3x128xf32> to vector<1x3x128xf32>
    tpu.vector_store %arg19[%c3_203, %c0_204, %c0_205], %787 {strides = array<i32>} : memref<8x3x128xf32, #tpu.memory_space<vmem>>, vector<1x3x128xf32>,
    %c3_i32 = arith.constant 3 : i32
    %788 = vector.broadcast %c3_i32 : i32 to vector<3x1xi32>
    %789 = arith.cmpi sgt, %285, %788 : vector<3x1xi32>
    %790 = arith.extui %789 : vector<3x1xi1> to vector<3x1xi32>
    %791 = arith.sitofp %790 : vector<3x1xi32> to vector<3x1xf32>
    %c3_i32_206 = arith.constant 3 : i32
    %792 = vector.broadcast %c3_i32_206 : i32 to vector<3x1xi32>
    %793 = arith.cmpi sgt, %286, %792 : vector<3x1xi32>
    %794 = arith.extui %793 : vector<3x1xi1> to vector<3x1xi32>
    %795 = arith.sitofp %794 : vector<3x1xi32> to vector<3x1xf32>
    %c3_207 = arith.constant 3 : index
    %c0_208 = arith.constant 0 : index
    %c0_209 = arith.constant 0 : index
    %796 = vector.load %arg14[%c3_207, %c0_208, %c0_209] : memref<8x3x1xi32, #tpu.memory_space<vmem>>, vector<1x3x1xi32>
    %797 = vector.shape_cast %796 : vector<1x3x1xi32> to vector<3x1xi32>
    %798 = vector.broadcast %791 : vector<3x1xf32> to vector<3x128xf32>
    %799 = arith.mulf %777, %798 : vector<3x128xf32>
    %cst_210 = arith.constant dense<0xFF800000> : vector<3xf32>
    %800 = vector.multi_reduction <maximumf>, %799, %cst_210 [1] : vector<3x128xf32> to vector<3xf32>
    %801 = vector.shape_cast %800 : vector<3xf32> to vector<3x1xf32>
    %802 = vector.broadcast %801 : vector<3x1xf32> to vector<3x128xf32>
    %803 = arith.subf %799, %802 : vector<3x128xf32>
    %804 = math.exp %803 : vector<3x128xf32>
    %cst_211 = arith.constant dense<0.000000e+00> : vector<3xf32>
    %805 = vector.multi_reduction <add>, %804, %cst_211 [1] : vector<3x128xf32> to vector<3xf32>
    %806 = vector.shape_cast %805 : vector<3xf32> to vector<3x1xf32>
    %807 = math.log %806 : vector<3x1xf32>
    %808 = vector.broadcast %807 : vector<3x1xf32> to vector<3x128xf32>
    %809 = arith.subf %803, %808 : vector<3x128xf32>
    %810 = vector.broadcast %797 : vector<3x1xi32> to vector<3x128xi32>
    %811 = arith.cmpi eq, %287, %810 : vector<3x128xi32>
    %cst_212 = arith.constant 0.000000e+00 : f32
    %812 = vector.broadcast %cst_212 : f32 to vector<3x128xf32>
    %813 = arith.select %811, %809, %812 : vector<3x128xi1>, vector<3x128xf32>
    %814 = vector.shape_cast %813 : vector<3x128xf32> to vector<1x3x128xf32>
    %cst_213 = arith.constant dense<0.000000e+00> : vector<1xf32>
    %815 = vector.multi_reduction <add>, %814, %cst_213 [1, 2] : vector<1x3x128xf32> to vector<1xf32>
    %816 = vector.shape_cast %815 : vector<1xf32> to vector<1x1x1xf32>
    %817 = vector.extract %816[0, 0, 0] : f32 from vector<1x1x1xf32>
    %cst_214 = arith.constant 0.000000e+00 : f32
    %818 = arith.subf %cst_214, %817 : f32
    %819 = arith.addf %705, %818 : f32
    %c3_215 = arith.constant 3 : index
    %c0_216 = arith.constant 0 : index
    %c0_217 = arith.constant 0 : index
    %820 = vector.load %arg15[%c3_215, %c0_216, %c0_217] : memref<8x3x1xi32, #tpu.memory_space<vmem>>, vector<1x3x1xi32>
    %821 = vector.shape_cast %820 : vector<1x3x1xi32> to vector<3x1xi32>
    %822 = vector.broadcast %795 : vector<3x1xf32> to vector<3x128xf32>
    %823 = arith.mulf %781, %822 : vector<3x128xf32>
    %cst_218 = arith.constant dense<0xFF800000> : vector<3xf32>
    %824 = vector.multi_reduction <maximumf>, %823, %cst_218 [1] : vector<3x128xf32> to vector<3xf32>
    %825 = vector.shape_cast %824 : vector<3xf32> to vector<3x1xf32>
    %826 = vector.broadcast %825 : vector<3x1xf32> to vector<3x128xf32>
    %827 = arith.subf %823, %826 : vector<3x128xf32>
    %828 = math.exp %827 : vector<3x128xf32>
    %cst_219 = arith.constant dense<0.000000e+00> : vector<3xf32>
    %829 = vector.multi_reduction <add>, %828, %cst_219 [1] : vector<3x128xf32> to vector<3xf32>
    %830 = vector.shape_cast %829 : vector<3xf32> to vector<3x1xf32>
    %831 = math.log %830 : vector<3x1xf32>
    %832 = vector.broadcast %831 : vector<3x1xf32> to vector<3x128xf32>
    %833 = arith.subf %827, %832 : vector<3x128xf32>
    %834 = vector.broadcast %821 : vector<3x1xi32> to vector<3x128xi32>
    %835 = arith.cmpi eq, %287, %834 : vector<3x128xi32>
    %cst_220 = arith.constant 0.000000e+00 : f32
    %836 = vector.broadcast %cst_220 : f32 to vector<3x128xf32>
    %837 = arith.select %835, %833, %836 : vector<3x128xi1>, vector<3x128xf32>
    %838 = vector.shape_cast %837 : vector<3x128xf32> to vector<1x3x128xf32>
    %cst_221 = arith.constant dense<0.000000e+00> : vector<1xf32>
    %839 = vector.multi_reduction <add>, %838, %cst_221 [1, 2] : vector<1x3x128xf32> to vector<1xf32>
    %840 = vector.shape_cast %839 : vector<1xf32> to vector<1x1x1xf32>
    %841 = vector.extract %840[0, 0, 0] : f32 from vector<1x1x1xf32>
    %cst_222 = arith.constant 0.000000e+00 : f32
    %842 = arith.subf %cst_222, %841 : f32
    %843 = arith.addf %819, %842 : f32
    %844 = vector.extract_strided_slice %1 {offsets = [3, 0, 0], sizes = [1, 3, 32], strides = [1, 1, 1]} : vector<8x4x32xf32> to vector<1x3x32xf32>
    %845 = vector.shape_cast %844 : vector<1x3x32xf32> to vector<3x32xf32>
    %846 = arith.truncf %845 : vector<3x32xf32> to vector<3x32xbf16>
    %847 = vector.extract_strided_slice %1 {offsets = [3, 1, 0], sizes = [1, 3, 32], strides = [1, 1, 1]} : vector<8x4x32xf32> to vector<1x3x32xf32>
    %848 = vector.shape_cast %847 : vector<1x3x32xf32> to vector<3x32xf32>
    %849 = arith.truncf %848 : vector<3x32xf32> to vector<3x32xbf16>
    %c0_223 = arith.constant 0 : index
    %c0_224 = arith.constant 0 : index
    %850 = vector.load %arg5[%c0_223, %c0_224] : memref<32x128xbf16, #tpu.memory_space<vmem>>, vector<32x128xbf16>
    %cst_225 = arith.constant dense<0.000000e+00> : vector<3x128xf32>
    %851 = tpu.matmul %846, %850, %cst_225 {dimension_numbers = #tpu.dot_dimension_numbers<[1], [0], [0], [1], [0, 0, 1, 1], [], []>} : vector<3x32xbf16>, vector<32x128xbf16>, vector<3x128xf32> -> vector<3x128xf32>
    %852 = arith.addf %293, %851 : vector<3x128xf32>
    %c0_226 = arith.constant 0 : index
    %c0_227 = arith.constant 0 : index
    %853 = vector.load %arg9[%c0_226, %c0_227] : memref<32x128xbf16, #tpu.memory_space<vmem>>, vector<32x128xbf16>
    %cst_228 = arith.constant dense<0.000000e+00> : vector<3x128xf32>
    %854 = tpu.matmul %849, %853, %cst_228 {dimension_numbers = #tpu.dot_dimension_numbers<[1], [0], [0], [1], [0, 0, 1, 1], [], []>} : vector<3x32xbf16>, vector<32x128xbf16>, vector<3x128xf32> -> vector<3x128xf32>
    %855 = arith.addf %299, %854 : vector<3x128xf32>
    %856 = arith.truncf %748 : vector<3x32xf32> to vector<3x32xbf16>
    %cst_229 = arith.constant dense<0.000000e+00> : vector<3x128xf32>
    %857 = tpu.matmul %856, %279, %cst_229 {dimension_numbers = #tpu.dot_dimension_numbers<[1], [0], [0], [1], [0, 0, 1, 1], [], []>} : vector<3x32xbf16>, vector<32x128xbf16>, vector<3x128xf32> -> vector<3x128xf32>
    %858 = arith.addf %852, %857 : vector<3x128xf32>
    %859 = arith.truncf %773 : vector<3x32xf32> to vector<3x32xbf16>
    %cst_230 = arith.constant dense<0.000000e+00> : vector<3x128xf32>
    %860 = tpu.matmul %859, %280, %cst_230 {dimension_numbers = #tpu.dot_dimension_numbers<[1], [0], [0], [1], [0, 0, 1, 1], [], []>} : vector<3x32xbf16>, vector<32x128xbf16>, vector<3x128xf32> -> vector<3x128xf32>
    %861 = arith.addf %855, %860 : vector<3x128xf32>
    %862 = vector.extract_strided_slice %858 {offsets = [0, 0], sizes = [3, 32], strides = [1, 1]} : vector<3x128xf32> to vector<3x32xf32>
    %863 = arith.negf %862 : vector<3x32xf32>
    %864 = math.exp %863 : vector<3x32xf32>
    %cst_231 = arith.constant 1.000000e+00 : f32
    %865 = vector.broadcast %cst_231 : f32 to vector<3x32xf32>
    %866 = arith.addf %865, %864 : vector<3x32xf32>
    %867 = arith.divf %865, %866 : vector<3x32xf32>
    %868 = vector.extract_strided_slice %858 {offsets = [0, 32], sizes = [3, 32], strides = [1, 1]} : vector<3x128xf32> to vector<3x32xf32>
    %869 = arith.negf %868 : vector<3x32xf32>
    %870 = math.exp %869 : vector<3x32xf32>
    %cst_232 = arith.constant 1.000000e+00 : f32
    %871 = vector.broadcast %cst_232 : f32 to vector<3x32xf32>
    %872 = arith.addf %871, %870 : vector<3x32xf32>
    %873 = arith.divf %871, %872 : vector<3x32xf32>
    %874 = vector.extract_strided_slice %858 {offsets = [0, 64], sizes = [3, 32], strides = [1, 1]} : vector<3x128xf32> to vector<3x32xf32>
    %875 = math.tanh %874 : vector<3x32xf32>
    %876 = vector.extract_strided_slice %858 {offsets = [0, 96], sizes = [3, 32], strides = [1, 1]} : vector<3x128xf32> to vector<3x32xf32>
    %877 = arith.negf %876 : vector<3x32xf32>
    %878 = math.exp %877 : vector<3x32xf32>
    %cst_233 = arith.constant 1.000000e+00 : f32
    %879 = vector.broadcast %cst_233 : f32 to vector<3x32xf32>
    %880 = arith.addf %879, %878 : vector<3x32xf32>
    %881 = arith.divf %879, %880 : vector<3x32xf32>
    %882 = arith.mulf %873, %746 : vector<3x32xf32>
    %883 = arith.mulf %867, %875 : vector<3x32xf32>
    %884 = arith.addf %882, %883 : vector<3x32xf32>
    %885 = math.tanh %884 : vector<3x32xf32>
    %886 = arith.mulf %881, %885 : vector<3x32xf32>
    %887 = vector.extract_strided_slice %861 {offsets = [0, 0], sizes = [3, 32], strides = [1, 1]} : vector<3x128xf32> to vector<3x32xf32>
    %888 = arith.negf %887 : vector<3x32xf32>
    %889 = math.exp %888 : vector<3x32xf32>
    %cst_234 = arith.constant 1.000000e+00 : f32
    %890 = vector.broadcast %cst_234 : f32 to vector<3x32xf32>
    %891 = arith.addf %890, %889 : vector<3x32xf32>
    %892 = arith.divf %890, %891 : vector<3x32xf32>
    %893 = vector.extract_strided_slice %861 {offsets = [0, 32], sizes = [3, 32], strides = [1, 1]} : vector<3x128xf32> to vector<3x32xf32>
    %894 = arith.negf %893 : vector<3x32xf32>
    %895 = math.exp %894 : vector<3x32xf32>
    %cst_235 = arith.constant 1.000000e+00 : f32
    %896 = vector.broadcast %cst_235 : f32 to vector<3x32xf32>
    %897 = arith.addf %896, %895 : vector<3x32xf32>
    %898 = arith.divf %896, %897 : vector<3x32xf32>
    %899 = vector.extract_strided_slice %861 {offsets = [0, 64], sizes = [3, 32], strides = [1, 1]} : vector<3x128xf32> to vector<3x32xf32>
    %900 = math.tanh %899 : vector<3x32xf32>
    %901 = vector.extract_strided_slice %861 {offsets = [0, 96], sizes = [3, 32], strides = [1, 1]} : vector<3x128xf32> to vector<3x32xf32>
    %902 = arith.negf %901 : vector<3x32xf32>
    %903 = math.exp %902 : vector<3x32xf32>
    %cst_236 = arith.constant 1.000000e+00 : f32
    %904 = vector.broadcast %cst_236 : f32 to vector<3x32xf32>
    %905 = arith.addf %904, %903 : vector<3x32xf32>
    %906 = arith.divf %904, %905 : vector<3x32xf32>
    %907 = arith.mulf %898, %771 : vector<3x32xf32>
    %908 = arith.mulf %892, %900 : vector<3x32xf32>
    %909 = arith.addf %907, %908 : vector<3x32xf32>
    %910 = math.tanh %909 : vector<3x32xf32>
    %911 = arith.mulf %906, %910 : vector<3x32xf32>
    %912 = arith.truncf %886 : vector<3x32xf32> to vector<3x32xbf16>
    %cst_237 = arith.constant dense<0.000000e+00> : vector<3x128xf32>
    %913 = tpu.matmul %912, %283, %cst_237 {dimension_numbers = #tpu.dot_dimension_numbers<[1], [0], [0], [1], [0, 0, 1, 1], [], []>} : vector<3x32xbf16>, vector<32x128xbf16>, vector<3x128xf32> -> vector<3x128xf32>
    %914 = vector.broadcast %284 : vector<1x128xf32> to vector<3x128xf32>
    %915 = arith.addf %913, %914 : vector<3x128xf32>
    %916 = arith.truncf %911 : vector<3x32xf32> to vector<3x32xbf16>
    %cst_238 = arith.constant dense<0.000000e+00> : vector<3x128xf32>
    %917 = tpu.matmul %916, %283, %cst_238 {dimension_numbers = #tpu.dot_dimension_numbers<[1], [0], [0], [1], [0, 0, 1, 1], [], []>} : vector<3x32xbf16>, vector<32x128xbf16>, vector<3x128xf32> -> vector<3x128xf32>
    %918 = vector.broadcast %284 : vector<1x128xf32> to vector<3x128xf32>
    %919 = arith.addf %917, %918 : vector<3x128xf32>
    %c4 = arith.constant 4 : index
    %c0_239 = arith.constant 0 : index
    %c0_240 = arith.constant 0 : index
    %920 = vector.load %arg18[%c4, %c0_239, %c0_240] : memref<8x3x128xf32, #tpu.memory_space<vmem>>, vector<1x3x128xf32>
    %921 = vector.shape_cast %920 : vector<1x3x128xf32> to vector<3x128xf32>
    %922 = vector.shape_cast %915 : vector<3x128xf32> to vector<1x3x128xf32>
    tpu.vector_store %arg18[%c4, %c0_239, %c0_240], %922 {strides = array<i32>} : memref<8x3x128xf32, #tpu.memory_space<vmem>>, vector<1x3x128xf32>,
    %c4_241 = arith.constant 4 : index
    %c0_242 = arith.constant 0 : index
    %c0_243 = arith.constant 0 : index
    %923 = vector.load %arg19[%c4_241, %c0_242, %c0_243] : memref<8x3x128xf32, #tpu.memory_space<vmem>>, vector<1x3x128xf32>
    %924 = vector.shape_cast %923 : vector<1x3x128xf32> to vector<3x128xf32>
    %925 = vector.shape_cast %919 : vector<3x128xf32> to vector<1x3x128xf32>
    tpu.vector_store %arg19[%c4_241, %c0_242, %c0_243], %925 {strides = array<i32>} : memref<8x3x128xf32, #tpu.memory_space<vmem>>, vector<1x3x128xf32>,
    %c4_i32 = arith.constant 4 : i32
    %926 = vector.broadcast %c4_i32 : i32 to vector<3x1xi32>
    %927 = arith.cmpi sgt, %285, %926 : vector<3x1xi32>
    %928 = arith.extui %927 : vector<3x1xi1> to vector<3x1xi32>
    %929 = arith.sitofp %928 : vector<3x1xi32> to vector<3x1xf32>
    %c4_i32_244 = arith.constant 4 : i32
    %930 = vector.broadcast %c4_i32_244 : i32 to vector<3x1xi32>
    %931 = arith.cmpi sgt, %286, %930 : vector<3x1xi32>
    %932 = arith.extui %931 : vector<3x1xi1> to vector<3x1xi32>
    %933 = arith.sitofp %932 : vector<3x1xi32> to vector<3x1xf32>
    %c4_245 = arith.constant 4 : index
    %c0_246 = arith.constant 0 : index
    %c0_247 = arith.constant 0 : index
    %934 = vector.load %arg14[%c4_245, %c0_246, %c0_247] : memref<8x3x1xi32, #tpu.memory_space<vmem>>, vector<1x3x1xi32>
    %935 = vector.shape_cast %934 : vector<1x3x1xi32> to vector<3x1xi32>
    %936 = vector.broadcast %929 : vector<3x1xf32> to vector<3x128xf32>
    %937 = arith.mulf %915, %936 : vector<3x128xf32>
    %cst_248 = arith.constant dense<0xFF800000> : vector<3xf32>
    %938 = vector.multi_reduction <maximumf>, %937, %cst_248 [1] : vector<3x128xf32> to vector<3xf32>
    %939 = vector.shape_cast %938 : vector<3xf32> to vector<3x1xf32>
    %940 = vector.broadcast %939 : vector<3x1xf32> to vector<3x128xf32>
    %941 = arith.subf %937, %940 : vector<3x128xf32>
    %942 = math.exp %941 : vector<3x128xf32>
    %cst_249 = arith.constant dense<0.000000e+00> : vector<3xf32>
    %943 = vector.multi_reduction <add>, %942, %cst_249 [1] : vector<3x128xf32> to vector<3xf32>
    %944 = vector.shape_cast %943 : vector<3xf32> to vector<3x1xf32>
    %945 = math.log %944 : vector<3x1xf32>
    %946 = vector.broadcast %945 : vector<3x1xf32> to vector<3x128xf32>
    %947 = arith.subf %941, %946 : vector<3x128xf32>
    %948 = vector.broadcast %935 : vector<3x1xi32> to vector<3x128xi32>
    %949 = arith.cmpi eq, %287, %948 : vector<3x128xi32>
    %cst_250 = arith.constant 0.000000e+00 : f32
    %950 = vector.broadcast %cst_250 : f32 to vector<3x128xf32>
    %951 = arith.select %949, %947, %950 : vector<3x128xi1>, vector<3x128xf32>
    %952 = vector.shape_cast %951 : vector<3x128xf32> to vector<1x3x128xf32>
    %cst_251 = arith.constant dense<0.000000e+00> : vector<1xf32>
    %953 = vector.multi_reduction <add>, %952, %cst_251 [1, 2] : vector<1x3x128xf32> to vector<1xf32>
    %954 = vector.shape_cast %953 : vector<1xf32> to vector<1x1x1xf32>
    %955 = vector.extract %954[0, 0, 0] : f32 from vector<1x1x1xf32>
    %cst_252 = arith.constant 0.000000e+00 : f32
    %956 = arith.subf %cst_252, %955 : f32
    %957 = arith.addf %843, %956 : f32
    %c4_253 = arith.constant 4 : index
    %c0_254 = arith.constant 0 : index
    %c0_255 = arith.constant 0 : index
    %958 = vector.load %arg15[%c4_253, %c0_254, %c0_255] : memref<8x3x1xi32, #tpu.memory_space<vmem>>, vector<1x3x1xi32>
    %959 = vector.shape_cast %958 : vector<1x3x1xi32> to vector<3x1xi32>
    %960 = vector.broadcast %933 : vector<3x1xf32> to vector<3x128xf32>
    %961 = arith.mulf %919, %960 : vector<3x128xf32>
    %cst_256 = arith.constant dense<0xFF800000> : vector<3xf32>
    %962 = vector.multi_reduction <maximumf>, %961, %cst_256 [1] : vector<3x128xf32> to vector<3xf32>
    %963 = vector.shape_cast %962 : vector<3xf32> to vector<3x1xf32>
    %964 = vector.broadcast %963 : vector<3x1xf32> to vector<3x128xf32>
    %965 = arith.subf %961, %964 : vector<3x128xf32>
    %966 = math.exp %965 : vector<3x128xf32>
    %cst_257 = arith.constant dense<0.000000e+00> : vector<3xf32>
    %967 = vector.multi_reduction <add>, %966, %cst_257 [1] : vector<3x128xf32> to vector<3xf32>
    %968 = vector.shape_cast %967 : vector<3xf32> to vector<3x1xf32>
    %969 = math.log %968 : vector<3x1xf32>
    %970 = vector.broadcast %969 : vector<3x1xf32> to vector<3x128xf32>
    %971 = arith.subf %965, %970 : vector<3x128xf32>
    %972 = vector.broadcast %959 : vector<3x1xi32> to vector<3x128xi32>
    %973 = arith.cmpi eq, %287, %972 : vector<3x128xi32>
    %cst_258 = arith.constant 0.000000e+00 : f32
    %974 = vector.broadcast %cst_258 : f32 to vector<3x128xf32>
    %975 = arith.select %973, %971, %974 : vector<3x128xi1>, vector<3x128xf32>
    %976 = vector.shape_cast %975 : vector<3x128xf32> to vector<1x3x128xf32>
    %cst_259 = arith.constant dense<0.000000e+00> : vector<1xf32>
    %977 = vector.multi_reduction <add>, %976, %cst_259 [1, 2] : vector<1x3x128xf32> to vector<1xf32>
    %978 = vector.shape_cast %977 : vector<1xf32> to vector<1x1x1xf32>
    %979 = vector.extract %978[0, 0, 0] : f32 from vector<1x1x1xf32>
    %cst_260 = arith.constant 0.000000e+00 : f32
    %980 = arith.subf %cst_260, %979 : f32
    %981 = arith.addf %957, %980 : f32
    %982 = vector.extract_strided_slice %1 {offsets = [4, 0, 0], sizes = [1, 3, 32], strides = [1, 1, 1]} : vector<8x4x32xf32> to vector<1x3x32xf32>
    %983 = vector.shape_cast %982 : vector<1x3x32xf32> to vector<3x32xf32>
    %984 = arith.truncf %983 : vector<3x32xf32> to vector<3x32xbf16>
    %985 = vector.extract_strided_slice %1 {offsets = [4, 1, 0], sizes = [1, 3, 32], strides = [1, 1, 1]} : vector<8x4x32xf32> to vector<1x3x32xf32>
    %986 = vector.shape_cast %985 : vector<1x3x32xf32> to vector<3x32xf32>
    %987 = arith.truncf %986 : vector<3x32xf32> to vector<3x32xbf16>
    %c0_261 = arith.constant 0 : index
    %c0_262 = arith.constant 0 : index
    %988 = vector.load %arg5[%c0_261, %c0_262] : memref<32x128xbf16, #tpu.memory_space<vmem>>, vector<32x128xbf16>
    %cst_263 = arith.constant dense<0.000000e+00> : vector<3x128xf32>
    %989 = tpu.matmul %984, %988, %cst_263 {dimension_numbers = #tpu.dot_dimension_numbers<[1], [0], [0], [1], [0, 0, 1, 1], [], []>} : vector<3x32xbf16>, vector<32x128xbf16>, vector<3x128xf32> -> vector<3x128xf32>
    %990 = arith.addf %293, %989 : vector<3x128xf32>
    %c0_264 = arith.constant 0 : index
    %c0_265 = arith.constant 0 : index
    %991 = vector.load %arg9[%c0_264, %c0_265] : memref<32x128xbf16, #tpu.memory_space<vmem>>, vector<32x128xbf16>
    %cst_266 = arith.constant dense<0.000000e+00> : vector<3x128xf32>
    %992 = tpu.matmul %987, %991, %cst_266 {dimension_numbers = #tpu.dot_dimension_numbers<[1], [0], [0], [1], [0, 0, 1, 1], [], []>} : vector<3x32xbf16>, vector<32x128xbf16>, vector<3x128xf32> -> vector<3x128xf32>
    %993 = arith.addf %299, %992 : vector<3x128xf32>
    %994 = arith.truncf %886 : vector<3x32xf32> to vector<3x32xbf16>
    %cst_267 = arith.constant dense<0.000000e+00> : vector<3x128xf32>
    %995 = tpu.matmul %994, %279, %cst_267 {dimension_numbers = #tpu.dot_dimension_numbers<[1], [0], [0], [1], [0, 0, 1, 1], [], []>} : vector<3x32xbf16>, vector<32x128xbf16>, vector<3x128xf32> -> vector<3x128xf32>
    %996 = arith.addf %990, %995 : vector<3x128xf32>
    %997 = arith.truncf %911 : vector<3x32xf32> to vector<3x32xbf16>
    %cst_268 = arith.constant dense<0.000000e+00> : vector<3x128xf32>
    %998 = tpu.matmul %997, %280, %cst_268 {dimension_numbers = #tpu.dot_dimension_numbers<[1], [0], [0], [1], [0, 0, 1, 1], [], []>} : vector<3x32xbf16>, vector<32x128xbf16>, vector<3x128xf32> -> vector<3x128xf32>
    %999 = arith.addf %993, %998 : vector<3x128xf32>
    %1000 = vector.extract_strided_slice %996 {offsets = [0, 0], sizes = [3, 32], strides = [1, 1]} : vector<3x128xf32> to vector<3x32xf32>
    %1001 = arith.negf %1000 : vector<3x32xf32>
    %1002 = math.exp %1001 : vector<3x32xf32>
    %cst_269 = arith.constant 1.000000e+00 : f32
    %1003 = vector.broadcast %cst_269 : f32 to vector<3x32xf32>
    %1004 = arith.addf %1003, %1002 : vector<3x32xf32>
    %1005 = arith.divf %1003, %1004 : vector<3x32xf32>
    %1006 = vector.extract_strided_slice %996 {offsets = [0, 32], sizes = [3, 32], strides = [1, 1]} : vector<3x128xf32> to vector<3x32xf32>
    %1007 = arith.negf %1006 : vector<3x32xf32>
    %1008 = math.exp %1007 : vector<3x32xf32>
    %cst_270 = arith.constant 1.000000e+00 : f32
    %1009 = vector.broadcast %cst_270 : f32 to vector<3x32xf32>
    %1010 = arith.addf %1009, %1008 : vector<3x32xf32>
    %1011 = arith.divf %1009, %1010 : vector<3x32xf32>
    %1012 = vector.extract_strided_slice %996 {offsets = [0, 64], sizes = [3, 32], strides = [1, 1]} : vector<3x128xf32> to vector<3x32xf32>
    %1013 = math.tanh %1012 : vector<3x32xf32>
    %1014 = vector.extract_strided_slice %996 {offsets = [0, 96], sizes = [3, 32], strides = [1, 1]} : vector<3x128xf32> to vector<3x32xf32>
    %1015 = arith.negf %1014 : vector<3x32xf32>
    %1016 = math.exp %1015 : vector<3x32xf32>
    %cst_271 = arith.constant 1.000000e+00 : f32
    %1017 = vector.broadcast %cst_271 : f32 to vector<3x32xf32>
    %1018 = arith.addf %1017, %1016 : vector<3x32xf32>
    %1019 = arith.divf %1017, %1018 : vector<3x32xf32>
    %1020 = arith.mulf %1011, %884 : vector<3x32xf32>
    %1021 = arith.mulf %1005, %1013 : vector<3x32xf32>
    %1022 = arith.addf %1020, %1021 : vector<3x32xf32>
    %1023 = math.tanh %1022 : vector<3x32xf32>
    %1024 = arith.mulf %1019, %1023 : vector<3x32xf32>
    %1025 = vector.extract_strided_slice %999 {offsets = [0, 0], sizes = [3, 32], strides = [1, 1]} : vector<3x128xf32> to vector<3x32xf32>
    %1026 = arith.negf %1025 : vector<3x32xf32>
    %1027 = math.exp %1026 : vector<3x32xf32>
    %cst_272 = arith.constant 1.000000e+00 : f32
    %1028 = vector.broadcast %cst_272 : f32 to vector<3x32xf32>
    %1029 = arith.addf %1028, %1027 : vector<3x32xf32>
    %1030 = arith.divf %1028, %1029 : vector<3x32xf32>
    %1031 = vector.extract_strided_slice %999 {offsets = [0, 32], sizes = [3, 32], strides = [1, 1]} : vector<3x128xf32> to vector<3x32xf32>
    %1032 = arith.negf %1031 : vector<3x32xf32>
    %1033 = math.exp %1032 : vector<3x32xf32>
    %cst_273 = arith.constant 1.000000e+00 : f32
    %1034 = vector.broadcast %cst_273 : f32 to vector<3x32xf32>
    %1035 = arith.addf %1034, %1033 : vector<3x32xf32>
    %1036 = arith.divf %1034, %1035 : vector<3x32xf32>
    %1037 = vector.extract_strided_slice %999 {offsets = [0, 64], sizes = [3, 32], strides = [1, 1]} : vector<3x128xf32> to vector<3x32xf32>
    %1038 = math.tanh %1037 : vector<3x32xf32>
    %1039 = vector.extract_strided_slice %999 {offsets = [0, 96], sizes = [3, 32], strides = [1, 1]} : vector<3x128xf32> to vector<3x32xf32>
    %1040 = arith.negf %1039 : vector<3x32xf32>
    %1041 = math.exp %1040 : vector<3x32xf32>
    %cst_274 = arith.constant 1.000000e+00 : f32
    %1042 = vector.broadcast %cst_274 : f32 to vector<3x32xf32>
    %1043 = arith.addf %1042, %1041 : vector<3x32xf32>
    %1044 = arith.divf %1042, %1043 : vector<3x32xf32>
    %1045 = arith.mulf %1036, %909 : vector<3x32xf32>
    %1046 = arith.mulf %1030, %1038 : vector<3x32xf32>
    %1047 = arith.addf %1045, %1046 : vector<3x32xf32>
    %1048 = math.tanh %1047 : vector<3x32xf32>
    %1049 = arith.mulf %1044, %1048 : vector<3x32xf32>
    %1050 = arith.truncf %1024 : vector<3x32xf32> to vector<3x32xbf16>
    %cst_275 = arith.constant dense<0.000000e+00> : vector<3x128xf32>
    %1051 = tpu.matmul %1050, %283, %cst_275 {dimension_numbers = #tpu.dot_dimension_numbers<[1], [0], [0], [1], [0, 0, 1, 1], [], []>} : vector<3x32xbf16>, vector<32x128xbf16>, vector<3x128xf32> -> vector<3x128xf32>
    %1052 = vector.broadcast %284 : vector<1x128xf32> to vector<3x128xf32>
    %1053 = arith.addf %1051, %1052 : vector<3x128xf32>
    %1054 = arith.truncf %1049 : vector<3x32xf32> to vector<3x32xbf16>
    %cst_276 = arith.constant dense<0.000000e+00> : vector<3x128xf32>
    %1055 = tpu.matmul %1054, %283, %cst_276 {dimension_numbers = #tpu.dot_dimension_numbers<[1], [0], [0], [1], [0, 0, 1, 1], [], []>} : vector<3x32xbf16>, vector<32x128xbf16>, vector<3x128xf32> -> vector<3x128xf32>
    %1056 = vector.broadcast %284 : vector<1x128xf32> to vector<3x128xf32>
    %1057 = arith.addf %1055, %1056 : vector<3x128xf32>
    %c5 = arith.constant 5 : index
    %c0_277 = arith.constant 0 : index
    %c0_278 = arith.constant 0 : index
    %1058 = vector.load %arg18[%c5, %c0_277, %c0_278] : memref<8x3x128xf32, #tpu.memory_space<vmem>>, vector<1x3x128xf32>
    %1059 = vector.shape_cast %1058 : vector<1x3x128xf32> to vector<3x128xf32>
    %1060 = vector.shape_cast %1053 : vector<3x128xf32> to vector<1x3x128xf32>
    tpu.vector_store %arg18[%c5, %c0_277, %c0_278], %1060 {strides = array<i32>} : memref<8x3x128xf32, #tpu.memory_space<vmem>>, vector<1x3x128xf32>,
    %c5_279 = arith.constant 5 : index
    %c0_280 = arith.constant 0 : index
    %c0_281 = arith.constant 0 : index
    %1061 = vector.load %arg19[%c5_279, %c0_280, %c0_281] : memref<8x3x128xf32, #tpu.memory_space<vmem>>, vector<1x3x128xf32>
    %1062 = vector.shape_cast %1061 : vector<1x3x128xf32> to vector<3x128xf32>
    %1063 = vector.shape_cast %1057 : vector<3x128xf32> to vector<1x3x128xf32>
    tpu.vector_store %arg19[%c5_279, %c0_280, %c0_281], %1063 {strides = array<i32>} : memref<8x3x128xf32, #tpu.memory_space<vmem>>, vector<1x3x128xf32>,
    %c5_i32 = arith.constant 5 : i32
    %1064 = vector.broadcast %c5_i32 : i32 to vector<3x1xi32>
    %1065 = arith.cmpi sgt, %285, %1064 : vector<3x1xi32>
    %1066 = arith.extui %1065 : vector<3x1xi1> to vector<3x1xi32>
    %1067 = arith.sitofp %1066 : vector<3x1xi32> to vector<3x1xf32>
    %c5_i32_282 = arith.constant 5 : i32
    %1068 = vector.broadcast %c5_i32_282 : i32 to vector<3x1xi32>
    %1069 = arith.cmpi sgt, %286, %1068 : vector<3x1xi32>
    %1070 = arith.extui %1069 : vector<3x1xi1> to vector<3x1xi32>
    %1071 = arith.sitofp %1070 : vector<3x1xi32> to vector<3x1xf32>
    %c5_283 = arith.constant 5 : index
    %c0_284 = arith.constant 0 : index
    %c0_285 = arith.constant 0 : index
    %1072 = vector.load %arg14[%c5_283, %c0_284, %c0_285] : memref<8x3x1xi32, #tpu.memory_space<vmem>>, vector<1x3x1xi32>
    %1073 = vector.shape_cast %1072 : vector<1x3x1xi32> to vector<3x1xi32>
    %1074 = vector.broadcast %1067 : vector<3x1xf32> to vector<3x128xf32>
    %1075 = arith.mulf %1053, %1074 : vector<3x128xf32>
    %cst_286 = arith.constant dense<0xFF800000> : vector<3xf32>
    %1076 = vector.multi_reduction <maximumf>, %1075, %cst_286 [1] : vector<3x128xf32> to vector<3xf32>
    %1077 = vector.shape_cast %1076 : vector<3xf32> to vector<3x1xf32>
    %1078 = vector.broadcast %1077 : vector<3x1xf32> to vector<3x128xf32>
    %1079 = arith.subf %1075, %1078 : vector<3x128xf32>
    %1080 = math.exp %1079 : vector<3x128xf32>
    %cst_287 = arith.constant dense<0.000000e+00> : vector<3xf32>
    %1081 = vector.multi_reduction <add>, %1080, %cst_287 [1] : vector<3x128xf32> to vector<3xf32>
    %1082 = vector.shape_cast %1081 : vector<3xf32> to vector<3x1xf32>
    %1083 = math.log %1082 : vector<3x1xf32>
    %1084 = vector.broadcast %1083 : vector<3x1xf32> to vector<3x128xf32>
    %1085 = arith.subf %1079, %1084 : vector<3x128xf32>
    %1086 = vector.broadcast %1073 : vector<3x1xi32> to vector<3x128xi32>
    %1087 = arith.cmpi eq, %287, %1086 : vector<3x128xi32>
    %cst_288 = arith.constant 0.000000e+00 : f32
    %1088 = vector.broadcast %cst_288 : f32 to vector<3x128xf32>
    %1089 = arith.select %1087, %1085, %1088 : vector<3x128xi1>, vector<3x128xf32>
    %1090 = vector.shape_cast %1089 : vector<3x128xf32> to vector<1x3x128xf32>
    %cst_289 = arith.constant dense<0.000000e+00> : vector<1xf32>
    %1091 = vector.multi_reduction <add>, %1090, %cst_289 [1, 2] : vector<1x3x128xf32> to vector<1xf32>
    %1092 = vector.shape_cast %1091 : vector<1xf32> to vector<1x1x1xf32>
    %1093 = vector.extract %1092[0, 0, 0] : f32 from vector<1x1x1xf32>
    %cst_290 = arith.constant 0.000000e+00 : f32
    %1094 = arith.subf %cst_290, %1093 : f32
    %1095 = arith.addf %981, %1094 : f32
    %c5_291 = arith.constant 5 : index
    %c0_292 = arith.constant 0 : index
    %c0_293 = arith.constant 0 : index
    %1096 = vector.load %arg15[%c5_291, %c0_292, %c0_293] : memref<8x3x1xi32, #tpu.memory_space<vmem>>, vector<1x3x1xi32>
    %1097 = vector.shape_cast %1096 : vector<1x3x1xi32> to vector<3x1xi32>
    %1098 = vector.broadcast %1071 : vector<3x1xf32> to vector<3x128xf32>
    %1099 = arith.mulf %1057, %1098 : vector<3x128xf32>
    %cst_294 = arith.constant dense<0xFF800000> : vector<3xf32>
    %1100 = vector.multi_reduction <maximumf>, %1099, %cst_294 [1] : vector<3x128xf32> to vector<3xf32>
    %1101 = vector.shape_cast %1100 : vector<3xf32> to vector<3x1xf32>
    %1102 = vector.broadcast %1101 : vector<3x1xf32> to vector<3x128xf32>
    %1103 = arith.subf %1099, %1102 : vector<3x128xf32>
    %1104 = math.exp %1103 : vector<3x128xf32>
    %cst_295 = arith.constant dense<0.000000e+00> : vector<3xf32>
    %1105 = vector.multi_reduction <add>, %1104, %cst_295 [1] : vector<3x128xf32> to vector<3xf32>
    %1106 = vector.shape_cast %1105 : vector<3xf32> to vector<3x1xf32>
    %1107 = math.log %1106 : vector<3x1xf32>
    %1108 = vector.broadcast %1107 : vector<3x1xf32> to vector<3x128xf32>
    %1109 = arith.subf %1103, %1108 : vector<3x128xf32>
    %1110 = vector.broadcast %1097 : vector<3x1xi32> to vector<3x128xi32>
    %1111 = arith.cmpi eq, %287, %1110 : vector<3x128xi32>
    %cst_296 = arith.constant 0.000000e+00 : f32
    %1112 = vector.broadcast %cst_296 : f32 to vector<3x128xf32>
    %1113 = arith.select %1111, %1109, %1112 : vector<3x128xi1>, vector<3x128xf32>
    %1114 = vector.shape_cast %1113 : vector<3x128xf32> to vector<1x3x128xf32>
    %cst_297 = arith.constant dense<0.000000e+00> : vector<1xf32>
    %1115 = vector.multi_reduction <add>, %1114, %cst_297 [1, 2] : vector<1x3x128xf32> to vector<1xf32>
    %1116 = vector.shape_cast %1115 : vector<1xf32> to vector<1x1x1xf32>
    %1117 = vector.extract %1116[0, 0, 0] : f32 from vector<1x1x1xf32>
    %cst_298 = arith.constant 0.000000e+00 : f32
    %1118 = arith.subf %cst_298, %1117 : f32
    %1119 = arith.addf %1095, %1118 : f32
    %1120 = vector.extract_strided_slice %1 {offsets = [5, 0, 0], sizes = [1, 3, 32], strides = [1, 1, 1]} : vector<8x4x32xf32> to vector<1x3x32xf32>
    %1121 = vector.shape_cast %1120 : vector<1x3x32xf32> to vector<3x32xf32>
    %1122 = arith.truncf %1121 : vector<3x32xf32> to vector<3x32xbf16>
    %1123 = vector.extract_strided_slice %1 {offsets = [5, 1, 0], sizes = [1, 3, 32], strides = [1, 1, 1]} : vector<8x4x32xf32> to vector<1x3x32xf32>
    %1124 = vector.shape_cast %1123 : vector<1x3x32xf32> to vector<3x32xf32>
    %1125 = arith.truncf %1124 : vector<3x32xf32> to vector<3x32xbf16>
    %c0_299 = arith.constant 0 : index
    %c0_300 = arith.constant 0 : index
    %1126 = vector.load %arg5[%c0_299, %c0_300] : memref<32x128xbf16, #tpu.memory_space<vmem>>, vector<32x128xbf16>
    %cst_301 = arith.constant dense<0.000000e+00> : vector<3x128xf32>
    %1127 = tpu.matmul %1122, %1126, %cst_301 {dimension_numbers = #tpu.dot_dimension_numbers<[1], [0], [0], [1], [0, 0, 1, 1], [], []>} : vector<3x32xbf16>, vector<32x128xbf16>, vector<3x128xf32> -> vector<3x128xf32>
    %1128 = arith.addf %293, %1127 : vector<3x128xf32>
    %c0_302 = arith.constant 0 : index
    %c0_303 = arith.constant 0 : index
    %1129 = vector.load %arg9[%c0_302, %c0_303] : memref<32x128xbf16, #tpu.memory_space<vmem>>, vector<32x128xbf16>
    %cst_304 = arith.constant dense<0.000000e+00> : vector<3x128xf32>
    %1130 = tpu.matmul %1125, %1129, %cst_304 {dimension_numbers = #tpu.dot_dimension_numbers<[1], [0], [0], [1], [0, 0, 1, 1], [], []>} : vector<3x32xbf16>, vector<32x128xbf16>, vector<3x128xf32> -> vector<3x128xf32>
    %1131 = arith.addf %299, %1130 : vector<3x128xf32>
    %1132 = arith.truncf %1024 : vector<3x32xf32> to vector<3x32xbf16>
    %cst_305 = arith.constant dense<0.000000e+00> : vector<3x128xf32>
    %1133 = tpu.matmul %1132, %279, %cst_305 {dimension_numbers = #tpu.dot_dimension_numbers<[1], [0], [0], [1], [0, 0, 1, 1], [], []>} : vector<3x32xbf16>, vector<32x128xbf16>, vector<3x128xf32> -> vector<3x128xf32>
    %1134 = arith.addf %1128, %1133 : vector<3x128xf32>
    %1135 = arith.truncf %1049 : vector<3x32xf32> to vector<3x32xbf16>
    %cst_306 = arith.constant dense<0.000000e+00> : vector<3x128xf32>
    %1136 = tpu.matmul %1135, %280, %cst_306 {dimension_numbers = #tpu.dot_dimension_numbers<[1], [0], [0], [1], [0, 0, 1, 1], [], []>} : vector<3x32xbf16>, vector<32x128xbf16>, vector<3x128xf32> -> vector<3x128xf32>
    %1137 = arith.addf %1131, %1136 : vector<3x128xf32>
    %1138 = vector.extract_strided_slice %1134 {offsets = [0, 0], sizes = [3, 32], strides = [1, 1]} : vector<3x128xf32> to vector<3x32xf32>
    %1139 = arith.negf %1138 : vector<3x32xf32>
    %1140 = math.exp %1139 : vector<3x32xf32>
    %cst_307 = arith.constant 1.000000e+00 : f32
    %1141 = vector.broadcast %cst_307 : f32 to vector<3x32xf32>
    %1142 = arith.addf %1141, %1140 : vector<3x32xf32>
    %1143 = arith.divf %1141, %1142 : vector<3x32xf32>
    %1144 = vector.extract_strided_slice %1134 {offsets = [0, 32], sizes = [3, 32], strides = [1, 1]} : vector<3x128xf32> to vector<3x32xf32>
    %1145 = arith.negf %1144 : vector<3x32xf32>
    %1146 = math.exp %1145 : vector<3x32xf32>
    %cst_308 = arith.constant 1.000000e+00 : f32
    %1147 = vector.broadcast %cst_308 : f32 to vector<3x32xf32>
    %1148 = arith.addf %1147, %1146 : vector<3x32xf32>
    %1149 = arith.divf %1147, %1148 : vector<3x32xf32>
    %1150 = vector.extract_strided_slice %1134 {offsets = [0, 64], sizes = [3, 32], strides = [1, 1]} : vector<3x128xf32> to vector<3x32xf32>
    %1151 = math.tanh %1150 : vector<3x32xf32>
    %1152 = vector.extract_strided_slice %1134 {offsets = [0, 96], sizes = [3, 32], strides = [1, 1]} : vector<3x128xf32> to vector<3x32xf32>
    %1153 = arith.negf %1152 : vector<3x32xf32>
    %1154 = math.exp %1153 : vector<3x32xf32>
    %cst_309 = arith.constant 1.000000e+00 : f32
    %1155 = vector.broadcast %cst_309 : f32 to vector<3x32xf32>
    %1156 = arith.addf %1155, %1154 : vector<3x32xf32>
    %1157 = arith.divf %1155, %1156 : vector<3x32xf32>
    %1158 = arith.mulf %1149, %1022 : vector<3x32xf32>
    %1159 = arith.mulf %1143, %1151 : vector<3x32xf32>
    %1160 = arith.addf %1158, %1159 : vector<3x32xf32>
    %1161 = math.tanh %1160 : vector<3x32xf32>
    %1162 = arith.mulf %1157, %1161 : vector<3x32xf32>
    %1163 = vector.extract_strided_slice %1137 {offsets = [0, 0], sizes = [3, 32], strides = [1, 1]} : vector<3x128xf32> to vector<3x32xf32>
    %1164 = arith.negf %1163 : vector<3x32xf32>
    %1165 = math.exp %1164 : vector<3x32xf32>
    %cst_310 = arith.constant 1.000000e+00 : f32
    %1166 = vector.broadcast %cst_310 : f32 to vector<3x32xf32>
    %1167 = arith.addf %1166, %1165 : vector<3x32xf32>
    %1168 = arith.divf %1166, %1167 : vector<3x32xf32>
    %1169 = vector.extract_strided_slice %1137 {offsets = [0, 32], sizes = [3, 32], strides = [1, 1]} : vector<3x128xf32> to vector<3x32xf32>
    %1170 = arith.negf %1169 : vector<3x32xf32>
    %1171 = math.exp %1170 : vector<3x32xf32>
    %cst_311 = arith.constant 1.000000e+00 : f32
    %1172 = vector.broadcast %cst_311 : f32 to vector<3x32xf32>
    %1173 = arith.addf %1172, %1171 : vector<3x32xf32>
    %1174 = arith.divf %1172, %1173 : vector<3x32xf32>
    %1175 = vector.extract_strided_slice %1137 {offsets = [0, 64], sizes = [3, 32], strides = [1, 1]} : vector<3x128xf32> to vector<3x32xf32>
    %1176 = math.tanh %1175 : vector<3x32xf32>
    %1177 = vector.extract_strided_slice %1137 {offsets = [0, 96], sizes = [3, 32], strides = [1, 1]} : vector<3x128xf32> to vector<3x32xf32>
    %1178 = arith.negf %1177 : vector<3x32xf32>
    %1179 = math.exp %1178 : vector<3x32xf32>
    %cst_312 = arith.constant 1.000000e+00 : f32
    %1180 = vector.broadcast %cst_312 : f32 to vector<3x32xf32>
    %1181 = arith.addf %1180, %1179 : vector<3x32xf32>
    %1182 = arith.divf %1180, %1181 : vector<3x32xf32>
    %1183 = arith.mulf %1174, %1047 : vector<3x32xf32>
    %1184 = arith.mulf %1168, %1176 : vector<3x32xf32>
    %1185 = arith.addf %1183, %1184 : vector<3x32xf32>
    %1186 = math.tanh %1185 : vector<3x32xf32>
    %1187 = arith.mulf %1182, %1186 : vector<3x32xf32>
    %1188 = arith.truncf %1162 : vector<3x32xf32> to vector<3x32xbf16>
    %cst_313 = arith.constant dense<0.000000e+00> : vector<3x128xf32>
    %1189 = tpu.matmul %1188, %283, %cst_313 {dimension_numbers = #tpu.dot_dimension_numbers<[1], [0], [0], [1], [0, 0, 1, 1], [], []>} : vector<3x32xbf16>, vector<32x128xbf16>, vector<3x128xf32> -> vector<3x128xf32>
    %1190 = vector.broadcast %284 : vector<1x128xf32> to vector<3x128xf32>
    %1191 = arith.addf %1189, %1190 : vector<3x128xf32>
    %1192 = arith.truncf %1187 : vector<3x32xf32> to vector<3x32xbf16>
    %cst_314 = arith.constant dense<0.000000e+00> : vector<3x128xf32>
    %1193 = tpu.matmul %1192, %283, %cst_314 {dimension_numbers = #tpu.dot_dimension_numbers<[1], [0], [0], [1], [0, 0, 1, 1], [], []>} : vector<3x32xbf16>, vector<32x128xbf16>, vector<3x128xf32> -> vector<3x128xf32>
    %1194 = vector.broadcast %284 : vector<1x128xf32> to vector<3x128xf32>
    %1195 = arith.addf %1193, %1194 : vector<3x128xf32>
    %c6 = arith.constant 6 : index
    %c0_315 = arith.constant 0 : index
    %c0_316 = arith.constant 0 : index
    %1196 = vector.load %arg18[%c6, %c0_315, %c0_316] : memref<8x3x128xf32, #tpu.memory_space<vmem>>, vector<1x3x128xf32>
    %1197 = vector.shape_cast %1196 : vector<1x3x128xf32> to vector<3x128xf32>
    %1198 = vector.shape_cast %1191 : vector<3x128xf32> to vector<1x3x128xf32>
    tpu.vector_store %arg18[%c6, %c0_315, %c0_316], %1198 {strides = array<i32>} : memref<8x3x128xf32, #tpu.memory_space<vmem>>, vector<1x3x128xf32>,
    %c6_317 = arith.constant 6 : index
    %c0_318 = arith.constant 0 : index
    %c0_319 = arith.constant 0 : index
    %1199 = vector.load %arg19[%c6_317, %c0_318, %c0_319] : memref<8x3x128xf32, #tpu.memory_space<vmem>>, vector<1x3x128xf32>
    %1200 = vector.shape_cast %1199 : vector<1x3x128xf32> to vector<3x128xf32>
    %1201 = vector.shape_cast %1195 : vector<3x128xf32> to vector<1x3x128xf32>
    tpu.vector_store %arg19[%c6_317, %c0_318, %c0_319], %1201 {strides = array<i32>} : memref<8x3x128xf32, #tpu.memory_space<vmem>>, vector<1x3x128xf32>,
    %c6_i32 = arith.constant 6 : i32
    %1202 = vector.broadcast %c6_i32 : i32 to vector<3x1xi32>
    %1203 = arith.cmpi sgt, %285, %1202 : vector<3x1xi32>
    %1204 = arith.extui %1203 : vector<3x1xi1> to vector<3x1xi32>
    %1205 = arith.sitofp %1204 : vector<3x1xi32> to vector<3x1xf32>
    %c6_i32_320 = arith.constant 6 : i32
    %1206 = vector.broadcast %c6_i32_320 : i32 to vector<3x1xi32>
    %1207 = arith.cmpi sgt, %286, %1206 : vector<3x1xi32>
    %1208 = arith.extui %1207 : vector<3x1xi1> to vector<3x1xi32>
    %1209 = arith.sitofp %1208 : vector<3x1xi32> to vector<3x1xf32>
    %c6_321 = arith.constant 6 : index
    %c0_322 = arith.constant 0 : index
    %c0_323 = arith.constant 0 : index
    %1210 = vector.load %arg14[%c6_321, %c0_322, %c0_323] : memref<8x3x1xi32, #tpu.memory_space<vmem>>, vector<1x3x1xi32>
    %1211 = vector.shape_cast %1210 : vector<1x3x1xi32> to vector<3x1xi32>
    %1212 = vector.broadcast %1205 : vector<3x1xf32> to vector<3x128xf32>
    %1213 = arith.mulf %1191, %1212 : vector<3x128xf32>
    %cst_324 = arith.constant dense<0xFF800000> : vector<3xf32>
    %1214 = vector.multi_reduction <maximumf>, %1213, %cst_324 [1] : vector<3x128xf32> to vector<3xf32>
    %1215 = vector.shape_cast %1214 : vector<3xf32> to vector<3x1xf32>
    %1216 = vector.broadcast %1215 : vector<3x1xf32> to vector<3x128xf32>
    %1217 = arith.subf %1213, %1216 : vector<3x128xf32>
    %1218 = math.exp %1217 : vector<3x128xf32>
    %cst_325 = arith.constant dense<0.000000e+00> : vector<3xf32>
    %1219 = vector.multi_reduction <add>, %1218, %cst_325 [1] : vector<3x128xf32> to vector<3xf32>
    %1220 = vector.shape_cast %1219 : vector<3xf32> to vector<3x1xf32>
    %1221 = math.log %1220 : vector<3x1xf32>
    %1222 = vector.broadcast %1221 : vector<3x1xf32> to vector<3x128xf32>
    %1223 = arith.subf %1217, %1222 : vector<3x128xf32>
    %1224 = vector.broadcast %1211 : vector<3x1xi32> to vector<3x128xi32>
    %1225 = arith.cmpi eq, %287, %1224 : vector<3x128xi32>
    %cst_326 = arith.constant 0.000000e+00 : f32
    %1226 = vector.broadcast %cst_326 : f32 to vector<3x128xf32>
    %1227 = arith.select %1225, %1223, %1226 : vector<3x128xi1>, vector<3x128xf32>
    %1228 = vector.shape_cast %1227 : vector<3x128xf32> to vector<1x3x128xf32>
    %cst_327 = arith.constant dense<0.000000e+00> : vector<1xf32>
    %1229 = vector.multi_reduction <add>, %1228, %cst_327 [1, 2] : vector<1x3x128xf32> to vector<1xf32>
    %1230 = vector.shape_cast %1229 : vector<1xf32> to vector<1x1x1xf32>
    %1231 = vector.extract %1230[0, 0, 0] : f32 from vector<1x1x1xf32>
    %cst_328 = arith.constant 0.000000e+00 : f32
    %1232 = arith.subf %cst_328, %1231 : f32
    %1233 = arith.addf %1119, %1232 : f32
    %c6_329 = arith.constant 6 : index
    %c0_330 = arith.constant 0 : index
    %c0_331 = arith.constant 0 : index
    %1234 = vector.load %arg15[%c6_329, %c0_330, %c0_331] : memref<8x3x1xi32, #tpu.memory_space<vmem>>, vector<1x3x1xi32>
    %1235 = vector.shape_cast %1234 : vector<1x3x1xi32> to vector<3x1xi32>
    %1236 = vector.broadcast %1209 : vector<3x1xf32> to vector<3x128xf32>
    %1237 = arith.mulf %1195, %1236 : vector<3x128xf32>
    %cst_332 = arith.constant dense<0xFF800000> : vector<3xf32>
    %1238 = vector.multi_reduction <maximumf>, %1237, %cst_332 [1] : vector<3x128xf32> to vector<3xf32>
    %1239 = vector.shape_cast %1238 : vector<3xf32> to vector<3x1xf32>
    %1240 = vector.broadcast %1239 : vector<3x1xf32> to vector<3x128xf32>
    %1241 = arith.subf %1237, %1240 : vector<3x128xf32>
    %1242 = math.exp %1241 : vector<3x128xf32>
    %cst_333 = arith.constant dense<0.000000e+00> : vector<3xf32>
    %1243 = vector.multi_reduction <add>, %1242, %cst_333 [1] : vector<3x128xf32> to vector<3xf32>
    %1244 = vector.shape_cast %1243 : vector<3xf32> to vector<3x1xf32>
    %1245 = math.log %1244 : vector<3x1xf32>
    %1246 = vector.broadcast %1245 : vector<3x1xf32> to vector<3x128xf32>
    %1247 = arith.subf %1241, %1246 : vector<3x128xf32>
    %1248 = vector.broadcast %1235 : vector<3x1xi32> to vector<3x128xi32>
    %1249 = arith.cmpi eq, %287, %1248 : vector<3x128xi32>
    %cst_334 = arith.constant 0.000000e+00 : f32
    %1250 = vector.broadcast %cst_334 : f32 to vector<3x128xf32>
    %1251 = arith.select %1249, %1247, %1250 : vector<3x128xi1>, vector<3x128xf32>
    %1252 = vector.shape_cast %1251 : vector<3x128xf32> to vector<1x3x128xf32>
    %cst_335 = arith.constant dense<0.000000e+00> : vector<1xf32>
    %1253 = vector.multi_reduction <add>, %1252, %cst_335 [1, 2] : vector<1x3x128xf32> to vector<1xf32>
    %1254 = vector.shape_cast %1253 : vector<1xf32> to vector<1x1x1xf32>
    %1255 = vector.extract %1254[0, 0, 0] : f32 from vector<1x1x1xf32>
    %cst_336 = arith.constant 0.000000e+00 : f32
    %1256 = arith.subf %cst_336, %1255 : f32
    %1257 = arith.addf %1233, %1256 : f32
    %1258 = vector.extract_strided_slice %1 {offsets = [6, 0, 0], sizes = [1, 3, 32], strides = [1, 1, 1]} : vector<8x4x32xf32> to vector<1x3x32xf32>
    %1259 = vector.shape_cast %1258 : vector<1x3x32xf32> to vector<3x32xf32>
    %1260 = arith.truncf %1259 : vector<3x32xf32> to vector<3x32xbf16>
    %1261 = vector.extract_strided_slice %1 {offsets = [6, 1, 0], sizes = [1, 3, 32], strides = [1, 1, 1]} : vector<8x4x32xf32> to vector<1x3x32xf32>
    %1262 = vector.shape_cast %1261 : vector<1x3x32xf32> to vector<3x32xf32>
    %1263 = arith.truncf %1262 : vector<3x32xf32> to vector<3x32xbf16>
    %c0_337 = arith.constant 0 : index
    %c0_338 = arith.constant 0 : index
    %1264 = vector.load %arg5[%c0_337, %c0_338] : memref<32x128xbf16, #tpu.memory_space<vmem>>, vector<32x128xbf16>
    %cst_339 = arith.constant dense<0.000000e+00> : vector<3x128xf32>
    %1265 = tpu.matmul %1260, %1264, %cst_339 {dimension_numbers = #tpu.dot_dimension_numbers<[1], [0], [0], [1], [0, 0, 1, 1], [], []>} : vector<3x32xbf16>, vector<32x128xbf16>, vector<3x128xf32> -> vector<3x128xf32>
    %1266 = arith.addf %293, %1265 : vector<3x128xf32>
    %c0_340 = arith.constant 0 : index
    %c0_341 = arith.constant 0 : index
    %1267 = vector.load %arg9[%c0_340, %c0_341] : memref<32x128xbf16, #tpu.memory_space<vmem>>, vector<32x128xbf16>
    %cst_342 = arith.constant dense<0.000000e+00> : vector<3x128xf32>
    %1268 = tpu.matmul %1263, %1267, %cst_342 {dimension_numbers = #tpu.dot_dimension_numbers<[1], [0], [0], [1], [0, 0, 1, 1], [], []>} : vector<3x32xbf16>, vector<32x128xbf16>, vector<3x128xf32> -> vector<3x128xf32>
    %1269 = arith.addf %299, %1268 : vector<3x128xf32>
    %1270 = arith.truncf %1162 : vector<3x32xf32> to vector<3x32xbf16>
    %cst_343 = arith.constant dense<0.000000e+00> : vector<3x128xf32>
    %1271 = tpu.matmul %1270, %279, %cst_343 {dimension_numbers = #tpu.dot_dimension_numbers<[1], [0], [0], [1], [0, 0, 1, 1], [], []>} : vector<3x32xbf16>, vector<32x128xbf16>, vector<3x128xf32> -> vector<3x128xf32>
    %1272 = arith.addf %1266, %1271 : vector<3x128xf32>
    %1273 = arith.truncf %1187 : vector<3x32xf32> to vector<3x32xbf16>
    %cst_344 = arith.constant dense<0.000000e+00> : vector<3x128xf32>
    %1274 = tpu.matmul %1273, %280, %cst_344 {dimension_numbers = #tpu.dot_dimension_numbers<[1], [0], [0], [1], [0, 0, 1, 1], [], []>} : vector<3x32xbf16>, vector<32x128xbf16>, vector<3x128xf32> -> vector<3x128xf32>
    %1275 = arith.addf %1269, %1274 : vector<3x128xf32>
    %1276 = vector.extract_strided_slice %1272 {offsets = [0, 0], sizes = [3, 32], strides = [1, 1]} : vector<3x128xf32> to vector<3x32xf32>
    %1277 = arith.negf %1276 : vector<3x32xf32>
    %1278 = math.exp %1277 : vector<3x32xf32>
    %cst_345 = arith.constant 1.000000e+00 : f32
    %1279 = vector.broadcast %cst_345 : f32 to vector<3x32xf32>
    %1280 = arith.addf %1279, %1278 : vector<3x32xf32>
    %1281 = arith.divf %1279, %1280 : vector<3x32xf32>
    %1282 = vector.extract_strided_slice %1272 {offsets = [0, 32], sizes = [3, 32], strides = [1, 1]} : vector<3x128xf32> to vector<3x32xf32>
    %1283 = arith.negf %1282 : vector<3x32xf32>
    %1284 = math.exp %1283 : vector<3x32xf32>
    %cst_346 = arith.constant 1.000000e+00 : f32
    %1285 = vector.broadcast %cst_346 : f32 to vector<3x32xf32>
    %1286 = arith.addf %1285, %1284 : vector<3x32xf32>
    %1287 = arith.divf %1285, %1286 : vector<3x32xf32>
    %1288 = vector.extract_strided_slice %1272 {offsets = [0, 64], sizes = [3, 32], strides = [1, 1]} : vector<3x128xf32> to vector<3x32xf32>
    %1289 = math.tanh %1288 : vector<3x32xf32>
    %1290 = vector.extract_strided_slice %1272 {offsets = [0, 96], sizes = [3, 32], strides = [1, 1]} : vector<3x128xf32> to vector<3x32xf32>
    %1291 = arith.negf %1290 : vector<3x32xf32>
    %1292 = math.exp %1291 : vector<3x32xf32>
    %cst_347 = arith.constant 1.000000e+00 : f32
    %1293 = vector.broadcast %cst_347 : f32 to vector<3x32xf32>
    %1294 = arith.addf %1293, %1292 : vector<3x32xf32>
    %1295 = arith.divf %1293, %1294 : vector<3x32xf32>
    %1296 = arith.mulf %1287, %1160 : vector<3x32xf32>
    %1297 = arith.mulf %1281, %1289 : vector<3x32xf32>
    %1298 = arith.addf %1296, %1297 : vector<3x32xf32>
    %1299 = math.tanh %1298 : vector<3x32xf32>
    %1300 = arith.mulf %1295, %1299 : vector<3x32xf32>
    %1301 = vector.extract_strided_slice %1275 {offsets = [0, 0], sizes = [3, 32], strides = [1, 1]} : vector<3x128xf32> to vector<3x32xf32>
    %1302 = arith.negf %1301 : vector<3x32xf32>
    %1303 = math.exp %1302 : vector<3x32xf32>
    %cst_348 = arith.constant 1.000000e+00 : f32
    %1304 = vector.broadcast %cst_348 : f32 to vector<3x32xf32>
    %1305 = arith.addf %1304, %1303 : vector<3x32xf32>
    %1306 = arith.divf %1304, %1305 : vector<3x32xf32>
    %1307 = vector.extract_strided_slice %1275 {offsets = [0, 32], sizes = [3, 32], strides = [1, 1]} : vector<3x128xf32> to vector<3x32xf32>
    %1308 = arith.negf %1307 : vector<3x32xf32>
    %1309 = math.exp %1308 : vector<3x32xf32>
    %cst_349 = arith.constant 1.000000e+00 : f32
    %1310 = vector.broadcast %cst_349 : f32 to vector<3x32xf32>
    %1311 = arith.addf %1310, %1309 : vector<3x32xf32>
    %1312 = arith.divf %1310, %1311 : vector<3x32xf32>
    %1313 = vector.extract_strided_slice %1275 {offsets = [0, 64], sizes = [3, 32], strides = [1, 1]} : vector<3x128xf32> to vector<3x32xf32>
    %1314 = math.tanh %1313 : vector<3x32xf32>
    %1315 = vector.extract_strided_slice %1275 {offsets = [0, 96], sizes = [3, 32], strides = [1, 1]} : vector<3x128xf32> to vector<3x32xf32>
    %1316 = arith.negf %1315 : vector<3x32xf32>
    %1317 = math.exp %1316 : vector<3x32xf32>
    %cst_350 = arith.constant 1.000000e+00 : f32
    %1318 = vector.broadcast %cst_350 : f32 to vector<3x32xf32>
    %1319 = arith.addf %1318, %1317 : vector<3x32xf32>
    %1320 = arith.divf %1318, %1319 : vector<3x32xf32>
    %1321 = arith.mulf %1312, %1185 : vector<3x32xf32>
    %1322 = arith.mulf %1306, %1314 : vector<3x32xf32>
    %1323 = arith.addf %1321, %1322 : vector<3x32xf32>
    %1324 = math.tanh %1323 : vector<3x32xf32>
    %1325 = arith.mulf %1320, %1324 : vector<3x32xf32>
    %1326 = arith.truncf %1300 : vector<3x32xf32> to vector<3x32xbf16>
    %cst_351 = arith.constant dense<0.000000e+00> : vector<3x128xf32>
    %1327 = tpu.matmul %1326, %283, %cst_351 {dimension_numbers = #tpu.dot_dimension_numbers<[1], [0], [0], [1], [0, 0, 1, 1], [], []>} : vector<3x32xbf16>, vector<32x128xbf16>, vector<3x128xf32> -> vector<3x128xf32>
    %1328 = vector.broadcast %284 : vector<1x128xf32> to vector<3x128xf32>
    %1329 = arith.addf %1327, %1328 : vector<3x128xf32>
    %1330 = arith.truncf %1325 : vector<3x32xf32> to vector<3x32xbf16>
    %cst_352 = arith.constant dense<0.000000e+00> : vector<3x128xf32>
    %1331 = tpu.matmul %1330, %283, %cst_352 {dimension_numbers = #tpu.dot_dimension_numbers<[1], [0], [0], [1], [0, 0, 1, 1], [], []>} : vector<3x32xbf16>, vector<32x128xbf16>, vector<3x128xf32> -> vector<3x128xf32>
    %1332 = vector.broadcast %284 : vector<1x128xf32> to vector<3x128xf32>
    %1333 = arith.addf %1331, %1332 : vector<3x128xf32>
    %c7 = arith.constant 7 : index
    %c0_353 = arith.constant 0 : index
    %c0_354 = arith.constant 0 : index
    %1334 = vector.load %arg18[%c7, %c0_353, %c0_354] : memref<8x3x128xf32, #tpu.memory_space<vmem>>, vector<1x3x128xf32>
    %1335 = vector.shape_cast %1334 : vector<1x3x128xf32> to vector<3x128xf32>
    %1336 = vector.shape_cast %1329 : vector<3x128xf32> to vector<1x3x128xf32>
    tpu.vector_store %arg18[%c7, %c0_353, %c0_354], %1336 {strides = array<i32>} : memref<8x3x128xf32, #tpu.memory_space<vmem>>, vector<1x3x128xf32>,
    %c7_355 = arith.constant 7 : index
    %c0_356 = arith.constant 0 : index
    %c0_357 = arith.constant 0 : index
    %1337 = vector.load %arg19[%c7_355, %c0_356, %c0_357] : memref<8x3x128xf32, #tpu.memory_space<vmem>>, vector<1x3x128xf32>
    %1338 = vector.shape_cast %1337 : vector<1x3x128xf32> to vector<3x128xf32>
    %1339 = vector.shape_cast %1333 : vector<3x128xf32> to vector<1x3x128xf32>
    tpu.vector_store %arg19[%c7_355, %c0_356, %c0_357], %1339 {strides = array<i32>} : memref<8x3x128xf32, #tpu.memory_space<vmem>>, vector<1x3x128xf32>,
    %c7_i32 = arith.constant 7 : i32
    %1340 = vector.broadcast %c7_i32 : i32 to vector<3x1xi32>
    %1341 = arith.cmpi sgt, %285, %1340 : vector<3x1xi32>
    %1342 = arith.extui %1341 : vector<3x1xi1> to vector<3x1xi32>
    %1343 = arith.sitofp %1342 : vector<3x1xi32> to vector<3x1xf32>
    %c7_i32_358 = arith.constant 7 : i32
    %1344 = vector.broadcast %c7_i32_358 : i32 to vector<3x1xi32>
    %1345 = arith.cmpi sgt, %286, %1344 : vector<3x1xi32>
    %1346 = arith.extui %1345 : vector<3x1xi1> to vector<3x1xi32>
    %1347 = arith.sitofp %1346 : vector<3x1xi32> to vector<3x1xf32>
    %c7_359 = arith.constant 7 : index
    %c0_360 = arith.constant 0 : index
    %c0_361 = arith.constant 0 : index
    %1348 = vector.load %arg14[%c7_359, %c0_360, %c0_361] : memref<8x3x1xi32, #tpu.memory_space<vmem>>, vector<1x3x1xi32>
    %1349 = vector.shape_cast %1348 : vector<1x3x1xi32> to vector<3x1xi32>
    %1350 = vector.broadcast %1343 : vector<3x1xf32> to vector<3x128xf32>
    %1351 = arith.mulf %1329, %1350 : vector<3x128xf32>
    %cst_362 = arith.constant dense<0xFF800000> : vector<3xf32>
    %1352 = vector.multi_reduction <maximumf>, %1351, %cst_362 [1] : vector<3x128xf32> to vector<3xf32>
    %1353 = vector.shape_cast %1352 : vector<3xf32> to vector<3x1xf32>
    %1354 = vector.broadcast %1353 : vector<3x1xf32> to vector<3x128xf32>
    %1355 = arith.subf %1351, %1354 : vector<3x128xf32>
    %1356 = math.exp %1355 : vector<3x128xf32>
    %cst_363 = arith.constant dense<0.000000e+00> : vector<3xf32>
    %1357 = vector.multi_reduction <add>, %1356, %cst_363 [1] : vector<3x128xf32> to vector<3xf32>
    %1358 = vector.shape_cast %1357 : vector<3xf32> to vector<3x1xf32>
    %1359 = math.log %1358 : vector<3x1xf32>
    %1360 = vector.broadcast %1359 : vector<3x1xf32> to vector<3x128xf32>
    %1361 = arith.subf %1355, %1360 : vector<3x128xf32>
    %1362 = vector.broadcast %1349 : vector<3x1xi32> to vector<3x128xi32>
    %1363 = arith.cmpi eq, %287, %1362 : vector<3x128xi32>
    %cst_364 = arith.constant 0.000000e+00 : f32
    %1364 = vector.broadcast %cst_364 : f32 to vector<3x128xf32>
    %1365 = arith.select %1363, %1361, %1364 : vector<3x128xi1>, vector<3x128xf32>
    %1366 = vector.shape_cast %1365 : vector<3x128xf32> to vector<1x3x128xf32>
    %cst_365 = arith.constant dense<0.000000e+00> : vector<1xf32>
    %1367 = vector.multi_reduction <add>, %1366, %cst_365 [1, 2] : vector<1x3x128xf32> to vector<1xf32>
    %1368 = vector.shape_cast %1367 : vector<1xf32> to vector<1x1x1xf32>
    %1369 = vector.extract %1368[0, 0, 0] : f32 from vector<1x1x1xf32>
    %cst_366 = arith.constant 0.000000e+00 : f32
    %1370 = arith.subf %cst_366, %1369 : f32
    %1371 = arith.addf %1257, %1370 : f32
    %c7_367 = arith.constant 7 : index
    %c0_368 = arith.constant 0 : index
    %c0_369 = arith.constant 0 : index
    %1372 = vector.load %arg15[%c7_367, %c0_368, %c0_369] : memref<8x3x1xi32, #tpu.memory_space<vmem>>, vector<1x3x1xi32>
    %1373 = vector.shape_cast %1372 : vector<1x3x1xi32> to vector<3x1xi32>
    %1374 = vector.broadcast %1347 : vector<3x1xf32> to vector<3x128xf32>
    %1375 = arith.mulf %1333, %1374 : vector<3x128xf32>
    %cst_370 = arith.constant dense<0xFF800000> : vector<3xf32>
    %1376 = vector.multi_reduction <maximumf>, %1375, %cst_370 [1] : vector<3x128xf32> to vector<3xf32>
    %1377 = vector.shape_cast %1376 : vector<3xf32> to vector<3x1xf32>
    %1378 = vector.broadcast %1377 : vector<3x1xf32> to vector<3x128xf32>
    %1379 = arith.subf %1375, %1378 : vector<3x128xf32>
    %1380 = math.exp %1379 : vector<3x128xf32>
    %cst_371 = arith.constant dense<0.000000e+00> : vector<3xf32>
    %1381 = vector.multi_reduction <add>, %1380, %cst_371 [1] : vector<3x128xf32> to vector<3xf32>
    %1382 = vector.shape_cast %1381 : vector<3xf32> to vector<3x1xf32>
    %1383 = math.log %1382 : vector<3x1xf32>
    %1384 = vector.broadcast %1383 : vector<3x1xf32> to vector<3x128xf32>
    %1385 = arith.subf %1379, %1384 : vector<3x128xf32>
    %1386 = vector.broadcast %1373 : vector<3x1xi32> to vector<3x128xi32>
    %1387 = arith.cmpi eq, %287, %1386 : vector<3x128xi32>
    %cst_372 = arith.constant 0.000000e+00 : f32
    %1388 = vector.broadcast %cst_372 : f32 to vector<3x128xf32>
    %1389 = arith.select %1387, %1385, %1388 : vector<3x128xi1>, vector<3x128xf32>
    %1390 = vector.shape_cast %1389 : vector<3x128xf32> to vector<1x3x128xf32>
    %cst_373 = arith.constant dense<0.000000e+00> : vector<1xf32>
    %1391 = vector.multi_reduction <add>, %1390, %cst_373 [1, 2] : vector<1x3x128xf32> to vector<1xf32>
    %1392 = vector.shape_cast %1391 : vector<1xf32> to vector<1x1x1xf32>
    %1393 = vector.extract %1392[0, 0, 0] : f32 from vector<1x1x1xf32>
    %cst_374 = arith.constant 0.000000e+00 : f32
    %1394 = arith.subf %cst_374, %1393 : f32
    %1395 = arith.addf %1371, %1394 : f32
    %c0_375 = arith.constant 0 : index
    %c0_376 = arith.constant 0 : index
    %1396 = memref.load %arg20[%c0_375, %c0_376] : memref<1x1xf32, #tpu.memory_space<smem>>
    memref.store %1395, %arg20[%c0_375, %c0_376] : memref<1x1xf32, #tpu.memory_space<smem>>
    return
  }
}

</mosaic_0001>

<bundles_post_ra>
// kernel: uniskip_forward.1
= control target key start
LH: loop header
LB: loop body
LE: loop exit
PB: predicated region body
PF: predicated region fallthrough
CT: control target
= control target key end

     0   :  { %s5675_s0 = inlined_call_operand.vmem [shape: f32[8,4,32], index: 0, kind: input, shape index: {}]   ;;  %s5676_s1 = inlined_call_operand.vmem [shape: bf16[32,256], index: 1, kind: input, shape index: {}]   ;;  %s5677_s2 = inlined_call_operand.vmem [shape: bf16[64,256], index: 2, kind: input, shape index: {}]   ;;  %s5678_s3 = inlined_call_operand.vmem [shape: f32[1,256], index: 3, kind: input, shape index: {}]   ;;  %s5679_s4 = inlined_call_operand.vmem [shape: bf16[64,128], index: 4, kind: input, shape index: {}]   ;;  %s5680_s5 = inlined_call_operand.vmem [shape: bf16[32,128], index: 5, kind: input, shape index: {}]   ;;  %s5681_s6 = inlined_call_operand.vmem [shape: bf16[32,128], index: 6, kind: input, shape index: {}]   ;;  %s5682_s7 = inlined_call_operand.vmem [shape: f32[1,128], index: 7, kind: input, shape index: {}]   ;;  %s5683_s8 = inlined_call_operand.vmem [shape: bf16[64,128], index: 8, kind: input, shape index: {}]   ;;  %s5684_s9 = inlined_call_operand.vmem [shape: bf16[32,128], index: 9, kind: input, shape index: {}]   ;;  %s5685_s10 = inlined_call_operand.vmem [shape: bf16[32,128], index: 10, kind: input, shape index: {}]   ;;  %s5686_s11 = inlined_call_operand.vmem [shape: f32[1,128], index: 11, kind: input, shape index: {}]   ;;  %s5687_s12 = inlined_call_operand.vmem [shape: bf16[32,128], index: 12, kind: input, shape index: {}]   ;;  %s5688_s13 = inlined_call_operand.vmem [shape: f32[1,128], index: 13, kind: input, shape index: {}]   ;;  %s5689_s14 = inlined_call_operand.vmem [shape: s32[8,3,1], index: 14, kind: input, shape index: {}]   ;;  %s5690_s15 = inlined_call_operand.vmem [shape: s32[8,3,1], index: 15, kind: input, shape index: {}]   ;;  %s5691_s16 = inlined_call_operand.vmem [shape: s32[3,1], index: 16, kind: input, shape index: {}]   ;;  %s5692_s17 = inlined_call_operand.vmem [shape: s32[3,1], index: 17, kind: input, shape index: {}]   ;;  %s5693_s18 = inlined_call_operand.vmem [shape: f32[8,3,128], index: 18, kind: output, shape index: {0}]   ;;  %s5694_s19 = inlined_call_operand.vmem [shape: f32[8,3,128], index: 19, kind: output, shape index: {1}]   ;;  %s5695_s20 = inlined_call_operand.hbm [shape: f32[1,1], index: 20, kind: output, shape index: {2}]  }
   0x1   :  { %5700 = sst [smem:[#allocation5_spill]] %s5675_s0 }
   0x2   :  { %5701 = sst [smem:[#allocation6_spill]] %s5676_s1 }
   0x3   :  { %5702 = sst [smem:[#allocation7_spill]] %s5677_s2 }
   0x4   :  { %5703 = sst [smem:[#allocation8_spill]] %s5678_s3 }
   0x5   :  { %5704 = sst [smem:[#allocation9_spill]] %s5679_s4 }
   0x6   :  { %s5705_s23 = sld [smem:[#allocation7_spill]]  ;;  %v4380_v18 = vmov 0   ;;  %vm184_vm0 = vcmask 261120  }
   0x7   :  { %s5706_s26 = sld [smem:[#allocation6_spill]]  ;;  %4007 = vset.pattern.permute.xlu2 %v4380_v18  ;;  %4013 = vset.pattern.permute.xlu1 %v4380_v18 }
   0x8   :  { %s5707_s3 = sld [smem:[#allocation5_spill]]  ;;  %4024 = vset.pattern.permute.xlu0 %v4380_v18 }
   0xc   :  { %v3574_v0 = vld [vmem:[%s5705_s23 + $0x30] sm:$0xf]  ;;  %v3927_v1 = vld [vmem:[%s5705_s23 + $0x34] sm:$0xf0]  ;;  %v3566_v5 = vld [vmem:[%s5705_s23 + $0x20] sm:$0xf] }
   0xd   :  { %v3590_v2 = vld [vmem:[%s5706_s26 + $0x10] sm:$0xf]  ;;  %v4499_v3 = vor.u32 %v3927_v1, %v3574_v0  ;;  %v3919_v4 = vld [vmem:[%s5706_s26 + $0x14] sm:$0xf0]  ;;  %v3925_v6 = vld [vmem:[%s5705_s23 + $0x24] sm:$0xf0] }
   0xe   :  { %v4510_v7 = vor.u32 %v3919_v4, %v3590_v2  ;;  %v3582_v8 = vld [vmem:[%s5706_s26] sm:$0xf]  ;;  %v3917_v9 = vld [vmem:[%s5706_s26 + $0x4] sm:$0xf0]  ;;  %v71_v10 = vld [vmem:[%s5707_s3 + $0x1c] sm:$0xf]  ;;  %v4522_v11 = vor.u32 %v3925_v6, %v3566_v5 }
   0xf   :  { %142 = vmatpush.bf16.msra.mxu0 %v4499_v3  ;;  %4053 = vtanh.f32 %v71_v10  ;;  %v3558_v12 = vld [vmem:[%s5705_s23 + $0x10] sm:$0xf]  ;;  %v3923_v13 = vld [vmem:[%s5705_s23 + $0x14] sm:$0xf0]  ;;  %v4531_v14 = vor.u32 %v3917_v9, %v3582_v8  ;;  %v3926_v15 = vld [vmem:[%s5705_s23 + $0x34] sm:$0xf] }
  0x10   :  { %194 = vmatpush.bf16.msra.mxu2 %v4510_v7  ;;  %v3576_v16 = vld [vmem:[%s5705_s23 + $0x38] sm:$0xf0]  ;;  %v3918_v17 = vld [vmem:[%s5706_s26 + $0x14] sm:$0xf]  ;;  %v3924_v22 = vld [vmem:[%s5705_s23 + $0x24] sm:$0xf]  ;;  %v4562_v25 = vor.u32 %v3923_v13, %v3558_v12 }
  0x11   :  { %v4543_v19 = vor.u32 %v3926_v15, %v3576_v16  ;;  %v3592_v20 = vld [vmem:[%s5706_s26 + $0x18] sm:$0xf0]  ;;  %v3568_v23 = vld [vmem:[%s5705_s23 + $0x28] sm:$0xf0]  ;;  %v3916_v24 = vld [vmem:[%s5706_s26 + $0x4] sm:$0xf] }
  0x12   :  { %v4550_v21 = vor.u32 %v3918_v17, %v3592_v20  ;;  %v3550_v26 = vld [vmem:[%s5705_s23] sm:$0xf]  ;;  %v3921_v27 = vld [vmem:[%s5705_s23 + $0x4] sm:$0xf0]  ;;  %v4571_v28 = vor.u32 %v3924_v22, %v3568_v23  ;;  %v3584_v29 = vld [vmem:[%s5706_s26 + $0x8] sm:$0xf0] }
  0x13   :  { %143 = vmatpush.bf16.msra.mxu0 %v4522_v11  ;;  %155 = vmatpush.bf16.msra.mxu1 %v4543_v19  ;;  %v4578_v30 = vor.u32 %v3916_v24, %v3584_v29  ;;  %v3922_v31 = vld [vmem:[%s5705_s23 + $0x14] sm:$0xf]  ;;  %v3560_v32 = vld [vmem:[%s5705_s23 + $0x18] sm:$0xf0] }
  0x14   :  { %195 = vmatpush.bf16.msra.mxu2 %v4531_v14  ;;  %207 = vmatpush.bf16.msra.mxu3 %v4550_v21 }
  0x15   :  { %v4054_v33 = vpop.eup %4053 }
  0x18   :  { %281 = vmatpush.bf16.msrb.mxu2 %v4499_v3 }
  0x19   :  { %26 = vsyncpa [#allocation3], 0  ;;  %v93_v34 = vpack.c.bf16 %v4054_v33, %v4054_v33  ;;  %144 = vmatpush.bf16.msra.mxu0 %v4562_v25  ;;  %v4588_v35 = vor.u32 %v3921_v27, %v3550_v26  ;;  %156 = vmatpush.bf16.msra.mxu1 %v4571_v28  ;;  %v4591_v36 = vor.u32 %v3922_v31, %v3560_v32  ;;  %v3920_v37 = vld [vmem:[%s5705_s23 + $0x4] sm:$0xf]  ;;  %v3552_v38 = vld [vmem:[%s5705_s23 + $0x8] sm:$0xf0] }
  0x1a   :  { %208 = vmatpush.bf16.msra.mxu3 %v4578_v30  ;;  %v4605_v39 = vor.u32 %v3920_v37, %v3552_v38  ;;  %s5708_s22 = sld [smem:[#allocation8_spill]]  ;;  %s4381_s24 = smov 64   ;;  %v70_v12 = vld [vmem:[%s5707_s3 + $0x18] sm:$0xf]  ;;  %vm134_vm9 = vcmask 523264  }
  0x1b   :  { %3596 = vmatmul.msk.bf16.vlgmr.msra.gmra.mxu2 %vm184_vm0, %v93_v34  ;;  %s5709_s26 = sld [smem:[#allocation9_spill]] }
  0x1c   :  { %282 = vmatpush.bf16.msrb.mxu2 %v4522_v11 }
  0x1d   :  { %145 = vmatpush.bf16.msra.mxu0 %v4588_v35  ;;  %157 = vmatpush.bf16.msra.mxu1 %v4591_v36 }
  0x1e   :  { %294 = vmatpush.bf16.msrb.mxu3 %v4543_v19 }
  0x1f   :  { %3597 = vmatmul.msk.bf16.vlgmr.msra.gmra.mxu3 %vm184_vm0, %v93_v34 }
  0x20   :  { %283 = vmatpush.bf16.msrb.mxu2 %v4562_v25  ;;  %146 = vmatmul.bf16.vlgmr.msra.gmra.mxu0 %v4380_v18  ;;  %v92_v40 = vld [vmem:[%s5708_s22] sm:$0x3] }
  0x21   :  { %312 = vmatpush.bf16.msrb.mxu0 %v4510_v7  ;;  %158 = vmatpush.bf16.msra.mxu1 %v4605_v39  ;;  %v4635_v41 = vperm.slane %v92_v40, 0  ;;  %v4638_v56 = vperm.slane %v92_v40, 1 }
  0x22   :  { %295 = vmatpush.bf16.msrb.mxu3 %v4571_v28 }
  0x24   :  { %284 = vmatpush.bf16.msrb.mxu2 %v4588_v35  ;;  %159 = vmatmul.bf16.vlgmr.msra.gmra.mxu1 %v4380_v18 }
  0x25   :  { %313 = vmatpush.bf16.msrb.mxu0 %v4531_v14  ;;  %325 = vmatpush.bf16.msrb.mxu1 %v4550_v21 }
  0x26   :  { %296 = vmatpush.bf16.msrb.mxu3 %v4591_v36 }
  0x28   :  { %394 = vmatpush.bf16.msra.mxu2 %v4499_v3 }
  0x29   :  { %425 = vmatpush.bf16.msra.mxu0 %v4510_v7  ;;  %326 = vmatpush.bf16.msrb.mxu1 %v4578_v30 }
  0x2a   :  { %297 = vmatpush.bf16.msrb.mxu3 %v4605_v39 }
  0x2c   :  { %395 = vmatpush.bf16.msra.mxu2 %v4522_v11 }
  0x2d   :  { %438 = vmatpush.bf16.msra.mxu1 %v4550_v21  ;;  %426 = vmatpush.bf16.msra.mxu0 %v4531_v14 }
  0x2e   :  { %407 = vmatpush.bf16.msra.mxu3 %v4543_v19 }
  0x30   :  { %396 = vmatpush.bf16.msra.mxu2 %v4562_v25 }
  0x31   :  { %439 = vmatpush.bf16.msra.mxu1 %v4578_v30 }
  0x32   :  { %408 = vmatpush.bf16.msra.mxu3 %v4571_v28 }
  0x34   :  { %397 = vmatpush.bf16.msra.mxu2 %v4588_v35 }
  0x36   :  { %409 = vmatpush.bf16.msra.mxu3 %v4591_v36 }
  0x3a   :  { %410 = vmatpush.bf16.msra.mxu3 %v4605_v39 }
  0x9d   :  { %v147_v43 = vpop.f32.mrf.mxu0 }
  0x9e   :  { %v197_v42 = vpop.f32.mrf.mxu2 }
  0x9f   :  { %v198_v44 = vadd.f32 %v197_v42, %v147_v43 }
  0xa1   :  { %v219_v45 = vadd.f32 %v4635_v41, %v198_v44  ;;  %v160_v46 = vpop.f32.mrf.mxu1 }
  0xa2   :  { %v210_v47 = vpop.f32.mrf.mxu3 }
  0xa3   :  { %v3598_v48 = vmul.f32 -1.442695, %v219_v45  ;;  %v211_v55 = vadd.f32 %v210_v47, %v160_v46 }
  0xa5   :  { %4055 = vpow2.f32 %v3598_v48  ;;  %v149_v50 = vpop.f32.mrf.mxu0  ;;  %v220_v58 = vadd.f32 %v4638_v56, %v211_v55 }
  0xa6   :  { %v199_v49 = vpop.f32.mrf.mxu2 }
  0xa7   :  { %v3599_v8 = vmul.f32 -1.442695, %v220_v58 }
  0xa9   :  { %v162_v51 = vpop.f32.mrf.mxu1 }
  0xaa   :  { %v212_v52 = vpop.f32.mrf.mxu3 }
  0xab   :  { %v4056_v53 = vpop.eup %4055 }
  0xac   :  { %v224_v54 = vadd.f32 1.0, %v4056_v53 }
  0xae   :  { %4057 = vrcp.f32 %v224_v54  ;;  %v236_v61 = vand.u32 2147483648, %v224_v54  ;;  %v234_v63 = vand.u32 2147483647, %v224_v54  ;;  %vm230_vm2 = vweird.f32 %v224_v54 }
  0xaf   :  { %4059 = vtanh.f32 %v220_v58 }
  0xb0   :  { %v237_v2 = vor.u32 1.1754944e-38, %v236_v61  ;;  %vm235_vm4 = vcmp.eq.f32.partialorder %v234_v63, 8.507059e+37  ;;  %4061 = vpow2.f32 %v3599_v8 }
  0xb4   :  { %v4058_v57 = vpop.eup %4057 }
  0xb5   :  { %v226_v59 = vmul.f32 %v4058_v57, %v224_v54  ;;  %vm231_vm1 = vweird.f32 %v4058_v57  ;;  %v4060_v1 = vpop.eup %4059 }
  0xb6   :  { %vm232_vm3 = vmor %vm230_vm2, %vm231_vm1  ;;  %v4062_v9 = vpop.eup %4061 }
  0xb7   :  { %v227_v60 = vsub.f32 1.0, %v226_v59  ;;  %v244_v10 = vadd.f32 1.0, %v4062_v9 }
  0xb9   :  { %v228_v62 = vmul.f32 %v4058_v57, %v227_v60  ;;  %4063 = vrcp.f32 %v244_v10  ;;  %vm250_vm5 = vweird.f32 %v244_v10  ;;  %v256_v27 = vand.u32 2147483648, %v244_v10 }
  0xba   :  { %4065 = vtanh.f32 %v70_v12  ;;  %v254_v31 = vand.u32 2147483647, %v244_v10 }
  0xbb   :  { %v229_v0 = vadd.f32 %v4058_v57, %v228_v62  ;;  %v257_v32 = vor.u32 1.1754944e-38, %v256_v27 }
  0xbc   :  { %vm255_vm8 = vcmp.eq.f32.partialorder %v254_v31, 8.507059e+37 }
  0xbd   :  { %v233_v4 = vsel %vm232_vm3, %v4058_v57, %v229_v0 }
  0xbe   :  { %v238_v5 = vsel %vm235_vm4, %v237_v2, %v233_v4 }
  0xbf   :  { %v261_v6 = vmul.f32 %v4060_v1, %v238_v5  ;;  %v4064_v13 = vpop.eup %4063  ;;  %v260_v23 = vmul.f32 0.0, %v238_v5 }
  0xc0   :  { %v4066_v15 = vpop.eup %4065  ;;  %v246_v16 = vmul.f32 %v4064_v13, %v244_v10  ;;  %vm251_vm6 = vweird.f32 %v4064_v13 }
  0xc1   :  { %263 = vrot.lane.b32.xlu0 %v261_v6, %s4381_s24  ;;  %v4645_v17 = vpack.c.bf16 %v4066_v15, %v4066_v15  ;;  %vm252_vm7 = vmor %vm250_vm5, %vm251_vm6 }
  0xc2   :  { %v247_v20 = vsub.f32 1.0, %v246_v16 }
  0xc3   :  { %3602 = vmatmul.msk.bf16.vlgmr.msrb.gmra.mxu0 %vm184_vm0, %v4645_v17  ;;  %3603 = vmatmul.msk.bf16.vlgmr.msrb.gmra.mxu1 %vm184_vm0, %v4645_v17 }
  0xc4   :  { %538 = vmatpush.bf16.msrb.mxu0 %v4510_v7  ;;  %551 = vmatpush.bf16.msrb.mxu1 %v4550_v21  ;;  %v248_v22 = vmul.f32 %v4064_v13, %v247_v20 }
  0xc6   :  { %v249_v29 = vadd.f32 %v4064_v13, %v248_v22 }
  0xc8   :  { %539 = vmatpush.bf16.msrb.mxu0 %v4531_v14  ;;  %552 = vmatpush.bf16.msrb.mxu1 %v4578_v30  ;;  %v253_v33 = vsel %vm252_vm7, %v4064_v13, %v249_v29  ;;  %v69_v13 = vld [vmem:[%s5707_s3 + $0x14] sm:$0xf] }
  0xc9   :  { %v258_v37 = vsel %vm255_vm8, %v257_v32, %v253_v33 }
 0x133   :  { %v264_v24 = vpop.permute.xlu0 %263 }
 0x134   :  { %v4655_v26 = vadd.f32 %v264_v24, %v260_v23 }
 0x136   :  { %4067 = vtanh.f32 %v4655_v26 }
 0x13c   :  { %v4068_v34 = vpop.eup %4067 }
 0x13d   :  { %v268_v38 = vmul.f32 %v4068_v34, %v258_v37 }
 0x13f   :  { %v270_v40 = vpack.c.bf16 %v268_v38, %v268_v38 }
 0x140   :  { %v315_v42 = vpop.f32.mrf.mxu0  ;;  %v328_v45 = vpop.f32.mrf.mxu1 }
 0x141   :  { %272 = vrot.lane.b32.xlu0 %v270_v40, %s4381_s24 }
 0x148   :  { %v317_v43 = vpop.f32.mrf.mxu0  ;;  %v330_v46 = vpop.f32.mrf.mxu1 }
 0x1b3   :  { %v273_v44 = vpop.permute.xlu0 %272 }
 0x1b4   :  { %3600 = vmatmul.msk.bf16.vlgmr.msrb.gmra.mxu2 %vm134_vm9, %v273_v44  ;;  %3601 = vmatmul.msk.bf16.vlgmr.msrb.gmra.mxu3 %vm134_vm9, %v273_v44 }
 0x1b5   :  { %507 = vmatpush.bf16.msrb.mxu2 %v4499_v3  ;;  %520 = vmatpush.bf16.msrb.mxu3 %v4543_v19 }
 0x1b9   :  { %508 = vmatpush.bf16.msrb.mxu2 %v4522_v11  ;;  %521 = vmatpush.bf16.msrb.mxu3 %v4571_v28 }
 0x1bd   :  { %509 = vmatpush.bf16.msrb.mxu2 %v4562_v25  ;;  %522 = vmatpush.bf16.msrb.mxu3 %v4591_v36 }
 0x1c1   :  { %510 = vmatpush.bf16.msrb.mxu2 %v4588_v35  ;;  %523 = vmatpush.bf16.msrb.mxu3 %v4605_v39 }
 0x237   :  { %v286_v47 = vpop.f32.mrf.mxu2  ;;  %v299_v48 = vpop.f32.mrf.mxu3 }
 0x238   :  { %v316_v49 = vadd.f32 %v315_v42, %v286_v47  ;;  %v329_v57 = vadd.f32 %v328_v45, %v299_v48 }
 0x23a   :  { %v332_v50 = vadd.f32 %v316_v49, %v4635_v41  ;;  %v333_v59 = vadd.f32 %v329_v57, %v4638_v56 }
 0x23c   :  { %v3604_v51 = vmul.f32 -1.442695, %v332_v50  ;;  %v3605_v9 = vmul.f32 -1.442695, %v333_v59 }
 0x23e   :  { %4069 = vpow2.f32 %v3604_v51 }
 0x23f   :  { %v288_v52 = vpop.f32.mrf.mxu2  ;;  %v301_v53 = vpop.f32.mrf.mxu3 }
 0x244   :  { %v4070_v54 = vpop.eup %4069 }
 0x245   :  { %v337_v55 = vadd.f32 1.0, %v4070_v54 }
 0x247   :  { %4071 = vrcp.f32 %v337_v55  ;;  %v349_v62 = vand.u32 2147483648, %v337_v55  ;;  %v347_v0 = vand.u32 2147483647, %v337_v55  ;;  %vm343_vm11 = vweird.f32 %v337_v55 }
 0x248   :  { %4073 = vtanh.f32 %v333_v59 }
 0x249   :  { %v350_v2 = vor.u32 1.1754944e-38, %v349_v62  ;;  %vm348_vm13 = vcmp.eq.f32.partialorder %v347_v0, 8.507059e+37  ;;  %4075 = vpow2.f32 %v3605_v9 }
 0x24d   :  { %v4072_v58 = vpop.eup %4071 }
 0x24e   :  { %v339_v60 = vmul.f32 %v4072_v58, %v337_v55  ;;  %vm344_vm10 = vweird.f32 %v4072_v58  ;;  %v4074_v5 = vpop.eup %4073 }
 0x24f   :  { %vm345_vm12 = vmor %vm343_vm11, %vm344_vm10  ;;  %v4076_v10 = vpop.eup %4075 }
 0x250   :  { %v340_v61 = vsub.f32 1.0, %v339_v60  ;;  %v357_v12 = vadd.f32 1.0, %v4076_v10 }
 0x252   :  { %v341_v63 = vmul.f32 %v4072_v58, %v340_v61  ;;  %4077 = vrcp.f32 %v357_v12  ;;  %v369_v33 = vand.u32 2147483648, %v357_v12  ;;  %vm363_vm15 = vweird.f32 %v357_v12 }
 0x253   :  { %4079 = vtanh.f32 %v69_v13  ;;  %v367_v34 = vand.u32 2147483647, %v357_v12 }
 0x254   :  { %v342_v1 = vadd.f32 %v4072_v58, %v341_v63  ;;  %v370_v38 = vor.u32 1.1754944e-38, %v369_v33 }
 0x255   :  { %vm368_vm2 = vcmp.eq.f32.partialorder %v367_v34, 8.507059e+37 }
 0x256   :  { %v346_v4 = vsel %vm345_vm12, %v4072_v58, %v342_v1 }
 0x257   :  { %v351_v6 = vsel %vm348_vm13, %v350_v2, %v346_v4 }
 0x258   :  { %v374_v8 = vmul.f32 %v4074_v5, %v351_v6  ;;  %v4078_v15 = vpop.eup %4077  ;;  %v373_v27 = vmul.f32 %v351_v6, %v4655_v26 }
 0x259   :  { %v4080_v16 = vpop.eup %4079  ;;  %v359_v20 = vmul.f32 %v4078_v15, %v357_v12  ;;  %vm364_vm14 = vweird.f32 %v4078_v15 }
 0x25a   :  { %376 = vrot.lane.b32.xlu1 %v374_v8, %s4381_s24  ;;  %v4675_v22 = vpack.c.bf16 %v4080_v16, %v4080_v16  ;;  %vm365_vm1 = vmor %vm363_vm15, %vm364_vm14  ;;  %v68_v16 = vld [vmem:[%s5707_s3 + $0x10] sm:$0xf] }
 0x25b   :  { %v360_v23 = vsub.f32 1.0, %v359_v20 }
 0x25c   :  { %3608 = vmatmul.msk.bf16.vlgmr.msra.gmra.mxu0 %vm184_vm0, %v4675_v22  ;;  %3609 = vmatmul.msk.bf16.vlgmr.msra.gmra.mxu1 %vm184_vm0, %v4675_v22 }
 0x25d   :  { %651 = vmatpush.bf16.msra.mxu0 %v4510_v7  ;;  %664 = vmatpush.bf16.msra.mxu1 %v4550_v21  ;;  %v361_v24 = vmul.f32 %v4078_v15, %v360_v23 }
 0x25f   :  { %v362_v32 = vadd.f32 %v4078_v15, %v361_v24 }
 0x261   :  { %652 = vmatpush.bf16.msra.mxu0 %v4531_v14  ;;  %665 = vmatpush.bf16.msra.mxu1 %v4578_v30  ;;  %v366_v37 = vsel %vm365_vm1, %v4078_v15, %v362_v32 }
 0x262   :  { %v371_v42 = vsel %vm368_vm2, %v370_v38, %v366_v37 }
 0x2cc   :  { %v377_v29 = vpop.permute.xlu1 %376 }
 0x2cd   :  { %v4686_v31 = vadd.f32 %v377_v29, %v373_v27 }
 0x2cf   :  { %4081 = vtanh.f32 %v4686_v31 }
 0x2d5   :  { %v4082_v40 = vpop.eup %4081 }
 0x2d6   :  { %v381_v43 = vmul.f32 %v4082_v40, %v371_v42 }
 0x2d8   :  { %v383_v44 = vpack.c.bf16 %v381_v43, %v381_v43 }
 0x2d9   :  { %v428_v26 = vpop.f32.mrf.mxu0  ;;  %v441_v47 = vpop.f32.mrf.mxu1 }
 0x2da   :  { %385 = vrot.lane.b32.xlu1 %v383_v44, %s4381_s24 }
 0x2e1   :  { %v430_v45 = vpop.f32.mrf.mxu0  ;;  %v443_v48 = vpop.f32.mrf.mxu1 }
 0x34c   :  { %v386_v46 = vpop.permute.xlu1 %385 }
 0x34d   :  { %3606 = vmatmul.msk.bf16.vlgmr.msra.gmra.mxu2 %vm134_vm9, %v386_v46  ;;  %3607 = vmatmul.msk.bf16.vlgmr.msra.gmra.mxu3 %vm134_vm9, %v386_v46 }
 0x34e   :  { %620 = vmatpush.bf16.msra.mxu2 %v4499_v3  ;;  %633 = vmatpush.bf16.msra.mxu3 %v4543_v19 }
 0x352   :  { %621 = vmatpush.bf16.msra.mxu2 %v4522_v11  ;;  %634 = vmatpush.bf16.msra.mxu3 %v4571_v28 }
 0x356   :  { %622 = vmatpush.bf16.msra.mxu2 %v4562_v25  ;;  %635 = vmatpush.bf16.msra.mxu3 %v4591_v36 }
 0x35a   :  { %623 = vmatpush.bf16.msra.mxu2 %v4588_v35  ;;  %636 = vmatpush.bf16.msra.mxu3 %v4605_v39 }
 0x3d0   :  { %v399_v49 = vpop.f32.mrf.mxu2  ;;  %v412_v50 = vpop.f32.mrf.mxu3 }
 0x3d1   :  { %v429_v51 = vadd.f32 %v428_v26, %v399_v49  ;;  %v442_v59 = vadd.f32 %v441_v47, %v412_v50 }
 0x3d3   :  { %v445_v52 = vadd.f32 %v429_v51, %v4635_v41  ;;  %v446_v61 = vadd.f32 %v442_v59, %v4638_v56 }
 0x3d5   :  { %v3610_v53 = vmul.f32 -1.442695, %v445_v52  ;;  %v3611_v12 = vmul.f32 -1.442695, %v446_v61 }
 0x3d7   :  { %4083 = vpow2.f32 %v3610_v53 }
 0x3d8   :  { %v401_v54 = vpop.f32.mrf.mxu2  ;;  %v414_v55 = vpop.f32.mrf.mxu3 }
 0x3dd   :  { %v4084_v57 = vpop.eup %4083 }
 0x3de   :  { %v450_v58 = vadd.f32 1.0, %v4084_v57 }
 0x3e0   :  { %4085 = vrcp.f32 %v450_v58  ;;  %v462_v0 = vand.u32 2147483648, %v450_v58  ;;  %v460_v2 = vand.u32 2147483647, %v450_v58  ;;  %vm456_vm4 = vweird.f32 %v450_v58 }
 0x3e1   :  { %4087 = vtanh.f32 %v446_v61 }
 0x3e2   :  { %v463_v5 = vor.u32 1.1754944e-38, %v462_v0  ;;  %vm461_vm6 = vcmp.eq.f32.partialorder %v460_v2, 8.507059e+37  ;;  %4089 = vpow2.f32 %v3611_v12 }
 0x3e6   :  { %v4086_v60 = vpop.eup %4085 }
 0x3e7   :  { %v452_v62 = vmul.f32 %v4086_v60, %v450_v58  ;;  %vm457_vm3 = vweird.f32 %v4086_v60  ;;  %v4088_v8 = vpop.eup %4087 }
 0x3e8   :  { %vm458_vm5 = vmor %vm456_vm4, %vm457_vm3  ;;  %v4090_v13 = vpop.eup %4089 }
 0x3e9   :  { %v453_v63 = vsub.f32 1.0, %v452_v62  ;;  %v470_v15 = vadd.f32 1.0, %v4090_v13 }
 0x3eb   :  { %v454_v1 = vmul.f32 %v4086_v60, %v453_v63  ;;  %4091 = vrcp.f32 %v470_v15  ;;  %v482_v40 = vand.u32 2147483648, %v470_v15  ;;  %vm476_vm8 = vweird.f32 %v470_v15 }
 0x3ec   :  { %4093 = vtanh.f32 %v68_v16  ;;  %v480_v42 = vand.u32 2147483647, %v470_v15 }
 0x3ed   :  { %v455_v4 = vadd.f32 %v4086_v60, %v454_v1  ;;  %v483_v44 = vor.u32 1.1754944e-38, %v482_v40 }
 0x3ee   :  { %vm481_vm11 = vcmp.eq.f32.partialorder %v480_v42, 8.507059e+37 }
 0x3ef   :  { %v459_v6 = vsel %vm458_vm5, %v4086_v60, %v455_v4 }
 0x3f0   :  { %v464_v9 = vsel %vm461_vm6, %v463_v5, %v459_v6 }
 0x3f1   :  { %v487_v10 = vmul.f32 %v4088_v8, %v464_v9  ;;  %v4092_v20 = vpop.eup %4091  ;;  %v486_v33 = vmul.f32 %v464_v9, %v4686_v31 }
 0x3f2   :  { %v4094_v23 = vpop.eup %4093  ;;  %v472_v24 = vmul.f32 %v4092_v20, %v470_v15  ;;  %vm477_vm7 = vweird.f32 %v4092_v20 }
 0x3f3   :  { %489 = vrot.lane.b32.xlu2 %v487_v10, %s4381_s24  ;;  %v4706_v27 = vpack.c.bf16 %v4094_v23, %v4094_v23  ;;  %vm478_vm10 = vmor %vm476_vm8, %vm477_vm7 }
 0x3f4   :  { %v473_v29 = vsub.f32 1.0, %v472_v24  ;;  %v67_v24 = vld [vmem:[%s5707_s3 + $0xc] sm:$0xf] }
 0x3f5   :  { %3614 = vmatmul.msk.bf16.vlgmr.msrb.gmra.mxu0 %vm184_vm0, %v4706_v27  ;;  %3615 = vmatmul.msk.bf16.vlgmr.msrb.gmra.mxu1 %vm184_vm0, %v4706_v27 }
 0x3f6   :  { %764 = vmatpush.bf16.msrb.mxu0 %v4510_v7  ;;  %777 = vmatpush.bf16.msrb.mxu1 %v4550_v21  ;;  %v474_v32 = vmul.f32 %v4092_v20, %v473_v29 }
 0x3f8   :  { %v475_v38 = vadd.f32 %v4092_v20, %v474_v32 }
 0x3fa   :  { %765 = vmatpush.bf16.msrb.mxu0 %v4531_v14  ;;  %778 = vmatpush.bf16.msrb.mxu1 %v4578_v30  ;;  %v479_v43 = vsel %vm478_vm10, %v4092_v20, %v475_v38 }
 0x3fb   :  { %v484_v45 = vsel %vm481_vm11, %v483_v44, %v479_v43 }
 0x44d   :  { %v490_v34 = vpop.permute.xlu2 %489 }
 0x44e   :  { %v4717_v37 = vadd.f32 %v490_v34, %v486_v33 }
 0x450   :  { %4095 = vtanh.f32 %v4717_v37 }
 0x456   :  { %v4096_v26 = vpop.eup %4095 }
 0x457   :  { %v494_v46 = vmul.f32 %v4096_v26, %v484_v45 }
 0x459   :  { %v496_v47 = vpack.c.bf16 %v494_v46, %v494_v46 }
 0x45b   :  { %498 = vrot.lane.b32.xlu2 %v496_v47, %s4381_s24 }
 0x472   :  { %v541_v48 = vpop.f32.mrf.mxu0  ;;  %v554_v50 = vpop.f32.mrf.mxu1 }
 0x47a   :  { %v543_v49 = vpop.f32.mrf.mxu0  ;;  %v556_v51 = vpop.f32.mrf.mxu1 }
 0x4b5   :  { %v499_v31 = vpop.permute.xlu2 %498 }
 0x4b6   :  { %3612 = vmatmul.msk.bf16.vlgmr.msrb.gmra.mxu2 %vm134_vm9, %v499_v31  ;;  %3613 = vmatmul.msk.bf16.vlgmr.msrb.gmra.mxu3 %vm134_vm9, %v499_v31 }
 0x4b7   :  { %733 = vmatpush.bf16.msrb.mxu2 %v4499_v3  ;;  %746 = vmatpush.bf16.msrb.mxu3 %v4543_v19 }
 0x4bb   :  { %734 = vmatpush.bf16.msrb.mxu2 %v4522_v11  ;;  %747 = vmatpush.bf16.msrb.mxu3 %v4571_v28 }
 0x4bf   :  { %735 = vmatpush.bf16.msrb.mxu2 %v4562_v25  ;;  %748 = vmatpush.bf16.msrb.mxu3 %v4591_v36 }
 0x4c3   :  { %736 = vmatpush.bf16.msrb.mxu2 %v4588_v35  ;;  %749 = vmatpush.bf16.msrb.mxu3 %v4605_v39 }
 0x539   :  { %v512_v52 = vpop.f32.mrf.mxu2  ;;  %v525_v53 = vpop.f32.mrf.mxu3 }
 0x53a   :  { %v542_v54 = vadd.f32 %v541_v48, %v512_v52  ;;  %v555_v62 = vadd.f32 %v554_v50, %v525_v53 }
 0x53c   :  { %v558_v55 = vadd.f32 %v542_v54, %v4635_v41  ;;  %v559_v0 = vadd.f32 %v555_v62, %v4638_v56 }
 0x53e   :  { %v3616_v57 = vmul.f32 -1.442695, %v558_v55  ;;  %v3617_v16 = vmul.f32 -1.442695, %v559_v0 }
 0x540   :  { %4097 = vpow2.f32 %v3616_v57 }
 0x541   :  { %v514_v58 = vpop.f32.mrf.mxu2  ;;  %v527_v59 = vpop.f32.mrf.mxu3 }
 0x546   :  { %v4098_v60 = vpop.eup %4097 }
 0x547   :  { %v563_v61 = vadd.f32 1.0, %v4098_v60 }
 0x549   :  { %4099 = vrcp.f32 %v563_v61  ;;  %v575_v4 = vand.u32 2147483648, %v563_v61  ;;  %v573_v6 = vand.u32 2147483647, %v563_v61  ;;  %vm569_vm13 = vweird.f32 %v563_v61 }
 0x54a   :  { %4101 = vtanh.f32 %v559_v0 }
 0x54b   :  { %v576_v9 = vor.u32 1.1754944e-38, %v575_v4  ;;  %vm574_vm15 = vcmp.eq.f32.partialorder %v573_v6, 8.507059e+37  ;;  %4103 = vpow2.f32 %v3617_v16 }
 0x54f   :  { %v4100_v63 = vpop.eup %4099 }
 0x550   :  { %v565_v1 = vmul.f32 %v4100_v63, %v563_v61  ;;  %vm570_vm12 = vweird.f32 %v4100_v63  ;;  %v4102_v12 = vpop.eup %4101 }
 0x551   :  { %vm571_vm14 = vmor %vm569_vm13, %vm570_vm12  ;;  %v4104_v20 = vpop.eup %4103 }
 0x552   :  { %v566_v2 = vsub.f32 1.0, %v565_v1  ;;  %v583_v23 = vadd.f32 1.0, %v4104_v20 }
 0x554   :  { %v567_v5 = vmul.f32 %v4100_v63, %v566_v2  ;;  %4105 = vrcp.f32 %v583_v23  ;;  %v595_v45 = vand.u32 2147483648, %v583_v23  ;;  %vm589_vm2 = vweird.f32 %v583_v23 }
 0x555   :  { %4107 = vtanh.f32 %v67_v24  ;;  %v593_v46 = vand.u32 2147483647, %v583_v23 }
 0x556   :  { %v568_v8 = vadd.f32 %v4100_v63, %v567_v5  ;;  %v596_v31 = vor.u32 1.1754944e-38, %v595_v45 }
 0x557   :  { %vm594_vm4 = vcmp.eq.f32.partialorder %v593_v46, 8.507059e+37 }
 0x558   :  { %v572_v10 = vsel %vm571_vm14, %v4100_v63, %v568_v8 }
 0x559   :  { %v577_v13 = vsel %vm574_vm15, %v576_v9, %v572_v10 }
 0x55a   :  { %v600_v15 = vmul.f32 %v4102_v12, %v577_v13  ;;  %v4106_v29 = vpop.eup %4105  ;;  %v599_v42 = vmul.f32 %v577_v13, %v4717_v37 }
 0x55b   :  { %v4108_v32 = vpop.eup %4107  ;;  %v585_v33 = vmul.f32 %v4106_v29, %v583_v23  ;;  %vm590_vm1 = vweird.f32 %v4106_v29 }
 0x55c   :  { %602 = vrot.lane.b32.xlu0 %v600_v15, %s4381_s24  ;;  %v4737_v34 = vpack.c.bf16 %v4108_v32, %v4108_v32  ;;  %vm591_vm3 = vmor %vm589_vm2, %vm590_vm1 }
 0x55d   :  { %v586_v38 = vsub.f32 1.0, %v585_v33 }
 0x55e   :  { %3620 = vmatmul.msk.bf16.vlgmr.msra.gmra.mxu0 %vm184_vm0, %v4737_v34  ;;  %3621 = vmatmul.msk.bf16.vlgmr.msra.gmra.mxu1 %vm184_vm0, %v4737_v34 }
 0x55f   :  { %877 = vmatpush.bf16.msra.mxu0 %v4510_v7  ;;  %890 = vmatpush.bf16.msra.mxu1 %v4550_v21  ;;  %v587_v40 = vmul.f32 %v4106_v29, %v586_v38  ;;  %v66_v38 = vld [vmem:[%s5707_s3 + $0x8] sm:$0xf] }
 0x561   :  { %v588_v26 = vadd.f32 %v4106_v29, %v587_v40 }
 0x563   :  { %878 = vmatpush.bf16.msra.mxu0 %v4531_v14  ;;  %891 = vmatpush.bf16.msra.mxu1 %v4578_v30  ;;  %v592_v47 = vsel %vm591_vm3, %v4106_v29, %v588_v26 }
 0x564   :  { %v597_v49 = vsel %vm594_vm4, %v596_v31, %v592_v47 }
 0x5ce   :  { %v603_v43 = vpop.permute.xlu0 %602 }
 0x5cf   :  { %v4748_v44 = vadd.f32 %v603_v43, %v599_v42 }
 0x5d1   :  { %4109 = vtanh.f32 %v4748_v44 }
 0x5d7   :  { %v4110_v48 = vpop.eup %4109 }
 0x5d8   :  { %v607_v50 = vmul.f32 %v4110_v48, %v597_v49 }
 0x5da   :  { %v609_v51 = vpack.c.bf16 %v607_v50, %v607_v50 }
 0x5db   :  { %v654_v37 = vpop.f32.mrf.mxu0  ;;  %v667_v54 = vpop.f32.mrf.mxu1 }
 0x5dc   :  { %611 = vrot.lane.b32.xlu1 %v609_v51, %s4381_s24 }
 0x5e3   :  { %v656_v52 = vpop.f32.mrf.mxu0  ;;  %v669_v55 = vpop.f32.mrf.mxu1 }
 0x64e   :  { %v612_v53 = vpop.permute.xlu1 %611 }
 0x64f   :  { %3618 = vmatmul.msk.bf16.vlgmr.msra.gmra.mxu2 %vm134_vm9, %v612_v53  ;;  %3619 = vmatmul.msk.bf16.vlgmr.msra.gmra.mxu3 %vm134_vm9, %v612_v53 }
 0x650   :  { %846 = vmatpush.bf16.msra.mxu2 %v4499_v3  ;;  %859 = vmatpush.bf16.msra.mxu3 %v4543_v19 }
 0x654   :  { %847 = vmatpush.bf16.msra.mxu2 %v4522_v11  ;;  %860 = vmatpush.bf16.msra.mxu3 %v4571_v28 }
 0x658   :  { %848 = vmatpush.bf16.msra.mxu2 %v4562_v25  ;;  %861 = vmatpush.bf16.msra.mxu3 %v4591_v36 }
 0x65c   :  { %849 = vmatpush.bf16.msra.mxu2 %v4588_v35  ;;  %862 = vmatpush.bf16.msra.mxu3 %v4605_v39 }
 0x6d2   :  { %v625_v57 = vpop.f32.mrf.mxu2  ;;  %v638_v58 = vpop.f32.mrf.mxu3 }
 0x6d3   :  { %v655_v59 = vadd.f32 %v654_v37, %v625_v57  ;;  %v668_v2 = vadd.f32 %v667_v54, %v638_v58 }
 0x6d5   :  { %v671_v60 = vadd.f32 %v655_v59, %v4635_v41  ;;  %v672_v5 = vadd.f32 %v668_v2, %v4638_v56 }
 0x6d7   :  { %v3622_v61 = vmul.f32 -1.442695, %v671_v60  ;;  %v3623_v29 = vmul.f32 -1.442695, %v672_v5 }
 0x6d9   :  { %4111 = vpow2.f32 %v3622_v61 }
 0x6da   :  { %v627_v62 = vpop.f32.mrf.mxu2  ;;  %v640_v63 = vpop.f32.mrf.mxu3 }
 0x6df   :  { %v4112_v0 = vpop.eup %4111 }
 0x6e0   :  { %v676_v1 = vadd.f32 1.0, %v4112_v0 }
 0x6e2   :  { %4113 = vrcp.f32 %v676_v1  ;;  %v688_v9 = vand.u32 2147483648, %v676_v1  ;;  %v686_v12 = vand.u32 2147483647, %v676_v1  ;;  %vm682_vm6 = vweird.f32 %v676_v1 }
 0x6e3   :  { %4115 = vtanh.f32 %v672_v5 }
 0x6e4   :  { %v689_v15 = vor.u32 1.1754944e-38, %v688_v9  ;;  %vm687_vm8 = vcmp.eq.f32.partialorder %v686_v12, 8.507059e+37  ;;  %4117 = vpow2.f32 %v3623_v29 }
 0x6e8   :  { %v4114_v4 = vpop.eup %4113 }
 0x6e9   :  { %v678_v6 = vmul.f32 %v4114_v4, %v676_v1  ;;  %vm683_vm5 = vweird.f32 %v4114_v4  ;;  %v4116_v20 = vpop.eup %4115 }
 0x6ea   :  { %vm684_vm7 = vmor %vm682_vm6, %vm683_vm5  ;;  %v4118_v32 = vpop.eup %4117 }
 0x6eb   :  { %v679_v8 = vsub.f32 1.0, %v678_v6  ;;  %v696_v33 = vadd.f32 1.0, %v4118_v32 }
 0x6ed   :  { %v680_v10 = vmul.f32 %v4114_v4, %v679_v8  ;;  %4119 = vrcp.f32 %v696_v33  ;;  %v708_v50 = vand.u32 2147483648, %v696_v33  ;;  %vm702_vm11 = vweird.f32 %v696_v33 }
 0x6ee   :  { %4121 = vtanh.f32 %v66_v38 }
 0x6ef   :  { %v681_v13 = vadd.f32 %v4114_v4, %v680_v10  ;;  %v709_v51 = vor.u32 1.1754944e-38, %v708_v50 }
 0x6f1   :  { %v685_v16 = vsel %vm684_vm7, %v4114_v4, %v681_v13 }
 0x6f2   :  { %v690_v23 = vsel %vm687_vm8, %v689_v15, %v685_v16  ;;  %v65_v16 = vld [vmem:[%s5707_s3 + $0x4] sm:$0xf] }
 0x6f3   :  { %v713_v24 = vmul.f32 %v4116_v20, %v690_v23  ;;  %v4120_v40 = vpop.eup %4119  ;;  %v712_v47 = vmul.f32 %v690_v23, %v4748_v44 }
 0x6f4   :  { %v4122_v42 = vpop.eup %4121  ;;  %v698_v43 = vmul.f32 %v4120_v40, %v696_v33  ;;  %vm703_vm10 = vweird.f32 %v4120_v40 }
 0x6f5   :  { %715 = vrot.lane.b32.xlu2 %v713_v24, %s4381_s24  ;;  %v4768_v26 = vpack.c.bf16 %v4122_v42, %v4122_v42  ;;  %vm704_vm12 = vmor %vm702_vm11, %vm703_vm10 }
 0x6f6   :  { %v699_v45 = vsub.f32 1.0, %v698_v43 }
 0x6f7   :  { %3626 = vmatmul.msk.bf16.vlgmr.msrb.gmra.mxu0 %vm184_vm0, %v4768_v26  ;;  %3627 = vmatmul.msk.bf16.vlgmr.msrb.gmra.mxu1 %vm184_vm0, %v4768_v26 }
 0x6f8   :  { %990 = vmatpush.bf16.msrb.mxu0 %v4510_v7  ;;  %1003 = vmatpush.bf16.msrb.mxu1 %v4550_v21  ;;  %v700_v46 = vmul.f32 %v4120_v40, %v699_v45  ;;  %v706_v7 = vand.u32 2147483647, %v696_v33 }
 0x6fa   :  { %v701_v49 = vadd.f32 %v4120_v40, %v700_v46  ;;  %vm707_vm13 = vcmp.eq.f32.partialorder %v706_v7, 8.507059e+37 }
 0x6fc   :  { %991 = vmatpush.bf16.msrb.mxu0 %v4531_v14  ;;  %1004 = vmatpush.bf16.msrb.mxu1 %v4578_v30  ;;  %v705_v21 = vsel %vm704_vm12, %v4120_v40, %v701_v49 }
 0x6fd   :  { %v710_v37 = vsel %vm707_vm13, %v709_v51, %v705_v21 }
 0x74f   :  { %v716_v31 = vpop.permute.xlu2 %715 }
 0x750   :  { %v4779_v48 = vadd.f32 %v716_v31, %v712_v47 }
 0x752   :  { %4123 = vtanh.f32 %v4779_v48 }
 0x758   :  { %v4124_v14 = vpop.eup %4123 }
 0x759   :  { %v720_v30 = vmul.f32 %v4124_v14, %v710_v37 }
 0x75b   :  { %v722_v52 = vpack.c.bf16 %v720_v30, %v720_v30 }
 0x75d   :  { %724 = vrot.lane.b32.xlu0 %v722_v52, %s4381_s24 }
 0x774   :  { %v767_v44 = vpop.f32.mrf.mxu0  ;;  %v780_v55 = vpop.f32.mrf.mxu1 }
 0x77c   :  { %v769_v53 = vpop.f32.mrf.mxu0  ;;  %v782_v57 = vpop.f32.mrf.mxu1 }
 0x7cf   :  { %v725_v54 = vpop.permute.xlu0 %724 }
 0x7d0   :  { %3624 = vmatmul.msk.bf16.vlgmr.msrb.gmra.mxu2 %vm134_vm9, %v725_v54  ;;  %3625 = vmatmul.msk.bf16.vlgmr.msrb.gmra.mxu3 %vm134_vm9, %v725_v54 }
 0x7d1   :  { %959 = vmatpush.bf16.msrb.mxu2 %v4499_v3  ;;  %972 = vmatpush.bf16.msrb.mxu3 %v4543_v19 }
 0x7d5   :  { %960 = vmatpush.bf16.msrb.mxu2 %v4522_v11  ;;  %973 = vmatpush.bf16.msrb.mxu3 %v4571_v28 }
 0x7d9   :  { %961 = vmatpush.bf16.msrb.mxu2 %v4562_v25  ;;  %974 = vmatpush.bf16.msrb.mxu3 %v4591_v36 }
 0x7dd   :  { %962 = vmatpush.bf16.msrb.mxu2 %v4588_v35  ;;  %975 = vmatpush.bf16.msrb.mxu3 %v4605_v39 }
 0x853   :  { %v738_v58 = vpop.f32.mrf.mxu2  ;;  %v751_v59 = vpop.f32.mrf.mxu3 }
 0x854   :  { %v768_v60 = vadd.f32 %v767_v44, %v738_v58  ;;  %v781_v25 = vadd.f32 %v780_v55, %v751_v59 }
 0x856   :  { %v784_v3 = vadd.f32 %v768_v60, %v4635_v41  ;;  %v785_v35 = vadd.f32 %v781_v25, %v4638_v56 }
 0x858   :  { %v3628_v19 = vmul.f32 -1.442695, %v784_v3  ;;  %v3629_v12 = vmul.f32 -1.442695, %v785_v35 }
 0x85a   :  { %4125 = vpow2.f32 %v3628_v19 }
 0x85b   :  { %v740_v11 = vpop.f32.mrf.mxu2  ;;  %v753_v61 = vpop.f32.mrf.mxu3 }
 0x860   :  { %v4126_v28 = vpop.eup %4125 }
 0x861   :  { %v789_v62 = vadd.f32 1.0, %v4126_v28 }
 0x863   :  { %4127 = vrcp.f32 %v789_v62  ;;  %v801_v0 = vand.u32 2147483648, %v789_v62  ;;  %v799_v2 = vand.u32 2147483647, %v789_v62  ;;  %vm795_vm15 = vweird.f32 %v789_v62 }
 0x864   :  { %4129 = vtanh.f32 %v785_v35 }
 0x865   :  { %v802_v5 = vor.u32 1.1754944e-38, %v801_v0  ;;  %vm800_vm2 = vcmp.eq.f32.partialorder %v799_v2, 8.507059e+37  ;;  %4131 = vpow2.f32 %v3629_v12 }
 0x869   :  { %v4128_v36 = vpop.eup %4127 }
 0x86a   :  { %v791_v63 = vmul.f32 %v4128_v36, %v789_v62  ;;  %vm796_vm14 = vweird.f32 %v4128_v36  ;;  %v4130_v8 = vpop.eup %4129 }
 0x86b   :  { %vm797_vm1 = vmor %vm795_vm15, %vm796_vm14  ;;  %v4132_v13 = vpop.eup %4131 }
 0x86c   :  { %v792_v39 = vsub.f32 1.0, %v791_v63  ;;  %v809_v15 = vadd.f32 1.0, %v4132_v13 }
 0x86e   :  { %v793_v1 = vmul.f32 %v4128_v36, %v792_v39  ;;  %4133 = vrcp.f32 %v809_v15  ;;  %v821_v45 = vand.u32 2147483648, %v809_v15  ;;  %vm815_vm4 = vweird.f32 %v809_v15 }
 0x86f   :  { %4135 = vtanh.f32 %v65_v16  ;;  %v819_v46 = vand.u32 2147483647, %v809_v15 }
 0x870   :  { %v794_v4 = vadd.f32 %v4128_v36, %v793_v1  ;;  %v822_v31 = vor.u32 1.1754944e-38, %v821_v45 }
 0x871   :  { %vm820_vm6 = vcmp.eq.f32.partialorder %v819_v46, 8.507059e+37 }
 0x872   :  { %v798_v6 = vsel %vm797_vm1, %v4128_v36, %v794_v4 }
 0x873   :  { %v803_v9 = vsel %vm800_vm2, %v802_v5, %v798_v6 }
 0x874   :  { %v826_v10 = vmul.f32 %v4130_v8, %v803_v9  ;;  %v4134_v20 = vpop.eup %4133  ;;  %v825_v38 = vmul.f32 %v803_v9, %v4779_v48  ;;  %v64_v8 = vld [vmem:[%s5707_s3] sm:$0xf] }
 0x875   :  { %v4136_v23 = vpop.eup %4135  ;;  %v811_v24 = vmul.f32 %v4134_v20, %v809_v15  ;;  %vm816_vm3 = vweird.f32 %v4134_v20 }
 0x876   :  { %828 = vrot.lane.b32.xlu1 %v826_v10, %s4381_s24  ;;  %v4799_v29 = vpack.c.bf16 %v4136_v23, %v4136_v23  ;;  %vm817_vm5 = vmor %vm815_vm4, %vm816_vm3 }
 0x877   :  { %v812_v32 = vsub.f32 1.0, %v811_v24 }
 0x878   :  { %3632 = vmatmul.msk.bf16.vlgmr.msra.gmra.mxu0 %vm184_vm0, %v4799_v29  ;;  %3633 = vmatmul.msk.bf16.vlgmr.msra.gmra.mxu1 %vm184_vm0, %v4799_v29 }
 0x879   :  { %v813_v33 = vmul.f32 %v4134_v20, %v812_v32 }
 0x87b   :  { %v814_v43 = vadd.f32 %v4134_v20, %v813_v33 }
 0x87d   :  { %v818_v47 = vsel %vm817_vm5, %v4134_v20, %v814_v43 }
 0x87e   :  { %v823_v50 = vsel %vm820_vm6, %v822_v31, %v818_v47 }
 0x8e8   :  { %v829_v40 = vpop.permute.xlu1 %828 }
 0x8e9   :  { %v4806_v42 = vadd.f32 %v829_v40, %v825_v38 }
 0x8eb   :  { %4137 = vtanh.f32 %v4806_v42 }
 0x8f1   :  { %v4138_v49 = vpop.eup %4137 }
 0x8f2   :  { %v833_v7 = vmul.f32 %v4138_v49, %v823_v50 }
 0x8f4   :  { %v835_v21 = vpack.c.bf16 %v833_v7, %v833_v7 }
 0x8f5   :  { %v880_v51 = vpop.f32.mrf.mxu0  ;;  %v893_v37 = vpop.f32.mrf.mxu1 }
 0x8f6   :  { %837 = vrot.lane.b32.xlu2 %v835_v21, %s4381_s24 }
 0x8fd   :  { %v882_v14 = vpop.f32.mrf.mxu0  ;;  %v895_v30 = vpop.f32.mrf.mxu1 }
 0x950   :  { %v838_v48 = vpop.permute.xlu2 %837 }
 0x951   :  { %3630 = vmatmul.msk.bf16.vlgmr.msra.gmra.mxu2 %vm134_vm9, %v838_v48  ;;  %3631 = vmatmul.msk.bf16.vlgmr.msra.gmra.mxu3 %vm134_vm9, %v838_v48 }
 0x9d4   :  { %v851_v52 = vpop.f32.mrf.mxu2  ;;  %v864_v44 = vpop.f32.mrf.mxu3 }
 0x9d5   :  { %v881_v53 = vadd.f32 %v880_v51, %v851_v52  ;;  %v894_v3 = vadd.f32 %v893_v37, %v864_v44 }
 0x9d7   :  { %v897_v54 = vadd.f32 %v881_v53, %v4635_v41  ;;  %v898_v11 = vadd.f32 %v894_v3, %v4638_v56 }
 0x9d9   :  { %v3634_v55 = vmul.f32 -1.442695, %v897_v54  ;;  %v3635_v4 = vmul.f32 -1.442695, %v898_v11 }
 0x9db   :  { %4139 = vpow2.f32 %v3634_v55 }
 0x9dc   :  { %v853_v57 = vpop.f32.mrf.mxu2  ;;  %v866_v58 = vpop.f32.mrf.mxu3 }
 0x9e1   :  { %v4140_v59 = vpop.eup %4139 }
 0x9e2   :  { %v902_v60 = vadd.f32 1.0, %v4140_v59 }
 0x9e4   :  { %4141 = vrcp.f32 %v902_v60  ;;  %v914_v62 = vand.u32 2147483648, %v902_v60  ;;  %v912_v36 = vand.u32 2147483647, %v902_v60  ;;  %vm908_vm8 = vweird.f32 %v902_v60 }
 0x9e5   :  { %4143 = vtanh.f32 %v898_v11 }
 0x9e6   :  { %v915_v63 = vor.u32 1.1754944e-38, %v914_v62  ;;  %vm913_vm11 = vcmp.eq.f32.partialorder %v912_v36, 8.507059e+37  ;;  %4145 = vpow2.f32 %v3635_v4  ;;  %v4848_v4 = vld [vmem:[%s5681_s6 + $0x8] sm:$0xff] }
 0x9e7   :  { %1214 = vmatpush.bf16.msra.mxu0 %v4848_v4 }
 0x9ea   :  { %v4142_v19 = vpop.eup %4141 }
 0x9eb   :  { %v904_v61 = vmul.f32 %v4142_v19, %v902_v60  ;;  %vm909_vm7 = vweird.f32 %v4142_v19  ;;  %v4144_v0 = vpop.eup %4143 }
 0x9ec   :  { %vm910_vm10 = vmor %vm908_vm8, %vm909_vm7  ;;  %v4146_v5 = vpop.eup %4145 }
 0x9ed   :  { %v905_v28 = vsub.f32 1.0, %v904_v61  ;;  %v922_v6 = vadd.f32 1.0, %v4146_v5 }
 0x9ef   :  { %v906_v25 = vmul.f32 %v4142_v19, %v905_v28  ;;  %4147 = vrcp.f32 %v922_v6  ;;  %v934_v33 = vand.u32 2147483648, %v922_v6  ;;  %vm928_vm13 = vweird.f32 %v922_v6 }
 0x9f0   :  { %4149 = vtanh.f32 %v64_v8  ;;  %v932_v38 = vand.u32 2147483647, %v922_v6  ;;  %v4857_v8 = vld [vmem:[%s5685_s10] sm:$0xff] }
 0x9f1   :  { %v907_v35 = vadd.f32 %v4142_v19, %v906_v25  ;;  %v935_v43 = vor.u32 1.1754944e-38, %v934_v33 }
 0x9f2   :  { %vm933_vm15 = vcmp.eq.f32.partialorder %v932_v38, 8.507059e+37 }
 0x9f3   :  { %v911_v39 = vsel %vm910_vm10, %v4142_v19, %v907_v35 }
 0x9f4   :  { %v916_v1 = vsel %vm913_vm11, %v915_v63, %v911_v39 }
 0x9f5   :  { %v939_v2 = vmul.f32 %v4144_v0, %v916_v1  ;;  %v4148_v9 = vpop.eup %4147  ;;  %v938_v20 = vmul.f32 %v916_v1, %v4806_v42  ;;  %v3941_v0 = vld [vmem:[%s5683_s8 + $0x18] sm:$0xff]  ;;  %v4840_v1 = vld [vmem:[%s5685_s10 + $0x8] sm:$0xff] }
 0x9f6   :  { %v4150_v10 = vpop.eup %4149  ;;  %v924_v12 = vmul.f32 %v4148_v9, %v922_v6  ;;  %vm929_vm12 = vweird.f32 %v4148_v9  ;;  %1185 = vmatpush.bf16.msra.mxu3 %v3941_v0  ;;  %1240 = vmatpush.bf16.msra.mxu1 %v4840_v1  ;;  %v3940_v6 = vld [vmem:[%s5683_s8 + $0x10] sm:$0xff] }
 0x9f7   :  { %941 = vrot.lane.b32.xlu0 %v939_v2, %s4381_s24  ;;  %v4818_v13 = vpack.c.bf16 %v4150_v10, %v4150_v10  ;;  %vm930_vm14 = vmor %vm928_vm13, %vm929_vm12  ;;  %v3937_v2 = vld [vmem:[%s5709_s26 + $0x18] sm:$0xff]  ;;  %v4866_v10 = vld [vmem:[%s5681_s6] sm:$0xff] }
 0x9f8   :  { %v925_v15 = vsub.f32 1.0, %v924_v12  ;;  %1131 = vmatpush.bf16.msra.mxu2 %v3937_v2  ;;  %1215 = vmatpush.bf16.msra.mxu0 %v4866_v10 }
 0x9f9   :  { %3638 = vmatmul.msk.bf16.vlgmr.msrb.gmra.mxu0 %vm184_vm0, %v4818_v13  ;;  %3639 = vmatmul.msk.bf16.vlgmr.msrb.gmra.mxu1 %vm184_vm0, %v4818_v13 }
 0x9fa   :  { %v926_v16 = vmul.f32 %v4148_v9, %v925_v15  ;;  %1186 = vmatpush.bf16.msra.mxu3 %v3940_v6  ;;  %1241 = vmatpush.bf16.msra.mxu1 %v4857_v8  ;;  %v3939_v15 = vld [vmem:[%s5683_s8 + $0x8] sm:$0xff] }
 0x9fc   :  { %v927_v32 = vadd.f32 %v4148_v9, %v926_v16  ;;  %v3935_v16 = vld [vmem:[%s5709_s26 + $0x8] sm:$0xff] }
 0x9fe   :  { %v931_v40 = vsel %vm930_vm14, %v4148_v9, %v927_v32  ;;  %v3936_v9 = vld [vmem:[%s5709_s26 + $0x10] sm:$0xff]  ;;  %1187 = vmatpush.bf16.msra.mxu3 %v3939_v15 }
 0x9ff   :  { %v936_v46 = vsel %vm933_vm15, %v935_v43, %v931_v40  ;;  %1132 = vmatpush.bf16.msra.mxu2 %v3936_v9 }
 0xa03   :  { %1133 = vmatpush.bf16.msra.mxu2 %v3935_v16 }
 0xa09   :  { %1242 = vmatmul.bf16.vlgmr.msra.gmra.mxu1 %v4380_v18  ;;  %1216 = vmatmul.bf16.vlgmr.msra.gmra.mxu0 %v4380_v18 }
 0xa69   :  { %v942_v23 = vpop.permute.xlu0 %941 }
 0xa6a   :  { %v4825_v24 = vadd.f32 %v942_v23, %v938_v20  ;;  %v3938_v23 = vld [vmem:[%s5683_s8] sm:$0xff] }
 0xa6b   :  { %1188 = vmatpush.bf16.msra.mxu3 %v3938_v23 }
 0xa6c   :  { %4151 = vtanh.f32 %v4825_v24 }
 0xa72   :  { %v4152_v45 = vpop.eup %4151 }
 0xa73   :  { %v946_v47 = vmul.f32 %v4152_v45, %v936_v46 }
 0xa75   :  { %v948_v31 = vpack.c.bf16 %v946_v47, %v946_v47 }
 0xa76   :  { %v993_v42 = vpop.f32.mrf.mxu0  ;;  %v1006_v7 = vpop.f32.mrf.mxu1 }
 0xa77   :  { %950 = vrot.lane.b32.xlu1 %v948_v31, %s4381_s24 }
 0xa7e   :  { %v995_v49 = vpop.f32.mrf.mxu0  ;;  %v1008_v21 = vpop.f32.mrf.mxu1 }
 0xae9   :  { %v951_v50 = vpop.permute.xlu1 %950 }
 0xaea   :  { %3636 = vmatmul.msk.bf16.vlgmr.msrb.gmra.mxu2 %vm134_vm9, %v951_v50  ;;  %3637 = vmatmul.msk.bf16.vlgmr.msrb.gmra.mxu3 %vm134_vm9, %v951_v50 }
 0xb6d   :  { %v964_v48 = vpop.f32.mrf.mxu2  ;;  %v977_v51 = vpop.f32.mrf.mxu3 }
 0xb6e   :  { %v994_v14 = vadd.f32 %v993_v42, %v964_v48  ;;  %v1007_v55 = vadd.f32 %v1006_v7, %v977_v51  ;;  %v3945_v48 = vld [vmem:[%s5684_s9 + $0x8] sm:$0xff]  ;;  %v3934_v51 = vld [vmem:[%s5709_s26] sm:$0xff] }
 0xb6f   :  { %1519 = vmatpush.bf16.msrb.mxu1 %v3945_v48  ;;  %1134 = vmatpush.bf16.msra.mxu2 %v3934_v51 }
 0xb70   :  { %v1010_v37 = vadd.f32 %v994_v14, %v4635_v41  ;;  %v1011_v58 = vadd.f32 %v1007_v55, %v4638_v56  ;;  %v3944_v14 = vld [vmem:[%s5684_s9] sm:$0xff]  ;;  %v1243_v55 = vpop.f32.mrf.mxu1 }
 0xb72   :  { %v3640_v30 = vmul.f32 -1.442695, %v1010_v37  ;;  %v3641_v35 = vmul.f32 -1.442695, %v1011_v58  ;;  %v1494_v37 = vshll.u32 %v4818_v13, 16 }
 0xb73   :  { %1520 = vmatpush.bf16.msrb.mxu1 %v3944_v14 }
 0xb74   :  { %4153 = vpow2.f32 %v3640_v30  ;;  %v3943_v30 = vld [vmem:[%s5680_s5 + $0x8] sm:$0xff] }
 0xb75   :  { %v966_v52 = vpop.f32.mrf.mxu2  ;;  %v979_v44 = vpop.f32.mrf.mxu3  ;;  %1480 = vmatpush.bf16.msrb.mxu0 %v3943_v30 }
 0xb76   :  { %v1492_v52 = vshrl.u32 %v4818_v13, 16  ;;  %v1496_v44 = vrot.slane %v1494_v37, 1 }
 0xb7a   :  { %v4154_v53 = vpop.eup %4153 }
 0xb7b   :  { %v1015_v54 = vadd.f32 1.0, %v4154_v53  ;;  %v1497_v53 = vor.u32 %v1496_v44, %v1492_v52 }
 0xb7d   :  { %4155 = vrcp.f32 %v1015_v54  ;;  %v1027_v3 = vand.u32 2147483648, %v1015_v54  ;;  %v1025_v11 = vand.u32 2147483647, %v1015_v54  ;;  %vm1021_vm2 = vweird.f32 %v1015_v54  ;;  %3723 = vmatmul.msk.bf16.vlgmr.msrb.gmra.mxu1 %vm184_vm0, %v1497_v53 }
 0xb7e   :  { %4157 = vtanh.f32 %v1011_v58 }
 0xb7f   :  { %v1028_v41 = vor.u32 1.1754944e-38, %v1027_v3  ;;  %vm1026_vm4 = vcmp.eq.f32.partialorder %v1025_v11, 8.507059e+37  ;;  %4159 = vpow2.f32 %v3641_v35 }
 0xb83   :  { %v4156_v57 = vpop.eup %4155 }
 0xb84   :  { %v1017_v59 = vmul.f32 %v4156_v57, %v1015_v54  ;;  %vm1022_vm1 = vweird.f32 %v4156_v57  ;;  %v4158_v62 = vpop.eup %4157  ;;  %v3942_v54 = vld [vmem:[%s5680_s5] sm:$0xff] }
 0xb85   :  { %vm1023_vm3 = vmor %vm1021_vm2, %vm1022_vm1  ;;  %v4160_v56 = vpop.eup %4159  ;;  %1481 = vmatpush.bf16.msrb.mxu0 %v3942_v54 }
 0xb86   :  { %v1018_v60 = vsub.f32 1.0, %v1017_v59  ;;  %v1035_v63 = vadd.f32 1.0, %v4160_v56  ;;  %v1245_v59 = vpop.f32.mrf.mxu1 }
 0xb88   :  { %v1019_v19 = vmul.f32 %v4156_v57, %v1018_v60  ;;  %4161 = vrcp.f32 %v1035_v63  ;;  %v1047_v43 = vand.u32 2147483648, %v1035_v63  ;;  %vm1041_vm6 = vweird.f32 %v1035_v63  ;;  %3714 = vmatmul.msk.bf16.vlgmr.msrb.gmra.mxu0 %vm184_vm0, %v4818_v13  ;;  %v4050_v13 = vld [vmem:[%s5686_s11] ss:$0 sm:$0xff] }
 0xb89   :  { %v1045_v45 = vand.u32 2147483647, %v1035_v63 }
 0xb8a   :  { %v1020_v61 = vadd.f32 %v4156_v57, %v1019_v19  ;;  %v1048_v47 = vor.u32 1.1754944e-38, %v1047_v43 }
 0xb8b   :  { %vm1046_vm8 = vcmp.eq.f32.partialorder %v1045_v45, 8.507059e+37 }
 0xb8c   :  { %v1024_v28 = vsel %vm1023_vm3, %v4156_v57, %v1020_v61  ;;  %v1217_v57 = vpop.f32.mrf.mxu0 }
 0xb8d   :  { %v1029_v25 = vsel %vm1026_vm4, %v1028_v41, %v1024_v28 }
 0xb8e   :  { %v1052_v36 = vmul.f32 %v4158_v62, %v1029_v25  ;;  %v4162_v39 = vpop.eup %4161  ;;  %v1051_v32 = vmul.f32 %v1029_v25, %v4825_v24  ;;  %v4051_v25 = vld [vmem:[%s5682_s7] ss:$0 sm:$0xff]  ;;  %s4382_s7 = smov 32  }
 0xb8f   :  { %v1037_v5 = vmul.f32 %v4162_v39, %v1035_v63  ;;  %vm1042_vm5 = vweird.f32 %v4162_v39 }
 0xb90   :  { %1054 = vrot.lane.b32.xlu2 %v1052_v36, %s4381_s24  ;;  %vm1043_vm7 = vmor %vm1041_vm6, %vm1042_vm5 }
 0xb91   :  { %v1038_v12 = vsub.f32 1.0, %v1037_v5 }
 0xb93   :  { %v1039_v20 = vmul.f32 %v4162_v39, %v1038_v12 }
 0xb94   :  { %v1219_v60 = vpop.f32.mrf.mxu0 }
 0xb95   :  { %v1040_v40 = vadd.f32 %v4162_v39, %v1039_v20 }
 0xb97   :  { %v1044_v46 = vsel %vm1043_vm7, %v4162_v39, %v1040_v40 }
 0xb98   :  { %v1049_v42 = vsel %vm1046_vm8, %v1048_v47, %v1044_v46 }
 0xbea   :  { %v1055_v33 = vpop.permute.xlu2 %1054 }
 0xbeb   :  { %v1057_v38 = vadd.f32 %v1055_v33, %v1051_v32 }
 0xbed   :  { %4163 = vtanh.f32 %v1057_v38 }
 0xbf3   :  { %v4164_v31 = vpop.eup %4163 }
 0xbf4   :  { %v1059_v49 = vmul.f32 %v4164_v31, %v1049_v42 }
 0xbf6   :  { %v1079_v18 = vpack.c.bf16 %v1059_v49, %v1059_v49 }
 0xbf8   :  { %1152 = vrot.lane.b32.xlu1 %v1079_v18, %s4381_s24  ;;  %v1094_v24 = vshll.u32 %v1079_v18, 16  ;;  %v1092_v50 = vshrl.u32 %v1079_v18, 16 }
 0xbfa   :  { %v1096_v7 = vrot.slane %v1094_v24, 1  ;;  %v4906_v19 = vpop.f32.mrf.mxu1 }
 0xbfc   :  { %v1097_v21 = vor.u32 %v1096_v7, %v1092_v50 }
 0xbfe   :  { %1098 = vrot.lane.b32.xlu0 %v1097_v21, %s4381_s24 }
 0xc02   :  { %v1524_v61 = vpop.f32.mrf.mxu1 }
 0xc03   :  { %v4937_v61 = vld [vmem:[%s5687_s12 + $0x8] sm:$0xff] }
 0xc04   :  { %1350 = vmatpush.bf16.msrb.mxu2 %v4937_v61  ;;  %1370 = vmatpush.bf16.msrb.mxu3 %v4937_v61 }
 0xc05   :  { %v4908_v11 = vpop.f32.mrf.mxu0  ;;  %1642 = vmatpush.bf16.msra.mxu0 %v4937_v61  ;;  %1662 = vmatpush.bf16.msra.mxu1 %v4937_v61 }
 0xc0d   :  { %v1485_v41 = vpop.f32.mrf.mxu0 }
 0xc0e   :  { %v4943_v41 = vld [vmem:[%s5687_s12] sm:$0xff] }
 0xc0f   :  { %1351 = vmatpush.bf16.msrb.mxu2 %v4943_v41  ;;  %1371 = vmatpush.bf16.msrb.mxu3 %v4943_v41 }
 0xc10   :  { %1663 = vmatpush.bf16.msra.mxu1 %v4943_v41  ;;  %1643 = vmatpush.bf16.msra.mxu0 %v4943_v41 }
 0xc14   :  { %1828 = vmatpush.bf16.msrb.mxu0 %v4848_v4  ;;  %1842 = vmatpush.bf16.msrb.mxu1 %v4840_v1 }
 0xc18   :  { %1843 = vmatpush.bf16.msrb.mxu1 %v4857_v8  ;;  %1829 = vmatpush.bf16.msrb.mxu0 %v4866_v10 }
 0xc6a   :  { %v1153_v58 = vpop.permute.xlu1 %1152 }
 0xc6b   :  { %3675 = vmatmul.msk.bf16.vlgmr.msra.gmra.mxu3 %vm134_vm9, %v1153_v58 }
 0xc6c   :  { %1547 = vmatpush.bf16.msra.mxu3 %v4840_v1 }
 0xc70   :  { %v1099_v3 = vpop.permute.xlu0 %1098  ;;  %1548 = vmatpush.bf16.msra.mxu3 %v4857_v8 }
 0xc71   :  { %3658 = vmatmul.msk.bf16.vlgmr.msra.gmra.mxu2 %vm134_vm9, %v1099_v3 }
 0xc72   :  { %1533 = vmatpush.bf16.msra.mxu2 %v4848_v4 }
 0xc76   :  { %1534 = vmatpush.bf16.msra.mxu2 %v4866_v10 }
 0xcee   :  { %v1190_v28 = vpop.f32.mrf.mxu3 }
 0xcef   :  { %v4913_v62 = vadd.f32 %v4050_v13, %v1190_v28 }
 0xcf1   :  { %v1247_v36 = vadd.f32 %v1243_v55, %v4913_v62 }
 0xcf3   :  { %4165 = vtanh.f32 %v1247_v36  ;;  %v3693_v15 = vmul.f32 -1.442695, %v1247_v36 }
 0xcf4   :  { %v1136_v35 = vpop.f32.mrf.mxu2 }
 0xcf5   :  { %v4919_v56 = vadd.f32 %v4051_v25, %v1136_v35 }
 0xcf6   :  { %v1192_v63 = vpop.f32.mrf.mxu3 }
 0xcf7   :  { %v1221_v39 = vadd.f32 %v1217_v57, %v4919_v56 }
 0xcf9   :  { %v4166_v0 = vpop.eup %4165  ;;  %4167 = vtanh.f32 %v1221_v39  ;;  %v3692_v6 = vmul.f32 -1.442695, %v1221_v39  ;;  %v3947_v39 = vld [vmem:[%s5680_s5 + $0x8] sm:$0xff] }
 0xcfa   :  { %1307 = vrot.lane.b32.xlu0 %v4166_v0, %s4381_s24 }
 0xcfb   :  { %4169 = vpow2.f32 %v3692_v6 }
 0xcfc   :  { %v1138_v2 = vpop.f32.mrf.mxu2 }
 0xcfd   :  { %v3946_v2 = vld [vmem:[%s5680_s5] sm:$0xff] }
 0xcff   :  { %v4168_v5 = vpop.eup %4167 }
 0xd00   :  { %1270 = vrot.lane.b32.xlu2 %v4168_v5, %s4381_s24  ;;  %v3949_v5 = vld [vmem:[%s5684_s9 + $0x8] sm:$0xff] }
 0xd01   :  { %v4170_v9 = vpop.eup %4169 }
 0xd02   :  { %v1251_v12 = vadd.f32 1.0, %v4170_v9  ;;  %v3948_v9 = vld [vmem:[%s5684_s9] sm:$0xff] }
 0xd04   :  { %4171 = vrcp.f32 %v1251_v12  ;;  %v1263_v43 = vand.u32 2147483648, %v1251_v12  ;;  %vm1257_vm10 = vweird.f32 %v1251_v12  ;;  %v1261_v45 = vand.u32 2147483647, %v1251_v12 }
 0xd05   :  { %4173 = vpow2.f32 %v3693_v15  ;;  %v1787_v15 = vshrl.u32 %v4799_v29, 16 }
 0xd06   :  { %v1264_v31 = vor.u32 1.1754944e-38, %v1263_v43  ;;  %vm1262_vm12 = vcmp.eq.f32.partialorder %v1261_v45, 8.507059e+37 }
 0xd0a   :  { %v4172_v16 = vpop.eup %4171 }
 0xd0b   :  { %v1253_v20 = vmul.f32 %v4172_v16, %v1251_v12  ;;  %v4174_v23 = vpop.eup %4173  ;;  %vm1258_vm9 = vweird.f32 %v4172_v16  ;;  %v1789_v12 = vshll.u32 %v4799_v29, 16 }
 0xd0c   :  { %v1288_v33 = vadd.f32 1.0, %v4174_v23  ;;  %vm1259_vm11 = vmor %vm1257_vm10, %vm1258_vm9  ;;  %v4994_v23 = vld [vmem:[%s5688_s13] ss:$0 sm:$0xff] }
 0xd0d   :  { %v1254_v32 = vsub.f32 1.0, %v1253_v20 }
 0xd0e   :  { %4175 = vrcp.f32 %v1288_v33  ;;  %v1300_v48 = vand.u32 2147483648, %v1288_v33  ;;  %vm1294_vm14 = vweird.f32 %v1288_v33  ;;  %v1298_v51 = vand.u32 2147483647, %v1288_v33 }
 0xd0f   :  { %v1255_v38 = vmul.f32 %v4172_v16, %v1254_v32 }
 0xd10   :  { %v1301_v37 = vor.u32 1.1754944e-38, %v1300_v48  ;;  %vm1299_vm1 = vcmp.eq.f32.partialorder %v1298_v51, 8.507059e+37 }
 0xd11   :  { %v1256_v40 = vadd.f32 %v4172_v16, %v1255_v38  ;;  %v1487_v38 = vadd.f32 %v4908_v11, %v4919_v56  ;;  %v1526_v11 = vadd.f32 %v4906_v19, %v4913_v62 }
 0xd13   :  { %v1260_v47 = vsel %vm1259_vm11, %v4172_v16, %v1256_v40  ;;  %v1791_v16 = vrot.slane %v1789_v12, 1 }
 0xd14   :  { %v4176_v46 = vpop.eup %4175  ;;  %v1265_v18 = vsel %vm1262_vm12, %v1264_v31, %v1260_v47 }
 0xd15   :  { %v1290_v42 = vmul.f32 %v4176_v46, %v1288_v33  ;;  %vm1295_vm13 = vweird.f32 %v4176_v46  ;;  %v1268_v57 = vmul.f32 0.0, %v1265_v18  ;;  %v1792_v20 = vor.u32 %v1791_v16, %v1787_v15 }
 0xd16   :  { %vm1296_vm15 = vmor %vm1294_vm14, %vm1295_vm13 }
 0xd17   :  { %v1291_v50 = vsub.f32 1.0, %v1290_v42 }
 0xd19   :  { %v1292_v7 = vmul.f32 %v4176_v46, %v1291_v50 }
 0xd1b   :  { %v1293_v21 = vadd.f32 %v4176_v46, %v1292_v7 }
 0xd1d   :  { %v1297_v14 = vsel %vm1296_vm15, %v4176_v46, %v1293_v21 }
 0xd1e   :  { %v1302_v30 = vsel %vm1299_vm1, %v1301_v37, %v1297_v14 }
 0xd1f   :  { %v1305_v53 = vmul.f32 0.0, %v1302_v30 }
 0xd5a   :  { %v1271_v49 = vpop.permute.xlu2 %1270 }
 0xd5b   :  { %v1273_v24 = vmul.f32 %v1271_v49, %v1265_v18 }
 0xd5d   :  { %1275 = vrot.lane.b32.xlu1 %v1273_v24, %s4382_s7 }
 0xd6c   :  { %v1308_v52 = vpop.permute.xlu0 %1307 }
 0xd6d   :  { %v1310_v44 = vmul.f32 %v1308_v52, %v1302_v30 }
 0xd6f   :  { %1312 = vrot.lane.b32.xlu2 %v1310_v44, %s4382_s7 }
 0xdc9   :  { %v1313_v54 = vpop.permute.xlu2 %1312 }
 0xdca   :  { %v4926_v55 = vadd.f32 %v1313_v54, %v1305_v53 }
 0xdcc   :  { %4177 = vtanh.f32 %v4926_v55 }
 0xdcf   :  { %v1276_v58 = vpop.permute.xlu1 %1275 }
 0xdd0   :  { %v4929_v59 = vadd.f32 %v1276_v58, %v1268_v57 }
 0xdd2   :  { %v4178_v60 = vpop.eup %4177  ;;  %4179 = vtanh.f32 %v4929_v59 }
 0xdd3   :  { %1318 = vrot.lane.b32.xlu1 %v4178_v60, %s4381_s24 }
 0xdd8   :  { %v4180_v3 = vpop.eup %4179 }
 0xdd9   :  { %1281 = vrot.lane.b32.xlu0 %v4180_v3, %s4381_s24 }
 0xe45   :  { %v1319_v13 = vpop.permute.xlu1 %1318 }
 0xe46   :  { %v1321_v28 = vmul.f32 %v1319_v13, %v1302_v30 }
 0xe48   :  { %v1357_v25 = vpack.c.bf16 %v1321_v28, %v1321_v28 }
 0xe4a   :  { %1359 = vrot.lane.b32.xlu0 %v1357_v25, %s4382_s7 }
 0xe4b   :  { %v1282_v36 = vpop.permute.xlu0 %1281 }
 0xe4c   :  { %v1284_v35 = vmul.f32 %v1282_v36, %v1265_v18 }
 0xe4e   :  { %v1322_v63 = vpack.c.bf16 %v1284_v35, %v1284_v35 }
 0xe50   :  { %1327 = vrot.lane.b32.xlu2 %v1322_v63, %s4382_s7 }
 0xeaa   :  { %v1328_v0 = vpop.permute.xlu2 %1327 }
 0xeab   :  { %3702 = vmatmul.msk.bf16.vlgmr.msrb.gmra.mxu2 %vm184_vm0, %v1328_v0 }
 0xeac   :  { %1775 = vmatpush.bf16.msrb.mxu2 %v3947_v39 }
 0xeb0   :  { %1776 = vmatpush.bf16.msrb.mxu2 %v3946_v2 }
 0xebb   :  { %3724 = vmatmul.msk.bf16.vlgmr.msra.gmra.mxu2 %vm184_vm0, %v1328_v0 }
 0xebc   :  { %v1360_v6 = vpop.permute.xlu0 %1359  ;;  %1937 = vmatpush.bf16.msra.mxu2 %v4937_v61 }
 0xebd   :  { %3703 = vmatmul.msk.bf16.vlgmr.msrb.gmra.mxu3 %vm184_vm0, %v1360_v6 }
 0xebe   :  { %1814 = vmatpush.bf16.msrb.mxu3 %v3949_v5 }
 0xec0   :  { %1938 = vmatpush.bf16.msra.mxu2 %v4943_v41 }
 0xec2   :  { %1815 = vmatpush.bf16.msrb.mxu3 %v3948_v9 }
 0xecb   :  { %3744 = vmatmul.msk.bf16.vlgmr.msrb.gmra.mxu2 %vm184_vm0, %v4799_v29 }
 0xecc   :  { %2123 = vmatpush.bf16.msrb.mxu2 %v4848_v4 }
 0xecd   :  { %3725 = vmatmul.msk.bf16.vlgmr.msra.gmra.mxu3 %vm184_vm0, %v1360_v6 }
 0xece   :  { %1957 = vmatpush.bf16.msra.mxu3 %v4937_v61 }
 0xed0   :  { %2124 = vmatpush.bf16.msrb.mxu2 %v4866_v10 }
 0xed2   :  { %1958 = vmatpush.bf16.msra.mxu3 %v4943_v41 }
 0xedd   :  { %3753 = vmatmul.msk.bf16.vlgmr.msrb.gmra.mxu3 %vm184_vm0, %v1792_v20 }
 0xede   :  { %2137 = vmatpush.bf16.msrb.mxu3 %v4840_v1 }
 0xee2   :  { %2138 = vmatpush.bf16.msrb.mxu3 %v4857_v8 }
 0xf2e   :  { %v1353_v32 = vpop.f32.mrf.mxu2 }
 0xf2f   :  { %v4997_v33 = vadd.f32 %v4994_v23, %v1353_v32 }
 0xf31   :  { %1377 = vst [vmem:[%s5693_s18] sm:$0x7] %v4997_v33 }
 0xf36   :  { %v1355_v29 = vpop.f32.mrf.mxu2 }
 0xf3e   :  { %v1536_v40 = vpop.f32.mrf.mxu2 }
 0xf3f   :  { %v1540_v43 = vadd.f32 %v1536_v40, %v1487_v38 }
 0xf40   :  { %v1373_v45 = vpop.f32.mrf.mxu3 }
 0xf41   :  { %4181 = vtanh.f32 %v1540_v43  ;;  %v5006_v46 = vadd.f32 %v4994_v23, %v1373_v45  ;;  %v3726_v37 = vmul.f32 -1.442695, %v1540_v43 }
 0xf43   :  { %1378 = vst [vmem:[%s5694_s19] sm:$0x7] %v5006_v46 }
 0xf46   :  { %v1538_v47 = vpop.f32.mrf.mxu2 }
 0xf47   :  { %v4182_v31 = vpop.eup %4181 }
 0xf48   :  { %1577 = vrot.lane.b32.xlu1 %v4182_v31, %s4381_s24  ;;  %v1375_v42 = vpop.f32.mrf.mxu3 }
 0xf4e   :  { %v5013_v49 = vpop.f32.mrf.mxu2 }
 0xf50   :  { %v1550_v18 = vpop.f32.mrf.mxu3 }
 0xf51   :  { %v1554_v24 = vadd.f32 %v1550_v18, %v1526_v11 }
 0xf53   :  { %4183 = vtanh.f32 %v1554_v24  ;;  %v3727_v14 = vmul.f32 -1.442695, %v1554_v24 }
 0xf55   :  { %4185 = vpow2.f32 %v3727_v14  ;;  %v3952_v14 = vld [vmem:[%s5684_s9] sm:$0xff] }
 0xf56   :  { %v1780_v50 = vpop.f32.mrf.mxu2  ;;  %4187 = vpow2.f32 %v3726_v37  ;;  %v3951_v37 = vld [vmem:[%s5680_s5 + $0x8] sm:$0xff] }
 0xf58   :  { %v1552_v7 = vpop.f32.mrf.mxu3 }
 0xf59   :  { %v4184_v21 = vpop.eup %4183 }
 0xf5a   :  { %1614 = vrot.lane.b32.xlu2 %v4184_v21, %s4381_s24 }
 0xf5b   :  { %v4186_v30 = vpop.eup %4185 }
 0xf5c   :  { %v1595_v52 = vadd.f32 1.0, %v4186_v30  ;;  %v4188_v44 = vpop.eup %4187 }
 0xf5d   :  { %v1558_v19 = vadd.f32 1.0, %v4188_v44  ;;  %v2084_v44 = vshll.u32 %v4768_v26, 16 }
 0xf5e   :  { %4189 = vrcp.f32 %v1595_v52  ;;  %v1607_v25 = vand.u32 2147483648, %v1595_v52  ;;  %vm1601_vm3 = vweird.f32 %v1595_v52  ;;  %v1605_v36 = vand.u32 2147483647, %v1595_v52 }
 0xf5f   :  { %4191 = vrcp.f32 %v1558_v19  ;;  %v1570_v6 = vand.u32 2147483648, %v1558_v19  ;;  %vm1564_vm7 = vweird.f32 %v1558_v19  ;;  %v1568_v12 = vand.u32 2147483647, %v1558_v19 }
 0xf60   :  { %v5018_v48 = vpop.f32.mrf.mxu3  ;;  %v1608_v39 = vor.u32 1.1754944e-38, %v1607_v25  ;;  %vm1606_vm5 = vcmp.eq.f32.partialorder %v1605_v36, 8.507059e+37 }
 0xf61   :  { %v1571_v16 = vor.u32 1.1754944e-38, %v1570_v6  ;;  %vm1569_vm9 = vcmp.eq.f32.partialorder %v1568_v12, 8.507059e+37 }
 0xf64   :  { %v4190_v53 = vpop.eup %4189 }
 0xf65   :  { %v1597_v54 = vmul.f32 %v4190_v53, %v1595_v52  ;;  %v4192_v57 = vpop.eup %4191  ;;  %vm1602_vm2 = vweird.f32 %v4190_v53  ;;  %v3950_v52 = vld [vmem:[%s5680_s5] sm:$0xff] }
 0xf66   :  { %v1560_v60 = vmul.f32 %v4192_v57, %v1558_v19  ;;  %vm1603_vm4 = vmor %vm1601_vm3, %vm1602_vm2  ;;  %vm1565_vm6 = vweird.f32 %v4192_v57  ;;  %v2082_v19 = vshrl.u32 %v4768_v26, 16 }
 0xf67   :  { %v1598_v58 = vsub.f32 1.0, %v1597_v54  ;;  %vm1566_vm8 = vmor %vm1564_vm7, %vm1565_vm6 }
 0xf68   :  { %v1819_v51 = vpop.f32.mrf.mxu3  ;;  %v1561_v13 = vsub.f32 1.0, %v1560_v60 }
 0xf69   :  { %v1599_v3 = vmul.f32 %v4190_v53, %v1598_v58 }
 0xf6a   :  { %v1562_v35 = vmul.f32 %v4192_v57, %v1561_v13 }
 0xf6b   :  { %v1600_v28 = vadd.f32 %v4190_v53, %v1599_v3 }
 0xf6c   :  { %v1563_v0 = vadd.f32 %v4192_v57, %v1562_v35  ;;  %v1782_v35 = vadd.f32 %v5013_v49, %v4919_v56 }
 0xf6d   :  { %v1604_v63 = vsel %vm1603_vm4, %v4190_v53, %v1600_v28  ;;  %v2086_v53 = vrot.slane %v2084_v44, 1  ;;  %v1821_v28 = vadd.f32 %v5018_v48, %v4913_v62 }
 0xf6e   :  { %v1609_v5 = vsel %vm1606_vm5, %v1608_v39, %v1604_v63  ;;  %v1567_v15 = vsel %vm1566_vm8, %v4192_v57, %v1563_v0 }
 0xf6f   :  { %v1572_v32 = vsel %vm1569_vm9, %v1571_v16, %v1567_v15  ;;  %v1612_v38 = vmul.f32 %v1609_v5, %v4926_v55  ;;  %v2087_v54 = vor.u32 %v2086_v53, %v2082_v19 }
 0xf70   :  { %v1575_v45 = vmul.f32 %v1572_v32, %v4929_v59  ;;  %v3953_v59 = vld [vmem:[%s5684_s9 + $0x8] sm:$0xff] }
 0xfb4   :  { %v1615_v2 = vpop.permute.xlu2 %1614 }
 0xfb5   :  { %v1617_v9 = vmul.f32 %v1615_v2, %v1609_v5 }
 0xfb7   :  { %1619 = vrot.lane.b32.xlu1 %v1617_v9, %s4382_s7 }
 0xfba   :  { %v1578_v20 = vpop.permute.xlu1 %1577 }
 0xfbb   :  { %v1580_v29 = vmul.f32 %v1578_v20, %v1572_v32 }
 0xfbd   :  { %1582 = vrot.lane.b32.xlu0 %v1580_v29, %s4382_s7 }
0x1029   :  { %v1620_v40 = vpop.permute.xlu1 %1619 }
0x102a   :  { %v5023_v43 = vadd.f32 %v1620_v40, %v1612_v38 }
0x102c   :  { %4193 = vtanh.f32 %v5023_v43 }
0x102f   :  { %v1583_v47 = vpop.permute.xlu0 %1582 }
0x1030   :  { %v5027_v31 = vadd.f32 %v1583_v47, %v1575_v45 }
0x1032   :  { %v4194_v42 = vpop.eup %4193  ;;  %4195 = vtanh.f32 %v5027_v31 }
0x1033   :  { %1625 = vrot.lane.b32.xlu0 %v4194_v42, %s4381_s24 }
0x1038   :  { %v4196_v11 = vpop.eup %4195 }
0x1039   :  { %1588 = vrot.lane.b32.xlu2 %v4196_v11, %s4381_s24 }
0x1093   :  { %v1589_v18 = vpop.permute.xlu2 %1588 }
0x1094   :  { %v1591_v55 = vmul.f32 %v1589_v18, %v1572_v32 }
0x1096   :  { %v1629_v24 = vpack.c.bf16 %v1591_v55, %v1591_v55 }
0x1098   :  { %1631 = vrot.lane.b32.xlu1 %v1629_v24, %s4382_s7 }
0x10a5   :  { %v1626_v50 = vpop.permute.xlu0 %1625 }
0x10a6   :  { %v1628_v7 = vmul.f32 %v1626_v50, %v1609_v5 }
0x10a8   :  { %v1649_v21 = vpack.c.bf16 %v1628_v7, %v1628_v7 }
0x10aa   :  { %1651 = vrot.lane.b32.xlu2 %v1649_v21, %s4382_s7 }
0x1104   :  { %v1652_v51 = vpop.permute.xlu2 %1651 }
0x1105   :  { %3729 = vmatmul.msk.bf16.vlgmr.msra.gmra.mxu1 %vm184_vm0, %v1652_v51 }
0x1106   :  { %2109 = vmatpush.bf16.msra.mxu1 %v3953_v59 }
0x110a   :  { %v1632_v30 = vpop.permute.xlu1 %1631  ;;  %2110 = vmatpush.bf16.msra.mxu1 %v3952_v14 }
0x110b   :  { %3728 = vmatmul.msk.bf16.vlgmr.msra.gmra.mxu0 %vm184_vm0, %v1632_v30 }
0x110c   :  { %2070 = vmatpush.bf16.msra.mxu0 %v3951_v37 }
0x1110   :  { %2071 = vmatpush.bf16.msra.mxu0 %v3950_v52 }
0x1115   :  { %3755 = vmatmul.msk.bf16.vlgmr.msrb.gmra.mxu1 %vm184_vm0, %v1652_v51 }
0x1116   :  { %2252 = vmatpush.bf16.msrb.mxu1 %v4937_v61 }
0x111a   :  { %2253 = vmatpush.bf16.msrb.mxu1 %v4943_v41 }
0x111b   :  { %3754 = vmatmul.msk.bf16.vlgmr.msrb.gmra.mxu0 %vm184_vm0, %v1632_v30 }
0x111c   :  { %2232 = vmatpush.bf16.msrb.mxu0 %v4937_v61 }
0x1120   :  { %2233 = vmatpush.bf16.msrb.mxu0 %v4943_v41 }
0x1125   :  { %3783 = vmatmul.msk.bf16.vlgmr.msra.gmra.mxu1 %vm184_vm0, %v2087_v54 }
0x1126   :  { %2432 = vmatpush.bf16.msra.mxu1 %v4840_v1 }
0x112a   :  { %2433 = vmatpush.bf16.msra.mxu1 %v4857_v8 }
0x112b   :  { %3774 = vmatmul.msk.bf16.vlgmr.msra.gmra.mxu0 %vm184_vm0, %v4768_v26 }
0x112c   :  { %2418 = vmatpush.bf16.msra.mxu0 %v4848_v4 }
0x1130   :  { %2419 = vmatpush.bf16.msra.mxu0 %v4866_v10 }
0x1182   :  { %v1665_v57 = vpop.f32.mrf.mxu1 }
0x1183   :  { %v5064_v58 = vadd.f32 %v4994_v23, %v1665_v57 }
0x1185   :  { %3731 = vst [vmem:[%s5694_s19 + $0x4] sm:$0x7] %v5064_v58 }
0x1188   :  { %v1645_v60 = vpop.f32.mrf.mxu0 }
0x1189   :  { %v5071_v3 = vadd.f32 %v4994_v23, %v1645_v60 }
0x118a   :  { %v1667_v13 = vpop.f32.mrf.mxu1 }
0x118b   :  { %3730 = vst [vmem:[%s5693_s18 + $0x4] sm:$0x7] %v5071_v3 }
0x1190   :  { %v1647_v26 = vpop.f32.mrf.mxu0 }
0x1192   :  { %v1845_v25 = vpop.f32.mrf.mxu1 }
0x1193   :  { %v1849_v36 = vadd.f32 %v1845_v25, %v1821_v28 }
0x1195   :  { %4197 = vtanh.f32 %v1849_v36  ;;  %v3757_v16 = vmul.f32 -1.442695, %v1849_v36 }
0x1198   :  { %v1831_v63 = vpop.f32.mrf.mxu0 }
0x1199   :  { %v1835_v39 = vadd.f32 %v1831_v63, %v1782_v35 }
0x119a   :  { %v1847_v0 = vpop.f32.mrf.mxu1 }
0x119b   :  { %v4198_v2 = vpop.eup %4197  ;;  %4199 = vtanh.f32 %v1835_v39  ;;  %v3756_v49 = vmul.f32 -1.442695, %v1835_v39 }
0x119c   :  { %1909 = vrot.lane.b32.xlu1 %v4198_v2, %s4381_s24  ;;  %4201 = vpow2.f32 %v3757_v16 }
0x119d   :  { %4203 = vpow2.f32 %v3756_v49  ;;  %v3956_v49 = vld [vmem:[%s5684_s9] sm:$0xff] }
0x11a0   :  { %v1833_v5 = vpop.f32.mrf.mxu0 }
0x11a1   :  { %v4200_v6 = vpop.eup %4199 }
0x11a2   :  { %1872 = vrot.lane.b32.xlu0 %v4200_v6, %s4381_s24  ;;  %v5083_v9 = vpop.f32.mrf.mxu1  ;;  %v4202_v20 = vpop.eup %4201 }
0x11a3   :  { %v1890_v32 = vadd.f32 1.0, %v4202_v20  ;;  %v4204_v29 = vpop.eup %4203  ;;  %v3955_v20 = vld [vmem:[%s5680_s5 + $0x8] sm:$0xff] }
0x11a4   :  { %v1853_v38 = vadd.f32 1.0, %v4204_v29  ;;  %v3954_v29 = vld [vmem:[%s5680_s5] sm:$0xff] }
0x11a5   :  { %4205 = vrcp.f32 %v1890_v32  ;;  %v1902_v50 = vand.u32 2147483648, %v1890_v32  ;;  %vm1896_vm11 = vweird.f32 %v1890_v32  ;;  %v1900_v7 = vand.u32 2147483647, %v1890_v32 }
0x11a6   :  { %4207 = vrcp.f32 %v1853_v38  ;;  %v1865_v52 = vand.u32 2147483648, %v1853_v38  ;;  %vm1859_vm15 = vweird.f32 %v1853_v38  ;;  %v1863_v19 = vand.u32 2147483647, %v1853_v38 }
0x11a7   :  { %v1903_v51 = vor.u32 1.1754944e-38, %v1902_v50  ;;  %vm1901_vm13 = vcmp.eq.f32.partialorder %v1900_v7, 8.507059e+37 }
0x11a8   :  { %v5085_v48 = vpop.f32.mrf.mxu0  ;;  %v1866_v54 = vor.u32 1.1754944e-38, %v1865_v52  ;;  %vm1864_vm2 = vcmp.eq.f32.partialorder %v1863_v19, 8.507059e+37 }
0x11aa   :  { %v2114_v12 = vpop.f32.mrf.mxu1 }
0x11ab   :  { %v4206_v40 = vpop.eup %4205 }
0x11ac   :  { %v1892_v45 = vmul.f32 %v4206_v40, %v1890_v32  ;;  %v4208_v47 = vpop.eup %4207  ;;  %vm1897_vm10 = vweird.f32 %v4206_v40 }
0x11ad   :  { %v1855_v11 = vmul.f32 %v4208_v47, %v1853_v38  ;;  %vm1898_vm12 = vmor %vm1896_vm11, %vm1897_vm10  ;;  %vm1860_vm14 = vweird.f32 %v4208_v47  ;;  %v2379_v38 = vshll.u32 %v4737_v34, 16 }
0x11ae   :  { %v1893_v42 = vsub.f32 1.0, %v1892_v45  ;;  %vm1861_vm1 = vmor %vm1859_vm15, %vm1860_vm14 }
0x11af   :  { %v1856_v55 = vsub.f32 1.0, %v1855_v11  ;;  %v2381_v45 = vrot.slane %v2379_v38, 1 }
0x11b0   :  { %v2075_v15 = vpop.f32.mrf.mxu0  ;;  %v1894_v18 = vmul.f32 %v4206_v40, %v1893_v42 }
0x11b1   :  { %v1857_v21 = vmul.f32 %v4208_v47, %v1856_v55 }
0x11b2   :  { %v1895_v24 = vadd.f32 %v4206_v40, %v1894_v18 }
0x11b3   :  { %v1858_v14 = vadd.f32 %v4208_v47, %v1857_v21 }
0x11b4   :  { %v1899_v59 = vsel %vm1898_vm12, %v4206_v40, %v1895_v24  ;;  %v2377_v40 = vshrl.u32 %v4737_v34, 16  ;;  %v2077_v24 = vadd.f32 %v5085_v48, %v4919_v56 }
0x11b5   :  { %v1904_v30 = vsel %vm1901_vm13, %v1903_v51, %v1899_v59  ;;  %v1862_v53 = vsel %vm1861_vm1, %v4208_v47, %v1858_v14 }
0x11b6   :  { %v1867_v57 = vsel %vm1864_vm2, %v1866_v54, %v1862_v53  ;;  %v1907_v35 = vmul.f32 %v1904_v30, %v5023_v43  ;;  %v3957_v43 = vld [vmem:[%s5684_s9 + $0x8] sm:$0xff]  ;;  %v2382_v47 = vor.u32 %v2381_v45, %v2377_v40 }
0x11b7   :  { %v1870_v26 = vmul.f32 %v1867_v57, %v5027_v31 }
0x120e   :  { %v1910_v37 = vpop.permute.xlu1 %1909 }
0x120f   :  { %v1912_v44 = vmul.f32 %v1910_v37, %v1904_v30 }
0x1211   :  { %1914 = vrot.lane.b32.xlu0 %v1912_v44, %s4382_s7 }
0x1214   :  { %v1873_v60 = vpop.permute.xlu0 %1872 }
0x1215   :  { %v1875_v13 = vmul.f32 %v1873_v60, %v1867_v57 }
0x1217   :  { %1877 = vrot.lane.b32.xlu2 %v1875_v13, %s4382_s7 }
0x1271   :  { %v1878_v28 = vpop.permute.xlu2 %1877 }
0x1272   :  { %v5090_v25 = vadd.f32 %v1878_v28, %v1870_v26 }
0x1274   :  { %4209 = vtanh.f32 %v5090_v25 }
0x127a   :  { %v4210_v36 = vpop.eup %4209 }
0x127b   :  { %1883 = vrot.lane.b32.xlu1 %v4210_v36, %s4381_s24 }
0x1283   :  { %v1915_v63 = vpop.permute.xlu0 %1914 }
0x1284   :  { %v5095_v39 = vadd.f32 %v1915_v63, %v1907_v35 }
0x1286   :  { %4211 = vtanh.f32 %v5095_v39 }
0x128c   :  { %v4212_v0 = vpop.eup %4211 }
0x128d   :  { %1920 = vrot.lane.b32.xlu2 %v4212_v0, %s4381_s24 }
0x12e7   :  { %v1921_v2 = vpop.permute.xlu2 %1920 }
0x12e8   :  { %v1923_v31 = vmul.f32 %v1921_v2, %v1904_v30 }
0x12ea   :  { %v1944_v5 = vpack.c.bf16 %v1923_v31, %v1923_v31 }
0x12ec   :  { %1946 = vrot.lane.b32.xlu1 %v1944_v5, %s4382_s7 }
0x12ed   :  { %v1884_v6 = vpop.permute.xlu1 %1883 }
0x12ee   :  { %v1886_v12 = vmul.f32 %v1884_v6, %v1867_v57 }
0x12f0   :  { %v1924_v15 = vpack.c.bf16 %v1886_v12, %v1886_v12 }
0x12f2   :  { %1926 = vrot.lane.b32.xlu0 %v1924_v15, %s4382_s7 }
0x135e   :  { %v1947_v16 = vpop.permute.xlu1 %1946 }
0x135f   :  { %3759 = vmatmul.msk.bf16.vlgmr.msra.gmra.mxu3 %vm184_vm0, %v1947_v16 }
0x1360   :  { %2404 = vmatpush.bf16.msra.mxu3 %v3957_v43 }
0x1364   :  { %v1927_v32 = vpop.permute.xlu0 %1926  ;;  %2405 = vmatpush.bf16.msra.mxu3 %v3956_v49 }
0x1365   :  { %3758 = vmatmul.msk.bf16.vlgmr.msra.gmra.mxu2 %vm184_vm0, %v1927_v32 }
0x1366   :  { %2365 = vmatpush.bf16.msra.mxu2 %v3955_v20 }
0x136a   :  { %2366 = vmatpush.bf16.msra.mxu2 %v3954_v29 }
0x136f   :  { %3785 = vmatmul.msk.bf16.vlgmr.msrb.gmra.mxu3 %vm184_vm0, %v1947_v16 }
0x1370   :  { %2547 = vmatpush.bf16.msrb.mxu3 %v4937_v61 }
0x1374   :  { %2548 = vmatpush.bf16.msrb.mxu3 %v4943_v41 }
0x1375   :  { %3784 = vmatmul.msk.bf16.vlgmr.msrb.gmra.mxu2 %vm184_vm0, %v1927_v32 }
0x1376   :  { %2527 = vmatpush.bf16.msrb.mxu2 %v4937_v61 }
0x137a   :  { %2528 = vmatpush.bf16.msrb.mxu2 %v4943_v41 }
0x137f   :  { %3813 = vmatmul.msk.bf16.vlgmr.msra.gmra.mxu3 %vm184_vm0, %v2382_v47 }
0x1380   :  { %2727 = vmatpush.bf16.msra.mxu3 %v4840_v1 }
0x1384   :  { %2728 = vmatpush.bf16.msra.mxu3 %v4857_v8 }
0x1385   :  { %3804 = vmatmul.msk.bf16.vlgmr.msra.gmra.mxu2 %vm184_vm0, %v4737_v34 }
0x1386   :  { %2713 = vmatpush.bf16.msra.mxu2 %v4848_v4  ;;  %v2116_v4 = vadd.f32 %v5083_v9, %v4913_v62 }
0x138a   :  { %2714 = vmatpush.bf16.msra.mxu2 %v4866_v10 }
0x13e2   :  { %v1960_v42 = vpop.f32.mrf.mxu3 }
0x13e3   :  { %v5131_v11 = vadd.f32 %v4994_v23, %v1960_v42 }
0x13e5   :  { %3761 = vst [vmem:[%s5694_s19 + $0x8] sm:$0x7] %v5131_v11 }
0x13e8   :  { %v1940_v18 = vpop.f32.mrf.mxu2 }
0x13e9   :  { %v5138_v1 = vadd.f32 %v4994_v23, %v1940_v18 }
0x13ea   :  { %v1962_v8 = vpop.f32.mrf.mxu3 }
0x13eb   :  { %3760 = vst [vmem:[%s5693_s18 + $0x8] sm:$0x7] %v5138_v1 }
0x13f0   :  { %v1942_v34 = vpop.f32.mrf.mxu2 }
0x13f2   :  { %v2140_v10 = vpop.f32.mrf.mxu3 }
0x13f3   :  { %v2144_v55 = vadd.f32 %v2140_v10, %v2116_v4 }
0x13f5   :  { %4213 = vtanh.f32 %v2144_v55  ;;  %v3787_v53 = vmul.f32 -1.442695, %v2144_v55 }
0x13f8   :  { %v2126_v50 = vpop.f32.mrf.mxu2 }
0x13f9   :  { %v2130_v7 = vadd.f32 %v2126_v50, %v2077_v24 }
0x13fa   :  { %v2142_v21 = vpop.f32.mrf.mxu3 }
0x13fb   :  { %v4214_v59 = vpop.eup %4213  ;;  %4215 = vtanh.f32 %v2130_v7  ;;  %v3786_v44 = vmul.f32 -1.442695, %v2130_v7 }
0x13fc   :  { %2204 = vrot.lane.b32.xlu0 %v4214_v59, %s4381_s24 }
0x13fd   :  { %4217 = vpow2.f32 %v3786_v44 }
0x1400   :  { %v2128_v51 = vpop.f32.mrf.mxu2 }
0x1401   :  { %v4216_v14 = vpop.eup %4215 }
0x1402   :  { %v5149_v37 = vpop.f32.mrf.mxu3  ;;  %2167 = vrot.lane.b32.xlu2 %v4216_v14, %s4381_s24 }
0x1403   :  { %v4218_v48 = vpop.eup %4217 }
0x1404   :  { %v2148_v19 = vadd.f32 1.0, %v4218_v48  ;;  %v3960_v48 = vld [vmem:[%s5684_s9] sm:$0xff] }
0x1406   :  { %4219 = vrcp.f32 %v2148_v19  ;;  %v2160_v35 = vand.u32 2147483648, %v2148_v19  ;;  %vm2154_vm4 = vweird.f32 %v2148_v19  ;;  %v2158_v63 = vand.u32 2147483647, %v2148_v19 }
0x1407   :  { %4221 = vpow2.f32 %v3787_v53  ;;  %v5198_v53 = vld [vmem:[%s5681_s6] sm:$0xff] }
0x1408   :  { %v5152_v9 = vpop.f32.mrf.mxu2  ;;  %v2161_v31 = vor.u32 1.1754944e-38, %v2160_v35  ;;  %vm2159_vm6 = vcmp.eq.f32.partialorder %v2158_v63, 8.507059e+37 }
0x140a   :  { %v2409_v30 = vpop.f32.mrf.mxu3 }
0x140b   :  { %v3958_v30 = vld [vmem:[%s5680_s5] sm:$0xff] }
0x140c   :  { %v4220_v54 = vpop.eup %4219 }
0x140d   :  { %v2150_v57 = vmul.f32 %v4220_v54, %v2148_v19  ;;  %v4222_v60 = vpop.eup %4221  ;;  %vm2155_vm3 = vweird.f32 %v4220_v54  ;;  %v5190_v19 = vld [vmem:[%s5681_s6 + $0x8] sm:$0xff] }
0x140e   :  { %v2185_v26 = vadd.f32 1.0, %v4222_v60  ;;  %vm2156_vm5 = vmor %vm2154_vm4, %vm2155_vm3 }
0x140f   :  { %v2151_v13 = vsub.f32 1.0, %v2150_v57  ;;  %v2672_v57 = vshrl.u32 %v4706_v27, 16 }
0x1410   :  { %v2370_v52 = vpop.f32.mrf.mxu2  ;;  %4223 = vrcp.f32 %v2185_v26  ;;  %v2197_v20 = vand.u32 2147483648, %v2185_v26  ;;  %vm2191_vm8 = vweird.f32 %v2185_v26  ;;  %v2195_v32 = vand.u32 2147483647, %v2185_v26 }
0x1411   :  { %v2152_v28 = vmul.f32 %v4220_v54, %v2151_v13  ;;  %v3961_v52 = vld [vmem:[%s5684_s9 + $0x8] sm:$0xff] }
0x1412   :  { %v2198_v38 = vor.u32 1.1754944e-38, %v2197_v20  ;;  %vm2196_vm10 = vcmp.eq.f32.partialorder %v2195_v32, 8.507059e+37 }
0x1413   :  { %v2153_v36 = vadd.f32 %v4220_v54, %v2152_v28 }
0x1415   :  { %v2157_v2 = vsel %vm2156_vm5, %v4220_v54, %v2153_v36  ;;  %v2674_v54 = vshll.u32 %v4706_v27, 16  ;;  %v2372_v36 = vadd.f32 %v5152_v9, %v4919_v56  ;;  %v2411_v9 = vadd.f32 %v5149_v37, %v4913_v62 }
0x1416   :  { %v4224_v0 = vpop.eup %4223  ;;  %v2162_v12 = vsel %vm2159_vm6, %v2161_v31, %v2157_v2 }
0x1417   :  { %v2187_v5 = vmul.f32 %v4224_v0, %v2185_v26  ;;  %vm2192_vm7 = vweird.f32 %v4224_v0  ;;  %v2165_v34 = vmul.f32 %v2162_v12, %v5090_v25  ;;  %v3959_v25 = vld [vmem:[%s5680_s5 + $0x8] sm:$0xff]  ;;  %v2676_v60 = vrot.slane %v2674_v54, 1  ;;  %v5214_v26 = vld [vmem:[%s5685_s10] sm:$0xff] }
0x1418   :  { %vm2193_vm9 = vmor %vm2191_vm8, %vm2192_vm7 }
0x1419   :  { %v2188_v43 = vsub.f32 1.0, %v2187_v5  ;;  %v2677_v13 = vor.u32 %v2676_v60, %v2672_v57 }
0x141b   :  { %v2189_v16 = vmul.f32 %v4224_v0, %v2188_v43 }
0x141d   :  { %v2190_v49 = vadd.f32 %v4224_v0, %v2189_v16 }
0x141f   :  { %v2194_v29 = vsel %vm2193_vm9, %v4224_v0, %v2190_v49 }
0x1420   :  { %v2199_v40 = vsel %vm2196_vm10, %v2198_v38, %v2194_v29 }
0x1421   :  { %v2202_v42 = vmul.f32 %v2199_v40, %v5095_v39 }
0x145c   :  { %v2168_v6 = vpop.permute.xlu2 %2167 }
0x145d   :  { %v2170_v15 = vmul.f32 %v2168_v6, %v2162_v12 }
0x145f   :  { %2172 = vrot.lane.b32.xlu1 %v2170_v15, %s4382_s7 }
0x146e   :  { %v2205_v45 = vpop.permute.xlu0 %2204 }
0x146f   :  { %v2207_v47 = vmul.f32 %v2205_v45, %v2199_v40 }
0x1471   :  { %2209 = vrot.lane.b32.xlu2 %v2207_v47, %s4382_s7 }
0x14cb   :  { %v2210_v18 = vpop.permute.xlu2 %2209 }
0x14cc   :  { %v5157_v8 = vadd.f32 %v2210_v18, %v2202_v42 }
0x14ce   :  { %4225 = vtanh.f32 %v5157_v8 }
0x14d1   :  { %v2173_v4 = vpop.permute.xlu1 %2172 }
0x14d2   :  { %v5161_v10 = vadd.f32 %v2173_v4, %v2165_v34 }
0x14d4   :  { %v4226_v55 = vpop.eup %4225  ;;  %4227 = vtanh.f32 %v5161_v10 }
0x14d5   :  { %2215 = vrot.lane.b32.xlu1 %v4226_v55, %s4381_s24 }
0x14da   :  { %v4228_v24 = vpop.eup %4227 }
0x14db   :  { %2178 = vrot.lane.b32.xlu0 %v4228_v24, %s4381_s24 }
0x1547   :  { %v2216_v50 = vpop.permute.xlu1 %2215 }
0x1548   :  { %v2218_v39 = vmul.f32 %v2216_v50, %v2199_v40 }
0x154a   :  { %v2239_v7 = vpack.c.bf16 %v2218_v39, %v2218_v39 }
0x154c   :  { %2241 = vrot.lane.b32.xlu0 %v2239_v7, %s4382_s7 }
0x154d   :  { %v2179_v21 = vpop.permute.xlu0 %2178 }
0x154e   :  { %v2181_v59 = vmul.f32 %v2179_v21, %v2162_v12 }
0x1550   :  { %v2219_v51 = vpack.c.bf16 %v2181_v59, %v2181_v59 }
0x1552   :  { %2221 = vrot.lane.b32.xlu2 %v2219_v51, %s4382_s7 }
0x15ac   :  { %v2222_v14 = vpop.permute.xlu2 %2221 }
0x15ad   :  { %3788 = vmatmul.msk.bf16.vlgmr.msrb.gmra.mxu0 %vm184_vm0, %v2222_v14 }
0x15ae   :  { %2660 = vmatpush.bf16.msrb.mxu0 %v3959_v25 }
0x15b2   :  { %2661 = vmatpush.bf16.msrb.mxu0 %v3958_v30 }
0x15bd   :  { %3814 = vmatmul.msk.bf16.vlgmr.msra.gmra.mxu0 %vm184_vm0, %v2222_v14 }
0x15be   :  { %v2242_v44 = vpop.permute.xlu0 %2241  ;;  %2822 = vmatpush.bf16.msra.mxu0 %v4937_v61 }
0x15bf   :  { %3789 = vmatmul.msk.bf16.vlgmr.msrb.gmra.mxu1 %vm184_vm0, %v2242_v44 }
0x15c0   :  { %2699 = vmatpush.bf16.msrb.mxu1 %v3961_v52 }
0x15c2   :  { %2823 = vmatpush.bf16.msra.mxu0 %v4943_v41 }
0x15c4   :  { %2700 = vmatpush.bf16.msrb.mxu1 %v3960_v48 }
0x15cd   :  { %3834 = vmatmul.msk.bf16.vlgmr.msrb.gmra.mxu0 %vm184_vm0, %v4706_v27 }
0x15ce   :  { %3008 = vmatpush.bf16.msrb.mxu0 %v5190_v19 }
0x15cf   :  { %3815 = vmatmul.msk.bf16.vlgmr.msra.gmra.mxu1 %vm184_vm0, %v2242_v44 }
0x15d0   :  { %2842 = vmatpush.bf16.msra.mxu1 %v4937_v61  ;;  %v5208_v61 = vld [vmem:[%s5685_s10 + $0x8] sm:$0xff] }
0x15d2   :  { %3009 = vmatpush.bf16.msrb.mxu0 %v5198_v53 }
0x15d4   :  { %2843 = vmatpush.bf16.msra.mxu1 %v4943_v41 }
0x15df   :  { %3843 = vmatmul.msk.bf16.vlgmr.msrb.gmra.mxu1 %vm184_vm0, %v2677_v13 }
0x15e0   :  { %3022 = vmatpush.bf16.msrb.mxu1 %v5208_v61 }
0x15e4   :  { %3023 = vmatpush.bf16.msrb.mxu1 %v5214_v26 }
0x162a   :  { %v2235_v41 = vpop.f32.mrf.mxu0 }
0x162b   :  { %v5218_v27 = vadd.f32 %v4994_v23, %v2235_v41 }
0x162d   :  { %3790 = vst [vmem:[%s5693_s18 + $0xc] sm:$0x7] %v5218_v27 }
0x1632   :  { %v2237_v28 = vpop.f32.mrf.mxu0 }
0x163a   :  { %v2421_v35 = vpop.f32.mrf.mxu0 }
0x163b   :  { %v2425_v63 = vadd.f32 %v2421_v35, %v2372_v36 }
0x163c   :  { %v2255_v0 = vpop.f32.mrf.mxu1 }
0x163d   :  { %4229 = vtanh.f32 %v2425_v63  ;;  %v5227_v2 = vadd.f32 %v4994_v23, %v2255_v0  ;;  %v3816_v40 = vmul.f32 -1.442695, %v2425_v63 }
0x163f   :  { %3791 = vst [vmem:[%s5694_s19 + $0xc] sm:$0x7] %v5227_v2 }
0x1642   :  { %v2423_v31 = vpop.f32.mrf.mxu0 }
0x1643   :  { %v4230_v5 = vpop.eup %4229 }
0x1644   :  { %2462 = vrot.lane.b32.xlu1 %v4230_v5, %s4381_s24  ;;  %v2257_v6 = vpop.f32.mrf.mxu1 }
0x164a   :  { %v5234_v12 = vpop.f32.mrf.mxu0 }
0x164c   :  { %v2435_v15 = vpop.f32.mrf.mxu1 }
0x164d   :  { %v2439_v43 = vadd.f32 %v2435_v15, %v2411_v9 }
0x164f   :  { %4231 = vtanh.f32 %v2439_v43  ;;  %v3817_v38 = vmul.f32 -1.442695, %v2439_v43 }
0x1651   :  { %4233 = vpow2.f32 %v3817_v38 }
0x1652   :  { %v2665_v16 = vpop.f32.mrf.mxu0  ;;  %4235 = vpow2.f32 %v3816_v40  ;;  %v3964_v40 = vld [vmem:[%s5684_s9] sm:$0xff] }
0x1654   :  { %v2437_v49 = vpop.f32.mrf.mxu1 }
0x1655   :  { %v4232_v20 = vpop.eup %4231 }
0x1656   :  { %2499 = vrot.lane.b32.xlu2 %v4232_v20, %s4381_s24 }
0x1657   :  { %v4234_v45 = vpop.eup %4233 }
0x1658   :  { %v2480_v47 = vadd.f32 1.0, %v4234_v45  ;;  %v4236_v42 = vpop.eup %4235  ;;  %v3963_v45 = vld [vmem:[%s5680_s5 + $0x8] sm:$0xff] }
0x1659   :  { %v2443_v37 = vadd.f32 1.0, %v4236_v42  ;;  %v3962_v42 = vld [vmem:[%s5680_s5] sm:$0xff] }
0x165a   :  { %4237 = vrcp.f32 %v2480_v47  ;;  %v2492_v21 = vand.u32 2147483648, %v2480_v47  ;;  %vm2486_vm12 = vweird.f32 %v2480_v47  ;;  %v2490_v59 = vand.u32 2147483647, %v2480_v47 }
0x165b   :  { %4239 = vrcp.f32 %v2443_v37  ;;  %v2455_v48 = vand.u32 2147483648, %v2443_v37  ;;  %vm2449_vm1 = vweird.f32 %v2443_v37  ;;  %v2453_v57 = vand.u32 2147483647, %v2443_v37 }
0x165c   :  { %v5239_v32 = vpop.f32.mrf.mxu1  ;;  %v2493_v14 = vor.u32 1.1754944e-38, %v2492_v21  ;;  %vm2491_vm14 = vcmp.eq.f32.partialorder %v2490_v59, 8.507059e+37  ;;  %v2667_v59 = vadd.f32 %v5234_v12, %v4919_v56 }
0x165d   :  { %v2456_v13 = vor.u32 1.1754944e-38, %v2455_v48  ;;  %vm2454_vm3 = vcmp.eq.f32.partialorder %v2453_v57, 8.507059e+37 }
0x1660   :  { %v4238_v18 = vpop.eup %4237 }
0x1661   :  { %v2482_v34 = vmul.f32 %v4238_v18, %v2480_v47  ;;  %v4240_v4 = vpop.eup %4239  ;;  %vm2487_vm11 = vweird.f32 %v4238_v18 }
0x1662   :  { %v2445_v24 = vmul.f32 %v4240_v4, %v2443_v37  ;;  %vm2488_vm13 = vmor %vm2486_vm12, %vm2487_vm11  ;;  %vm2450_vm15 = vweird.f32 %v4240_v4  ;;  %v5273_v37 = vld [vmem:[%s5687_s12 + $0x8] sm:$0xff] }
0x1663   :  { %v2483_v55 = vsub.f32 1.0, %v2482_v34  ;;  %vm2451_vm2 = vmor %vm2449_vm1, %vm2450_vm15  ;;  %v5280_v34 = vld [vmem:[%s5687_s12] sm:$0xff] }
0x1664   :  { %v2704_v29 = vpop.f32.mrf.mxu1  ;;  %v2446_v39 = vsub.f32 1.0, %v2445_v24 }
0x1665   :  { %v2484_v50 = vmul.f32 %v4238_v18, %v2483_v55 }
0x1666   :  { %v2447_v51 = vmul.f32 %v4240_v4, %v2446_v39 }
0x1667   :  { %v2485_v7 = vadd.f32 %v4238_v18, %v2484_v50 }
0x1668   :  { %v2448_v30 = vadd.f32 %v4240_v4, %v2447_v51 }
0x1669   :  { %v2489_v25 = vsel %vm2488_vm13, %v4238_v18, %v2485_v7  ;;  %v2969_v18 = vshll.u32 %v4675_v22, 16 }
0x166a   :  { %v2494_v44 = vsel %vm2491_vm14, %v2493_v14, %v2489_v25  ;;  %v2452_v60 = vsel %vm2451_vm2, %v4240_v4, %v2448_v30  ;;  %v2967_v4 = vshrl.u32 %v4675_v22, 16  ;;  %vm1392_vm14 = vcmask 1042432  }
0x166b   :  { %v2457_v28 = vsel %vm2454_vm3, %v2456_v13, %v2452_v60  ;;  %v2497_v35 = vmul.f32 %v2494_v44, %v5157_v8  ;;  %v2971_v55 = vrot.slane %v2969_v18, 1 }
0x166c   :  { %v2460_v31 = vmul.f32 %v2457_v28, %v5161_v10  ;;  %v3965_v10 = vld [vmem:[%s5684_s9 + $0x8] sm:$0xff] }
0x166d   :  { %v2972_v24 = vor.u32 %v2971_v55, %v2967_v4 }
0x16b0   :  { %v2500_v52 = vpop.permute.xlu2 %2499 }
0x16b1   :  { %v2502_v54 = vmul.f32 %v2500_v52, %v2494_v44 }
0x16b3   :  { %2504 = vrot.lane.b32.xlu1 %v2502_v54, %s4382_s7 }
0x16b6   :  { %v2463_v41 = vpop.permute.xlu1 %2462 }
0x16b7   :  { %v2465_v36 = vmul.f32 %v2463_v41, %v2457_v28 }
0x16b9   :  { %2467 = vrot.lane.b32.xlu0 %v2465_v36, %s4382_s7 }
0x1725   :  { %v2505_v63 = vpop.permute.xlu1 %2504 }
0x1726   :  { %v5244_v0 = vadd.f32 %v2505_v63, %v2497_v35 }
0x1728   :  { %4241 = vtanh.f32 %v5244_v0 }
0x172b   :  { %v2468_v5 = vpop.permute.xlu0 %2467 }
0x172c   :  { %v5248_v6 = vadd.f32 %v2468_v5, %v2460_v31 }
0x172e   :  { %v4242_v9 = vpop.eup %4241  ;;  %4243 = vtanh.f32 %v5248_v6 }
0x172f   :  { %2510 = vrot.lane.b32.xlu0 %v4242_v9, %s4381_s24 }
0x1734   :  { %v4244_v15 = vpop.eup %4243 }
0x1735   :  { %2473 = vrot.lane.b32.xlu2 %v4244_v15, %s4381_s24 }
0x178f   :  { %v2474_v43 = vpop.permute.xlu2 %2473 }
0x1790   :  { %v2476_v8 = vmul.f32 %v2474_v43, %v2457_v28 }
0x1792   :  { %v2514_v16 = vpack.c.bf16 %v2476_v8, %v2476_v8 }
0x1794   :  { %2516 = vrot.lane.b32.xlu1 %v2514_v16, %s4382_s7 }
0x17a1   :  { %v2511_v49 = vpop.permute.xlu0 %2510 }
0x17a2   :  { %v2513_v20 = vmul.f32 %v2511_v49, %v2494_v44 }
0x17a4   :  { %v2534_v29 = vpack.c.bf16 %v2513_v20, %v2513_v20 }
0x17a6   :  { %2536 = vrot.lane.b32.xlu2 %v2534_v29, %s4382_s7 }
0x1800   :  { %v2537_v38 = vpop.permute.xlu2 %2536 }
0x1801   :  { %3819 = vmatmul.msk.bf16.vlgmr.msrb.gmra.mxu3 %vm184_vm0, %v2537_v38 }
0x1802   :  { %2994 = vmatpush.bf16.msrb.mxu3 %v3965_v10 }
0x1806   :  { %v2517_v47 = vpop.permute.xlu1 %2516  ;;  %2995 = vmatpush.bf16.msrb.mxu3 %v3964_v40 }
0x1807   :  { %3818 = vmatmul.msk.bf16.vlgmr.msrb.gmra.mxu2 %vm184_vm0, %v2517_v47 }
0x1808   :  { %2955 = vmatpush.bf16.msrb.mxu2 %v3963_v45 }
0x180c   :  { %2956 = vmatpush.bf16.msrb.mxu2 %v3962_v42 }
0x1811   :  { %3845 = vmatmul.msk.bf16.vlgmr.msra.gmra.mxu3 %vm184_vm0, %v2537_v38 }
0x1812   :  { %3137 = vmatpush.bf16.msra.mxu3 %v5273_v37 }
0x1816   :  { %3138 = vmatpush.bf16.msra.mxu3 %v5280_v34 }
0x1817   :  { %3844 = vmatmul.msk.bf16.vlgmr.msra.gmra.mxu2 %vm184_vm0, %v2517_v47 }
0x1818   :  { %3117 = vmatpush.bf16.msra.mxu2 %v5273_v37 }
0x181c   :  { %3118 = vmatpush.bf16.msra.mxu2 %v5280_v34 }
0x1821   :  { %3873 = vmatmul.msk.bf16.vlgmr.msrb.gmra.mxu3 %vm184_vm0, %v2972_v24 }
0x1822   :  { %3317 = vmatpush.bf16.msrb.mxu3 %v5208_v61 }
0x1826   :  { %3318 = vmatpush.bf16.msrb.mxu3 %v5214_v26 }
0x1827   :  { %3864 = vmatmul.msk.bf16.vlgmr.msrb.gmra.mxu2 %vm184_vm0, %v4675_v22 }
0x1828   :  { %3303 = vmatpush.bf16.msrb.mxu2 %v5190_v19  ;;  %v2706_v19 = vadd.f32 %v5239_v32, %v4913_v62 }
0x182c   :  { %3304 = vmatpush.bf16.msrb.mxu2 %v5198_v53 }
0x1884   :  { %v2550_v50 = vpop.f32.mrf.mxu3 }
0x1885   :  { %v5295_v39 = vadd.f32 %v4994_v23, %v2550_v50 }
0x1887   :  { %3821 = vst [vmem:[%s5694_s19 + $0x10] sm:$0x7] %v5295_v39 }
0x188a   :  { %v2530_v7 = vpop.f32.mrf.mxu2 }
0x188b   :  { %v5302_v61 = vadd.f32 %v4994_v23, %v2530_v7 }
0x188c   :  { %v2552_v26 = vpop.f32.mrf.mxu3 }
0x188d   :  { %3820 = vst [vmem:[%s5693_s18 + $0x10] sm:$0x7] %v5302_v61 }
0x1892   :  { %v2532_v22 = vpop.f32.mrf.mxu2 }
0x1894   :  { %v2730_v53 = vpop.f32.mrf.mxu3 }
0x1895   :  { %v2734_v21 = vadd.f32 %v2730_v53, %v2706_v19 }
0x1897   :  { %4245 = vtanh.f32 %v2734_v21  ;;  %v3847_v57 = vmul.f32 -1.442695, %v2734_v21 }
0x189a   :  { %v2716_v51 = vpop.f32.mrf.mxu2 }
0x189b   :  { %v2720_v25 = vadd.f32 %v2716_v51, %v2667_v59  ;;  %v5332_v51 = vld [vmem:[%s5691_s16] sm:$0x7] }
0x189c   :  { %v2732_v23 = vpop.f32.mrf.mxu3  ;;  %vm1379_vm12 = vcmp.gt.s32.totalorder %v5332_v51, 0  ;;  %vm1673_vm15 = vcmp.gt.s32.totalorder %v5332_v51, 1 }
0x189d   :  { %v4246_v14 = vpop.eup %4245  ;;  %4247 = vtanh.f32 %v2720_v25  ;;  %v3846_v12 = vmul.f32 -1.442695, %v2720_v25  ;;  %v4383_v25 = vmov 0.0  }
0x189e   :  { %2794 = vrot.lane.b32.xlu1 %v4246_v14, %s4381_s24  ;;  %4249 = vpow2.f32 %v3847_v57  ;;  %v3704_v23 = vsel %vm1379_vm12, 1.0, %v4383_v25 }
0x189f   :  { %4251 = vpow2.f32 %v3846_v12 }
0x18a2   :  { %v2718_v30 = vpop.f32.mrf.mxu2 }
0x18a3   :  { %v4248_v52 = vpop.eup %4247 }
0x18a4   :  { %2757 = vrot.lane.b32.xlu0 %v4248_v52, %s4381_s24  ;;  %v5314_v44 = vpop.f32.mrf.mxu3  ;;  %v4250_v60 = vpop.eup %4249  ;;  %v1385_v52 = vld [vmem:[%s5689_s14] sm:$0x7] }
0x18a5   :  { %v2775_v13 = vadd.f32 1.0, %v4250_v60  ;;  %v4252_v41 = vpop.eup %4251 }
0x18a6   :  { %v2738_v28 = vadd.f32 1.0, %v4252_v41 }
0x18a7   :  { %4253 = vrcp.f32 %v2775_v13  ;;  %v2787_v8 = vand.u32 2147483648, %v2775_v13  ;;  %vm2781_vm5 = vweird.f32 %v2775_v13  ;;  %v2785_v16 = vand.u32 2147483647, %v2775_v13 }
0x18a8   :  { %4255 = vrcp.f32 %v2738_v28  ;;  %v2750_v45 = vand.u32 2147483648, %v2738_v28  ;;  %vm2744_vm9 = vweird.f32 %v2738_v28  ;;  %v2748_v42 = vand.u32 2147483647, %v2738_v28 }
0x18a9   :  { %v2788_v29 = vor.u32 1.1754944e-38, %v2787_v8  ;;  %vm2786_vm7 = vcmp.eq.f32.partialorder %v2785_v16, 8.507059e+37  ;;  %v3966_v8 = vld [vmem:[%s5680_s5] sm:$0xff]  ;;  %v3264_v16 = vshll.u32 %v4645_v17, 16 }
0x18aa   :  { %v5316_v32 = vpop.f32.mrf.mxu2  ;;  %v2751_v4 = vor.u32 1.1754944e-38, %v2750_v45  ;;  %vm2749_vm11 = vcmp.eq.f32.partialorder %v2748_v42, 8.507059e+37 }
0x18ac   :  { %v2999_v48 = vpop.f32.mrf.mxu3 }
0x18ad   :  { %v4254_v36 = vpop.eup %4253 }
0x18ae   :  { %v2777_v35 = vmul.f32 %v4254_v36, %v2775_v13  ;;  %v4256_v63 = vpop.eup %4255  ;;  %vm2782_vm4 = vweird.f32 %v4254_v36 }
0x18af   :  { %v2740_v5 = vmul.f32 %v4256_v63, %v2738_v28  ;;  %vm2783_vm6 = vmor %vm2781_vm5, %vm2782_vm4  ;;  %vm2745_vm8 = vweird.f32 %v4256_v63 }
0x18b0   :  { %v2778_v31 = vsub.f32 1.0, %v2777_v35  ;;  %vm2746_vm10 = vmor %vm2744_vm9, %vm2745_vm8 }
0x18b1   :  { %v2741_v15 = vsub.f32 1.0, %v2740_v5 }
0x18b2   :  { %v2960_v54 = vpop.f32.mrf.mxu2  ;;  %v2779_v9 = vmul.f32 %v4254_v36, %v2778_v31 }
0x18b3   :  { %v2742_v49 = vmul.f32 %v4256_v63, %v2741_v15 }
0x18b4   :  { %v2780_v43 = vadd.f32 %v4254_v36, %v2779_v9  ;;  %v3969_v9 = vld [vmem:[%s5684_s9 + $0x8] sm:$0xff] }
0x18b5   :  { %v2743_v10 = vadd.f32 %v4256_v63, %v2742_v49  ;;  %v3262_v49 = vshrl.u32 %v4645_v17, 16 }
0x18b6   :  { %v2784_v20 = vsel %vm2783_vm6, %v4254_v36, %v2780_v43  ;;  %v3967_v43 = vld [vmem:[%s5680_s5 + $0x8] sm:$0xff] }
0x18b7   :  { %v2789_v40 = vsel %vm2786_vm7, %v2788_v29, %v2784_v20  ;;  %v2747_v18 = vsel %vm2746_vm10, %v4256_v63, %v2743_v10  ;;  %v3266_v20 = vrot.slane %v3264_v16, 1 }
0x18b8   :  { %v2752_v55 = vsel %vm2749_vm11, %v2751_v4, %v2747_v18  ;;  %v2792_v53 = vmul.f32 %v2789_v40, %v5244_v0 }
0x18b9   :  { %v2755_v7 = vmul.f32 %v2752_v55, %v5248_v6  ;;  %v5337_v6 = vld [vmem:[%s5692_s17] sm:$0x7]  ;;  %v3267_v29 = vor.u32 %v3266_v20, %v3262_v49 }
0x18ba   :  { %vm1382_vm13 = vcmp.gt.s32.totalorder %v5337_v6, 0  ;;  %vm1676_vm1 = vcmp.gt.s32.totalorder %v5337_v6, 1 }
0x18bb   :  { %v3705_v14 = vsel %vm1382_vm13, 1.0, %v4383_v25  ;;  %vm1968_vm13 = vcmp.gt.s32.totalorder %v5332_v51, 2 }
0x18bc   :  { %v4008_v30 = vpack.i.bf16 %v3705_v14, %v3704_v23  ;;  %v3001_v23 = vadd.f32 %v5314_v44, %v4913_v62 }
0x1910   :  { %v2795_v38 = vpop.permute.xlu1 %2794 }
0x1911   :  { %v2797_v47 = vmul.f32 %v2795_v38, %v2789_v40 }
0x1913   :  { %2799 = vrot.lane.b32.xlu0 %v2797_v47, %s4382_s7 }
0x1916   :  { %v2758_v24 = vpop.permute.xlu0 %2757 }
0x1917   :  { %v2760_v50 = vmul.f32 %v2758_v24, %v2752_v55 }
0x1919   :  { %2762 = vrot.lane.b32.xlu2 %v2760_v50, %s4382_s7 }
0x1973   :  { %v2763_v26 = vpop.permute.xlu2 %2762 }
0x1974   :  { %v5321_v22 = vadd.f32 %v2763_v26, %v2755_v7  ;;  %v5390_v7 = vld [vmem:[%s5688_s13] ss:$0 sm:$0xff] }
0x1976   :  { %4257 = vtanh.f32 %v5321_v22 }
0x197c   :  { %v4258_v19 = vpop.eup %4257 }
0x197d   :  { %2768 = vrot.lane.b32.xlu1 %v4258_v19, %s4381_s24 }
0x1985   :  { %v2800_v21 = vpop.permute.xlu0 %2799 }
0x1986   :  { %v5326_v59 = vadd.f32 %v2800_v21, %v2792_v53 }
0x1988   :  { %4259 = vtanh.f32 %v5326_v59 }
0x198e   :  { %v4260_v0 = vpop.eup %4259 }
0x198f   :  { %2805 = vrot.lane.b32.xlu2 %v4260_v0, %s4381_s24 }
0x1997   :  { %4009 = vperm.xlu2 %4007, %v4008_v30  }
0x199f   :  { %1406 = vperm.xlu2 %4007, %v1385_v52   ;;  %v2962_v52 = vadd.f32 %v5316_v32, %v4919_v56 }
0x19e9   :  { %v2806_v48 = vpop.permute.xlu2 %2805 }
0x19ea   :  { %v2808_v54 = vmul.f32 %v2806_v48, %v2789_v40 }
0x19ec   :  { %v2829_v57 = vpack.c.bf16 %v2808_v54, %v2808_v54 }
0x19ee   :  { %2831 = vrot.lane.b32.xlu1 %v2829_v57, %s4382_s7 }
0x19ef   :  { %v2769_v12 = vpop.permute.xlu1 %2768 }
0x19f0   :  { %v2771_v60 = vmul.f32 %v2769_v12, %v2752_v55  ;;  %v3733_v55 = vsel %vm1676_vm1, 1.0, %v4383_v25 }
0x19f1   :  { %v4010_v41 = vpop.permute.xlu2 %4009 }
0x19f2   :  { %v2809_v13 = vpack.c.bf16 %v2771_v60, %v2771_v60  ;;  %v4011_v28 = vunpack.i.l.bf16 %v4010_v41  ;;  %v4012_v35 = vunpack.i.h.bf16 %v4010_v41 }
0x19f4   :  { %2811 = vrot.lane.b32.xlu0 %v2809_v13, %s4382_s7  ;;  %v1391_v36 = vmul.f32 %v4011_v28, %v4997_v33  ;;  %v1428_v31 = vmul.f32 %v4012_v35, %v5006_v46  ;;  %v3968_v33 = vld [vmem:[%s5684_s9] sm:$0xff]  ;;  %v1077_v35 = vlaneseq }
0x19f6   :  { %v1393_v63 = vsel %vm1392_vm14, %v1391_v36, -inf  ;;  %v1429_v5 = vsel %vm1392_vm14, %v1428_v31, -inf }
0x1a1e   :  { %1394 = vmax.xlane.f32.xlu0 %v1393_v63  ;;  %v5416_v63 = vand.u32 127, %v1077_v35 }
0x1a26   :  { %1430 = vmax.xlane.f32.xlu0 %v1429_v5 }
0x1a60   :  { %v2832_v15 = vpop.permute.xlu1 %2831 }
0x1a61   :  { %3849 = vmatmul.msk.bf16.vlgmr.msra.gmra.mxu1 %vm184_vm0, %v2832_v15 }
0x1a62   :  { %3289 = vmatpush.bf16.msra.mxu1 %v3969_v9 }
0x1a66   :  { %v2812_v46 = vpop.permute.xlu0 %2811  ;;  %3290 = vmatpush.bf16.msra.mxu1 %v3968_v33 }
0x1a67   :  { %3848 = vmatmul.msk.bf16.vlgmr.msra.gmra.mxu0 %vm184_vm0, %v2812_v46 }
0x1a68   :  { %3250 = vmatpush.bf16.msra.mxu0 %v3967_v43 }
0x1a6c   :  { %3251 = vmatpush.bf16.msra.mxu0 %v3966_v8  ;;  %v1422_v8 = vld [vmem:[%s5690_s15] sm:$0x7] }
0x1a71   :  { %3875 = vmatmul.msk.bf16.vlgmr.msrb.gmra.mxu1 %vm184_vm0, %v2832_v15 }
0x1a72   :  { %3432 = vmatpush.bf16.msrb.mxu1 %v5273_v37 }
0x1a76   :  { %3433 = vmatpush.bf16.msrb.mxu1 %v5280_v34 }
0x1a77   :  { %3874 = vmatmul.msk.bf16.vlgmr.msrb.gmra.mxu0 %vm184_vm0, %v2812_v46 }
0x1a78   :  { %3412 = vmatpush.bf16.msrb.mxu0 %v5273_v37 }
0x1a7c   :  { %3413 = vmatpush.bf16.msrb.mxu0 %v5280_v34 }
0x1a81   :  { %3903 = vmatmul.msk.bf16.vlgmr.msra.gmra.mxu1 %vm184_vm0, %v3267_v29 }
0x1a87   :  { %3894 = vmatmul.msk.bf16.vlgmr.msra.gmra.mxu0 %vm184_vm0, %v4645_v17  ;;  %v3732_v17 = vsel %vm1673_vm15, 1.0, %v4383_v25  ;;  %vm1971_vm15 = vcmp.gt.s32.totalorder %v5337_v6, 2 }
0x1a88   :  { %v4014_v24 = vpack.i.bf16 %v3733_v55, %v3732_v17 }
0x1a91   :  { %v1395_v10 = vpop.xlane.xlu0 %1394 }
0x1a92   :  { %v1396_v38 = vsub.f32 %v1391_v36, %v1395_v10 }
0x1a94   :  { %v1397_v40 = vmul.f32 1.442695, %v1396_v38 }
0x1a96   :  { %4261 = vpow2.f32 %v1397_v40 }
0x1a99   :  { %v1431_v45 = vpop.xlane.xlu0 %1430 }
0x1a9a   :  { %v5378_v47 = vsub.f32 %v1428_v31, %v1431_v45  ;;  %v1407_v31 = vpop.permute.xlu2 %1406 }
0x1a9b   :  { %vm1408_vm2 = vcmp.eq.s32.totalorder %v5416_v63, %v1407_v31 }
0x1a9c   :  { %v4262_v42 = vpop.eup %4261  ;;  %v1433_v37 = vmul.f32 1.442695, %v5378_v47 }
0x1a9d   :  { %v1399_v18 = vsel %vm1392_vm14, %v4262_v42, 0.0 }
0x1a9e   :  { %4263 = vpow2.f32 %v1433_v37  ;;  %1400 = vadd.xlane.f32.xlu1 %v1399_v18 }
0x1aa4   :  { %v4264_v34 = vpop.eup %4263 }
0x1aa5   :  { %v1435_v4 = vsel %vm1392_vm14, %v4264_v34, 0.0 }
0x1aa6   :  { %1436 = vadd.xlane.f32.xlu1 %v1435_v4 }
0x1abf   :  { %4015 = vperm.xlu1 %4013, %v4014_v24  }
0x1ade   :  { %v2845_v50 = vpop.f32.mrf.mxu1 }
0x1adf   :  { %v5393_v26 = vadd.f32 %v5390_v7, %v2845_v50 }
0x1ae1   :  { %3851 = vst [vmem:[%s5694_s19 + $0x14] sm:$0x7] %v5393_v26 }
0x1ae4   :  { %v2825_v19 = vpop.f32.mrf.mxu0 }
0x1ae5   :  { %v5400_v53 = vadd.f32 %v5390_v7, %v2825_v19 }
0x1ae6   :  { %v2847_v21 = vpop.f32.mrf.mxu1 }
0x1ae7   :  { %3850 = vst [vmem:[%s5693_s18 + $0x14] sm:$0x7] %v5400_v53 }
0x1aec   :  { %v2827_v0 = vpop.f32.mrf.mxu0 }
0x1aee   :  { %v3025_v14 = vpop.f32.mrf.mxu1 }
0x1aef   :  { %v5408_v30 = vadd.f32 %v3025_v14, %v3001_v23 }
0x1af4   :  { %v3011_v48 = vpop.f32.mrf.mxu0 }
0x1af5   :  { %v3015_v54 = vadd.f32 %v3011_v48, %v2962_v52 }
0x1af6   :  { %v3027_v57 = vpop.f32.mrf.mxu1 }
0x1af7   :  { %v3876_v48 = vmul.f32 -1.442695, %v3015_v54  ;;  %v3877_v57 = vmul.f32 -1.442695, %v5408_v30 }
0x1afc   :  { %v3013_v12 = vpop.f32.mrf.mxu0 }
0x1afe   :  { %v5412_v60 = vpop.f32.mrf.mxu1 }
0x1b04   :  { %v5414_v13 = vpop.f32.mrf.mxu0 }
0x1b06   :  { %v3294_v41 = vpop.f32.mrf.mxu1 }
0x1b0c   :  { %v3255_v28 = vpop.f32.mrf.mxu0 }
0x1b11   :  { %v1401_v36 = vpop.xlane.xlu1 %1400 }
0x1b12   :  { %4265 = vlog2.f32 %v1401_v36 }
0x1b13   :  { %4267 = vtanh.f32 %v5408_v30 }
0x1b18   :  { %v4266_v44 = vpop.eup %4265 }
0x1b19   :  { %v1403_v5 = vmul.f32 0.6931472, %v4266_v44  ;;  %v1437_v33 = vpop.xlane.xlu1 %1436  ;;  %v4268_v10 = vpop.eup %4267 }
0x1b1a   :  { %4269 = vlog2.f32 %v1437_v33 }
0x1b1b   :  { %v1404_v9 = vsub.f32 %v1396_v38, %v1403_v5  ;;  %4271 = vtanh.f32 %v3015_v54 }
0x1b1d   :  { %v1409_v32 = vsel %vm1408_vm2, %v1404_v9, 0.0  ;;  %vm2263_vm2 = vcmp.gt.s32.totalorder %v5332_v51, 3 }
0x1b1e   :  { %v1410_v15 = vsel %vm1392_vm14, %v1409_v32, 0.0 }
0x1b1f   :  { %1411 = vadd.xlane.f32.xlu2 %v1410_v15 }
0x1b20   :  { %v4270_v45 = vpop.eup %4269 }
0x1b21   :  { %v1439_v18 = vmul.f32 0.6931472, %v4270_v45  ;;  %v4272_v21 = vpop.eup %4271 }
0x1b23   :  { %v1440_v17 = vsub.f32 %v5378_v47, %v1439_v18 }
0x1b31   :  { %v4016_v43 = vpop.permute.xlu1 %4015 }
0x1b32   :  { %v4017_v46 = vunpack.i.l.bf16 %v4016_v43  ;;  %v4018_v49 = vunpack.i.h.bf16 %v4016_v43 }
0x1b34   :  { %v1686_v16 = vmul.f32 %v4017_v46, %v5071_v3  ;;  %v5427_v29 = vmul.f32 %v4018_v49, %v5064_v58  ;;  %v3734_v3 = vld [vmem:[%s5689_s14 + $0x4] sm:$0x7] }
0x1b36   :  { %v1687_v20 = vsel %vm1392_vm14, %v1686_v16, -inf  ;;  %v1724_v38 = vsel %vm1392_vm14, %v5427_v29, -inf }
0x1b37   :  { %1442 = vperm.xlu2 %4007, %v1422_v8   ;;  %1688 = vmax.xlane.f32.xlu1 %v1687_v20 }
0x1b3f   :  { %3089 = vrot.lane.b32.xlu2 %v4268_v10, %s4381_s24  ;;  %1725 = vmax.xlane.f32.xlu1 %v1724_v38 }
0x1b47   :  { %1700 = vperm.xlu2 %4007, %v3734_v3  }
0x1b92   :  { %v1412_v40 = vpop.xlane.xlu2 %1411 }
0x1b93   :  { %v1413_v42 = vrot.slane %v1412_v40, 4 }
0x1b95   :  { %v1414_v37 = vadd.f32 %v1413_v42, %v1412_v40 }
0x1b97   :  { %v1415_v58 = vrot.slane %v1414_v37, 2 }
0x1b99   :  { %v1416_v34 = vadd.f32 %v1415_v58, %v1414_v37 }
0x1b9a   :  { %v1443_v4 = vpop.permute.xlu2 %1442 }
0x1b9b   :  { %vm1444_vm3 = vcmp.eq.s32.totalorder %v5416_v63, %v1443_v4  ;;  %v1417_v55 = vrot.slane %v1416_v34, 1 }
0x1b9c   :  { %v1445_v24 = vsel %vm1444_vm3, %v1440_v17, 0.0  ;;  %vm2266_vm3 = vcmp.gt.s32.totalorder %v5337_v6, 3 }
0x1b9d   :  { %v1446_v50 = vsel %vm1392_vm14, %v1445_v24, 0.0  ;;  %v1418_v19 = vadd.f32 %v1417_v55, %v1416_v34 }
0x1b9e   :  { %1447 = vadd.xlane.f32.xlu0 %v1446_v50 }
0x1b9f   :  { %3970 = vpush %v1418_v19 }
0x1ba2   :  { %v3090_v55 = vpop.permute.xlu2 %3089 }
0x1baa   :  { %v1689_v0 = vpop.xlane.xlu1 %1688 }
0x1bab   :  { %v5439_v23 = vsub.f32 %v1686_v16, %v1689_v0  ;;  %v1701_v0 = vpop.permute.xlu2 %1700 }
0x1bac   :  { %vm1702_vm12 = vcmp.eq.s32.totalorder %v5416_v63, %v1701_v0 }
0x1bad   :  { %v1691_v14 = vmul.f32 1.442695, %v5439_v23 }
0x1baf   :  { %4273 = vpow2.f32 %v1691_v14 }
0x1bb0   :  { %4275 = vpow2.f32 %v3876_v48 }
0x1bb1   :  { %4277 = vpow2.f32 %v3877_v57  ;;  %v3735_v57 = vld [vmem:[%s5690_s15 + $0x4] sm:$0x7] }
0x1bb2   :  { %3052 = vrot.lane.b32.xlu0 %v4272_v21, %s4381_s24 }
0x1bb5   :  { %v4274_v47 = vpop.eup %4273 }
0x1bb6   :  { %v1693_v52 = vsel %vm1392_vm14, %v4274_v47, 0.0  ;;  %v4276_v12 = vpop.eup %4275 }
0x1bb7   :  { %v3033_v41 = vadd.f32 1.0, %v4276_v12  ;;  %v4278_v28 = vpop.eup %4277  ;;  %v3762_v12 = vsel %vm1968_vm13, 1.0, %v4383_v25 }
0x1bb8   :  { %v3070_v36 = vadd.f32 1.0, %v4278_v28 }
0x1bb9   :  { %4279 = vrcp.f32 %v3033_v41  ;;  %v3045_v20 = vand.u32 2147483648, %v3033_v41  ;;  %vm3039_vm5 = vweird.f32 %v3033_v41  ;;  %v3043_v10 = vand.u32 2147483647, %v3033_v41 }
0x1bba   :  { %4281 = vrcp.f32 %v3070_v36  ;;  %v3082_v58 = vand.u32 2147483648, %v3070_v36  ;;  %vm3076_vm9 = vweird.f32 %v3070_v36  ;;  %v3080_v34 = vand.u32 2147483647, %v3070_v36 }
0x1bbb   :  { %v3046_v40 = vor.u32 1.1754944e-38, %v3045_v20  ;;  %vm3044_vm7 = vcmp.eq.f32.partialorder %v3043_v10, 8.507059e+37 }
0x1bbc   :  { %v3083_v17 = vor.u32 1.1754944e-38, %v3082_v58  ;;  %vm3081_vm11 = vcmp.eq.f32.partialorder %v3080_v34, 8.507059e+37 }
0x1bbf   :  { %v4280_v35 = vpop.eup %4279 }
0x1bc0   :  { %v3035_v31 = vmul.f32 %v4280_v35, %v3033_v41  ;;  %v4282_v15 = vpop.eup %4281  ;;  %vm3040_vm4 = vweird.f32 %v4280_v35  ;;  %v3763_v41 = vsel %vm1971_vm15, 1.0, %v4383_v25 }
0x1bc1   :  { %v3072_v54 = vmul.f32 %v4282_v15, %v3070_v36  ;;  %vm3041_vm6 = vmor %vm3039_vm5, %vm3040_vm4  ;;  %vm3077_vm8 = vweird.f32 %v4282_v15 }
0x1bc2   :  { %v3036_v32 = vsub.f32 1.0, %v3035_v31  ;;  %vm3078_vm10 = vmor %vm3076_vm9, %vm3077_vm8 }
0x1bc3   :  { %v3073_v16 = vsub.f32 1.0, %v3072_v54 }
0x1bc4   :  { %v3037_v46 = vmul.f32 %v4280_v35, %v3036_v32 }
0x1bc5   :  { %v3074_v38 = vmul.f32 %v4282_v15, %v3073_v16 }
0x1bc6   :  { %v3038_v49 = vadd.f32 %v4280_v35, %v3037_v46 }
0x1bc7   :  { %v3075_v37 = vadd.f32 %v4282_v15, %v3074_v38 }
0x1bc8   :  { %v3042_v3 = vsel %vm3041_vm6, %v4280_v35, %v3038_v49 }
0x1bc9   :  { %v5444_v45 = vsel %vm3044_vm7, %v3046_v40, %v3042_v3  ;;  %v3079_v4 = vsel %vm3078_vm10, %v4282_v15, %v3075_v37  ;;  %v1726_v15 = vpop.xlane.xlu1 %1725 }
0x1bca   :  { %v3084_v24 = vsel %vm3081_vm11, %v3083_v17, %v3079_v4  ;;  %v3050_v28 = vmul.f32 %v5444_v45, %v5321_v22  ;;  %v1727_v22 = vsub.f32 %v5427_v29, %v1726_v15 }
0x1bcb   :  { %v3092_v50 = vmul.f32 %v3090_v55, %v3084_v24 }
0x1bdc   :  { %1694 = vadd.xlane.f32.xlu0 %v1693_v52 }
0x1c11   :  { %v1448_v44 = vpop.xlane.xlu0 %1447 }
0x1c12   :  { %v1449_v5 = vrot.slane %v1448_v44, 4 }
0x1c14   :  { %v1450_v9 = vadd.f32 %v1449_v5, %v1448_v44  ;;  %v3087_v44 = vmul.f32 %v3084_v24, %v5326_v59 }
0x1c16   :  { %v1451_v33 = vrot.slane %v1450_v9, 2 }
0x1c18   :  { %v1452_v43 = vadd.f32 %v1451_v33, %v1450_v9  ;;  %v1728_v33 = vmul.f32 1.442695, %v1727_v22 }
0x1c1a   :  { %v1453_v8 = vrot.slane %v1452_v43, 1 }
0x1c1c   :  { %v1454_v30 = vadd.f32 %v1453_v8, %v1452_v43 }
0x1c1e   :  { %3972 = vpush %v1454_v30 }
0x1c24   :  { %v3053_v42 = vpop.permute.xlu0 %3052 }
0x1c25   :  { %v3055_v18 = vmul.f32 %v3053_v42, %v5444_v45 }
0x1c27   :  { %3057 = vrot.lane.b32.xlu2 %v3055_v18, %s4382_s7 }
0x1c2f   :  { %3094 = vrot.lane.b32.xlu2 %v3092_v50, %s4382_s7 }
0x1c4f   :  { %v1695_v19 = vpop.xlane.xlu0 %1694 }
0x1c50   :  { %4283 = vlog2.f32 %v1695_v19 }
0x1c56   :  { %v4284_v21 = vpop.eup %4283 }
0x1c57   :  { %v1697_v14 = vmul.f32 0.6931472, %v4284_v21 }
0x1c59   :  { %v1698_v47 = vsub.f32 %v5439_v23, %v1697_v14  ;;  %v4019_v23 = vpack.i.bf16 %v3763_v41, %v3762_v12  ;;  %v3793_v12 = vsel %vm2266_vm3, 1.0, %v4383_v25 }
0x1c5b   :  { %v1703_v52 = vsel %vm1702_vm12, %v1698_v47, 0.0 }
0x1c5c   :  { %v1704_v48 = vsel %vm1392_vm14, %v1703_v52, 0.0 }
0x1c5d   :  { %1705 = vadd.xlane.f32.xlu2 %v1704_v48  ;;  %v3764_v48 = vld [vmem:[%s5689_s14 + $0x8] sm:$0x7] }
0x1c75   :  { %1737 = vperm.xlu2 %4007, %v3735_v57   ;;  %v3792_v57 = vsel %vm2263_vm2, 1.0, %v4383_v25  ;;  %vm2561_vm2 = vcmp.gt.s32.totalorder %v5337_v6, 4 }
0x1c7d   :  { %4020 = vperm.xlu2 %4007, %v4019_v23   ;;  %v4025_v23 = vpack.i.bf16 %v3793_v12, %v3792_v57 }
0x1c81   :  { %v3058_v36 = vpop.permute.xlu2 %3057 }
0x1c82   :  { %v5461_v35 = vadd.f32 %v3058_v36, %v3050_v28 }
0x1c84   :  { %4285 = vtanh.f32 %v5461_v35 }
0x1c89   :  { %v3095_v31 = vpop.permute.xlu2 %3094 }
0x1c8a   :  { %v4286_v5 = vpop.eup %4285  ;;  %v5465_v9 = vadd.f32 %v3095_v31, %v3087_v44 }
0x1c8b   :  { %3063 = vrot.lane.b32.xlu0 %v4286_v5, %s4381_s24 }
0x1c8c   :  { %4287 = vtanh.f32 %v5465_v9 }
0x1c8d   :  { %4289 = vpow2.f32 %v1728_v33 }
0x1c92   :  { %v4288_v32 = vpop.eup %4287 }
0x1c93   :  { %3100 = vrot.lane.b32.xlu1 %v4288_v32, %s4381_s24  ;;  %v4290_v43 = vpop.eup %4289 }
0x1c94   :  { %v1730_v54 = vsel %vm1392_vm14, %v4290_v43, 0.0 }
0x1cb5   :  { %1731 = vadd.xlane.f32.xlu0 %v1730_v54 }
0x1cd0   :  { %v1706_v59 = vpop.xlane.xlu2 %1705 }
0x1cd1   :  { %v1707_v46 = vrot.slane %v1706_v59, 4 }
0x1cd3   :  { %v1708_v8 = vadd.f32 %v1707_v46, %v1706_v59 }
0x1cd5   :  { %v1709_v30 = vrot.slane %v1708_v8, 2 }
0x1cd7   :  { %v1710_v16 = vadd.f32 %v1709_v30, %v1708_v8 }
0x1cd8   :  { %v1738_v49 = vpop.permute.xlu2 %1737 }
0x1cd9   :  { %v1711_v20 = vrot.slane %v1710_v16, 1  ;;  %vm1739_vm1 = vcmp.eq.s32.totalorder %v5416_v63, %v1738_v49 }
0x1cdb   :  { %v1712_v10 = vadd.f32 %v1711_v20, %v1710_v16 }
0x1cdd   :  { %3974 = vpush %v1712_v10 }
0x1ce0   :  { %v5472_v38 = vpop.permute.xlu2 %4020 }
0x1ce1   :  { %v4022_v3 = vunpack.i.l.bf16 %v5472_v38  ;;  %v4023_v8 = vunpack.i.h.bf16 %v5472_v38 }
0x1ce3   :  { %v1981_v29 = vmul.f32 %v4022_v3, %v5138_v1  ;;  %v2018_v16 = vmul.f32 %v4023_v8, %v5131_v11  ;;  %v3257_v11 = vadd.f32 %v5414_v13, %v4919_v56 }
0x1ce5   :  { %v1982_v40 = vsel %vm1392_vm14, %v1981_v29, -inf  ;;  %v2019_v49 = vsel %vm1392_vm14, %v2018_v16, -inf }
0x1ce6   :  { %1983 = vmax.xlane.f32.xlu2 %v1982_v40 }
0x1cfd   :  { %v3064_v42 = vpop.permute.xlu0 %3063 }
0x1cfe   :  { %v3066_v37 = vmul.f32 %v3064_v42, %v5444_v45 }
0x1d00   :  { %v3104_v18 = vpack.c.bf16 %v3066_v37, %v3066_v37 }
0x1d02   :  { %3106 = vrot.lane.b32.xlu1 %v3104_v18, %s4382_s7  ;;  %v3765_v18 = vld [vmem:[%s5690_s15 + $0x8] sm:$0x7] }
0x1d05   :  { %v3101_v58 = vpop.permute.xlu1 %3100 }
0x1d06   :  { %v3103_v34 = vmul.f32 %v3101_v58, %v3084_v24  ;;  %v3296_v58 = vadd.f32 %v5412_v60, %v4913_v62 }
0x1d08   :  { %v3124_v4 = vpack.c.bf16 %v3103_v34, %v3103_v34 }
0x1d0a   :  { %3126 = vrot.lane.b32.xlu1 %v3124_v4, %s4382_s7 }
0x1d28   :  { %v1732_v17 = vpop.xlane.xlu0 %1731 }
0x1d29   :  { %4291 = vlog2.f32 %v1732_v17 }
0x1d2f   :  { %v4292_v55 = vpop.eup %4291 }
0x1d30   :  { %v1734_v50 = vmul.f32 0.6931472, %v4292_v55 }
0x1d32   :  { %v1735_v19 = vsub.f32 %v1727_v22, %v1734_v50 }
0x1d34   :  { %v1740_v1 = vsel %vm1739_vm1, %v1735_v19, 0.0  ;;  %vm2558_vm1 = vcmp.gt.s32.totalorder %v5332_v51, 4 }
0x1d35   :  { %v1741_v21 = vsel %vm1392_vm14, %v1740_v1, 0.0 }
0x1d36   :  { %1742 = vadd.xlane.f32.xlu1 %v1741_v21 }
0x1d59   :  { %v1984_v45 = vpop.xlane.xlu2 %1983 }
0x1d5a   :  { %v1985_v0 = vsub.f32 %v1981_v29, %v1984_v45 }
0x1d5c   :  { %v1986_v14 = vmul.f32 1.442695, %v1985_v0 }
0x1d5e   :  { %4293 = vpow2.f32 %v1986_v14 }
0x1d64   :  { %v4294_v47 = vpop.eup %4293 }
0x1d65   :  { %v1988_v24 = vsel %vm1392_vm14, %v4294_v47, 0.0 }
0x1d66   :  { %1989 = vadd.xlane.f32.xlu0 %v1988_v24 }
0x1d74   :  { %v3107_v52 = vpop.permute.xlu1 %3106 }
0x1d75   :  { %3878 = vmatmul.msk.bf16.vlgmr.msra.gmra.mxu2 %vm184_vm0, %v3107_v52 }
0x1d7a   :  { %1995 = vperm.xlu0 %4024, %v3764_v48  }
0x1d7c   :  { %v3127_v41 = vpop.permute.xlu1 %3126 }
0x1d7d   :  { %3879 = vmatmul.msk.bf16.vlgmr.msra.gmra.mxu3 %vm184_vm0, %v3127_v41 }
0x1d82   :  { %4026 = vperm.xlu0 %4024, %v4025_v23  }
0x1d85   :  { %3904 = vmatmul.msk.bf16.vlgmr.msrb.gmra.mxu2 %vm184_vm0, %v3107_v52 }
0x1d8d   :  { %3905 = vmatmul.msk.bf16.vlgmr.msrb.gmra.mxu3 %vm184_vm0, %v3127_v41 }
0x1da9   :  { %v1743_v28 = vpop.xlane.xlu1 %1742 }
0x1daa   :  { %v1744_v36 = vrot.slane %v1743_v28, 4 }
0x1dac   :  { %v1745_v44 = vadd.f32 %v1744_v36, %v1743_v28 }
0x1dae   :  { %v1746_v31 = vrot.slane %v1745_v44, 2 }
0x1db0   :  { %v1747_v5 = vadd.f32 %v1746_v31, %v1745_v44 }
0x1db2   :  { %v1748_v32 = vrot.slane %v1747_v5, 1 }
0x1db4   :  { %v1749_v15 = vadd.f32 %v1748_v32, %v1747_v5  ;;  %v3794_v5 = vld [vmem:[%s5689_s14 + $0xc] sm:$0x7] }
0x1db6   :  { %3976 = vpush %v1749_v15 }
0x1dd9   :  { %v1990_v22 = vpop.xlane.xlu0 %1989 }
0x1dda   :  { %4295 = vlog2.f32 %v1990_v22 }
0x1de0   :  { %v4296_v33 = vpop.eup %4295 }
0x1de1   :  { %v1992_v43 = vmul.f32 0.6931472, %v4296_v33 }
0x1de3   :  { %v1993_v59 = vsub.f32 %v1985_v0, %v1992_v43 }
0x1dec   :  { %v1996_v54 = vpop.permute.xlu0 %1995 }
0x1ded   :  { %vm1997_vm4 = vcmp.eq.s32.totalorder %v5416_v63, %v1996_v54 }
0x1dee   :  { %v1998_v46 = vsel %vm1997_vm4, %v1993_v59, 0.0 }
0x1def   :  { %v1999_v30 = vsel %vm1392_vm14, %v1998_v46, 0.0 }
0x1df0   :  { %2000 = vadd.xlane.f32.xlu1 %v1999_v30 }
0x1df4   :  { %v4027_v12 = vpop.permute.xlu0 %4026 }
0x1df5   :  { %v4028_v28 = vunpack.i.l.bf16 %v4027_v12 }
0x1df7   :  { %v2276_v44 = vmul.f32 %v4028_v28, %v5218_v27 }
0x1df8   :  { %2020 = vmax.xlane.f32.xlu1 %v2019_v49  ;;  %v3120_v20 = vpop.f32.mrf.mxu2 }
0x1df9   :  { %v5500_v10 = vadd.f32 %v5390_v7, %v3120_v20  ;;  %v2277_v31 = vsel %vm1392_vm14, %v2276_v44, -inf }
0x1dfb   :  { %3880 = vst [vmem:[%s5693_s18 + $0x18] sm:$0x7] %v5500_v10 }
0x1e00   :  { %v3122_v3 = vpop.f32.mrf.mxu2  ;;  %v3140_v29 = vpop.f32.mrf.mxu3 }
0x1e01   :  { %v5507_v38 = vadd.f32 %v5390_v7, %v3140_v29  ;;  %v4029_v29 = vunpack.i.h.bf16 %v4027_v12 }
0x1e03   :  { %3881 = vst [vmem:[%s5694_s19 + $0x18] sm:$0x7] %v5507_v38 }
0x1e08   :  { %v3142_v40 = vpop.f32.mrf.mxu3  ;;  %v3306_v42 = vpop.f32.mrf.mxu2 }
0x1e09   :  { %v5515_v37 = vadd.f32 %v3306_v42, %v3257_v11  ;;  %v2313_v42 = vmul.f32 %v4029_v29, %v5227_v2 }
0x1e10   :  { %v3308_v34 = vpop.f32.mrf.mxu2  ;;  %v3320_v4 = vpop.f32.mrf.mxu3 }
0x1e11   :  { %v3324_v17 = vadd.f32 %v3320_v4, %v3296_v58  ;;  %2032 = vperm.xlu1 %4013, %v3765_v18   ;;  %v2314_v18 = vsel %vm1392_vm14, %v2313_v42, -inf }
0x1e13   :  { %v3907_v59 = vmul.f32 -1.442695, %v3324_v17 }
0x1e18   :  { %v3322_v55 = vpop.f32.mrf.mxu3 }
0x1e63   :  { %v2001_v50 = vpop.xlane.xlu1 %2000 }
0x1e64   :  { %v2002_v19 = vrot.slane %v2001_v50, 4 }
0x1e66   :  { %v2003_v1 = vadd.f32 %v2002_v19, %v2001_v50  ;;  %v3795_v19 = vld [vmem:[%s5690_s15 + $0xc] sm:$0x7] }
0x1e68   :  { %v2004_v56 = vrot.slane %v2003_v1, 2 }
0x1e6a   :  { %v2005_v13 = vadd.f32 %v2004_v56, %v2003_v1 }
0x1e6b   :  { %v2021_v21 = vpop.xlane.xlu1 %2020 }
0x1e6c   :  { %v2022_v45 = vsub.f32 %v2018_v16, %v2021_v21  ;;  %v2006_v0 = vrot.slane %v2005_v13, 1 }
0x1e6e   :  { %v2023_v14 = vmul.f32 1.442695, %v2022_v45  ;;  %v2007_v47 = vadd.f32 %v2006_v0, %v2005_v13 }
0x1e70   :  { %4297 = vpow2.f32 %v2023_v14  ;;  %3978 = vpush %v2007_v47  ;;  %v3906_v47 = vmul.f32 -1.442695, %v5515_v37 }
0x1e76   :  { %v4298_v24 = vpop.eup %4297 }
0x1e77   :  { %v2025_v62 = vsel %vm1392_vm14, %v4298_v24, 0.0 }
0x1e78   :  { %2026 = vadd.xlane.f32.xlu2 %v2025_v62 }
0x1e83   :  { %v2033_v48 = vpop.permute.xlu1 %2032 }
0x1e84   :  { %vm2034_vm5 = vcmp.eq.s32.totalorder %v5416_v63, %v2033_v48 }
0x1eeb   :  { %v2027_v60 = vpop.xlane.xlu2 %2026 }
0x1eec   :  { %4299 = vlog2.f32 %v2027_v60 }
0x1eed   :  { %4301 = vtanh.f32 %v5515_v37 }
0x1eee   :  { %4303 = vtanh.f32 %v3324_v17 }
0x1eef   :  { %4305 = vpow2.f32 %v3907_v59 }
0x1ef2   :  { %v4300_v52 = vpop.eup %4299 }
0x1ef3   :  { %v2029_v57 = vmul.f32 0.6931472, %v4300_v52  ;;  %v4302_v32 = vpop.eup %4301 }
0x1ef4   :  { %v4304_v15 = vpop.eup %4303 }
0x1ef5   :  { %v2030_v41 = vsub.f32 %v2022_v45, %v2029_v57  ;;  %v4306_v20 = vpop.eup %4305 }
0x1ef6   :  { %v3365_v40 = vadd.f32 1.0, %v4306_v20 }
0x1ef7   :  { %v2035_v23 = vsel %vm2034_vm5, %v2030_v41, 0.0 }
0x1ef8   :  { %v2036_v36 = vsel %vm1392_vm14, %v2035_v23, 0.0  ;;  %v3377_v56 = vand.u32 2147483648, %v3365_v40  ;;  %vm3371_vm7 = vweird.f32 %v3365_v40  ;;  %v3375_v13 = vand.u32 2147483647, %v3365_v40 }
0x1ef9   :  { %2037 = vadd.xlane.f32.xlu2 %v2036_v36 }
0x1efa   :  { %v3378_v21 = vor.u32 1.1754944e-38, %v3377_v56  ;;  %vm3376_vm9 = vcmp.eq.f32.partialorder %v3375_v13, 8.507059e+37 }
0x1f01   :  { %2278 = vmax.xlane.f32.xlu2 %v2277_v31 }
0x1f19   :  { %2290 = vperm.xlu2 %4007, %v3794_v5  }
0x1f21   :  { %3347 = vrot.lane.b32.xlu2 %v4302_v32, %s4381_s24 }
0x1f29   :  { %3384 = vrot.lane.b32.xlu2 %v4304_v15, %s4381_s24 }
0x1f6c   :  { %v2038_v22 = vpop.xlane.xlu2 %2037 }
0x1f6d   :  { %v2039_v33 = vrot.slane %v2038_v22, 4 }
0x1f6f   :  { %v2040_v27 = vadd.f32 %v2039_v33, %v2038_v22 }
0x1f71   :  { %v2041_v43 = vrot.slane %v2040_v27, 2 }
0x1f73   :  { %v2042_v54 = vadd.f32 %v2041_v43, %v2040_v27 }
0x1f74   :  { %v2279_v46 = vpop.xlane.xlu2 %2278 }
0x1f75   :  { %v2280_v8 = vsub.f32 %v2276_v44, %v2279_v46  ;;  %v2043_v30 = vrot.slane %v2042_v54, 1 }
0x1f77   :  { %v2281_v16 = vmul.f32 1.442695, %v2280_v8  ;;  %v2044_v49 = vadd.f32 %v2043_v30, %v2042_v54  ;;  %v3823_v30 = vsel %vm2561_vm2, 1.0, %v4383_v25 }
0x1f79   :  { %4307 = vpow2.f32 %v2281_v16  ;;  %3980 = vpush %v2044_v49 }
0x1f7a   :  { %4309 = vrcp.f32 %v3365_v40 }
0x1f7b   :  { %4311 = vpow2.f32 %v3906_v47 }
0x1f7c   :  { %v2291_v34 = vpop.permute.xlu2 %2290 }
0x1f7d   :  { %vm2292_vm10 = vcmp.eq.s32.totalorder %v5416_v63, %v2291_v34 }
0x1f7f   :  { %v4308_v3 = vpop.eup %4307 }
0x1f80   :  { %v2283_v11 = vsel %vm1392_vm14, %v4308_v3, 0.0  ;;  %v4310_v58 = vpop.eup %4309 }
0x1f81   :  { %2284 = vadd.xlane.f32.xlu0 %v2283_v11  ;;  %v3367_v4 = vmul.f32 %v4310_v58, %v3365_v40  ;;  %vm3372_vm6 = vweird.f32 %v4310_v58  ;;  %v4312_v62 = vpop.eup %4311 }
0x1f82   :  { %vm3373_vm8 = vmor %vm3371_vm7, %vm3372_vm6  ;;  %v3328_v60 = vadd.f32 1.0, %v4312_v62 }
0x1f83   :  { %v3368_v17 = vsub.f32 1.0, %v3367_v4 }
0x1f84   :  { %v3348_v55 = vpop.permute.xlu2 %3347  ;;  %v3340_v33 = vand.u32 2147483648, %v3328_v60  ;;  %vm3334_vm12 = vweird.f32 %v3328_v60  ;;  %v3338_v27 = vand.u32 2147483647, %v3328_v60 }
0x1f85   :  { %v3369_v50 = vmul.f32 %v4310_v58, %v3368_v17 }
0x1f86   :  { %v3341_v54 = vor.u32 1.1754944e-38, %v3340_v33  ;;  %vm3339_vm15 = vcmp.eq.f32.partialorder %v3338_v27, 8.507059e+37 }
0x1f87   :  { %v3370_v1 = vadd.f32 %v4310_v58, %v3369_v50 }
0x1f89   :  { %2315 = vmax.xlane.f32.xlu0 %v2314_v18  ;;  %v3374_v2 = vsel %vm3373_vm8, %v4310_v58, %v3370_v1 }
0x1f8a   :  { %v5539_v0 = vsel %vm3376_vm9, %v3378_v21, %v3374_v2 }
0x1f8b   :  { %v3382_v56 = vmul.f32 %v5539_v0, %v5465_v9 }
0x1f8c   :  { %v3385_v45 = vpop.permute.xlu2 %3384 }
0x1f8d   :  { %v3387_v14 = vmul.f32 %v3385_v45, %v5539_v0 }
0x1f9d   :  { %2327 = vperm.xlu0 %4024, %v3795_v19  }
0x1fa5   :  { %3389 = vrot.lane.b32.xlu0 %v3387_v14, %s4382_s7 }
0x1ff4   :  { %v2285_v24 = vpop.xlane.xlu0 %2284 }
0x1ff5   :  { %4313 = vlog2.f32 %v2285_v24 }
0x1ff6   :  { %4315 = vrcp.f32 %v3328_v60 }
0x1ffb   :  { %v4314_v52 = vpop.eup %4313 }
0x1ffc   :  { %v2287_v48 = vmul.f32 0.6931472, %v4314_v52  ;;  %v2316_v57 = vpop.xlane.xlu0 %2315  ;;  %v4316_v44 = vpop.eup %4315 }
0x1ffd   :  { %v2317_v12 = vsub.f32 %v2313_v42, %v2316_v57  ;;  %v3330_v37 = vmul.f32 %v4316_v44, %v3328_v60  ;;  %vm3335_vm11 = vweird.f32 %v4316_v44 }
0x1ffe   :  { %v2288_v41 = vsub.f32 %v2280_v8, %v2287_v48  ;;  %vm3336_vm13 = vmor %vm3334_vm12, %vm3335_vm11  ;;  %v3822_v8 = vsel %vm2558_vm1, 1.0, %v4383_v25 }
0x1fff   :  { %v2318_v23 = vmul.f32 1.442695, %v2317_v12  ;;  %v3331_v32 = vsub.f32 1.0, %v3330_v37  ;;  %v4030_v16 = vpack.i.bf16 %v3823_v30, %v3822_v8 }
0x2000   :  { %v2293_v28 = vsel %vm2292_vm10, %v2288_v41, 0.0 }
0x2001   :  { %4317 = vpow2.f32 %v2318_v23  ;;  %v2294_v36 = vsel %vm1392_vm14, %v2293_v28, 0.0  ;;  %v3332_v15 = vmul.f32 %v4316_v44, %v3331_v32 }
0x2002   :  { %2295 = vadd.xlane.f32.xlu1 %v2294_v36 }
0x2003   :  { %v3333_v22 = vadd.f32 %v4316_v44, %v3332_v15 }
0x2005   :  { %v3337_v43 = vsel %vm3336_vm13, %v4316_v44, %v3333_v22 }
0x2006   :  { %v3342_v59 = vsel %vm3339_vm15, %v3341_v54, %v3337_v43 }
0x2007   :  { %v4318_v31 = vpop.eup %4317  ;;  %v3350_v46 = vmul.f32 %v3348_v55, %v3342_v59  ;;  %v3345_v55 = vmul.f32 %v3342_v59, %v5461_v35  ;;  %v3824_v35 = vld [vmem:[%s5689_s14 + $0x10] sm:$0x7] }
0x2008   :  { %v2320_v5 = vsel %vm1392_vm14, %v4318_v31, 0.0 }
0x2009   :  { %2321 = vadd.xlane.f32.xlu2 %v2320_v5 }
0x200f   :  { %v2328_v6 = vpop.permute.xlu0 %2327 }
0x2010   :  { %vm2329_vm3 = vcmp.eq.s32.totalorder %v5416_v63, %v2328_v6 }
0x2017   :  { %v3390_v1 = vpop.permute.xlu0 %3389 }
0x2018   :  { %v3392_v13 = vadd.f32 %v3390_v1, %v3382_v56 }
0x201b   :  { %3352 = vrot.lane.b32.xlu1 %v3350_v46, %s4382_s7 }
0x2023   :  { %4031 = vperm.xlu1 %4013, %v4030_v16  }
0x2075   :  { %v2296_v49 = vpop.xlane.xlu1 %2295 }
0x2076   :  { %v2297_v20 = vrot.slane %v2296_v49, 4 }
0x2078   :  { %v2298_v3 = vadd.f32 %v2297_v20, %v2296_v49 }
0x207a   :  { %v2299_v29 = vrot.slane %v2298_v3, 2 }
0x207c   :  { %v2322_v11 = vpop.xlane.xlu2 %2321  ;;  %v2300_v40 = vadd.f32 %v2299_v29, %v2298_v3 }
0x207d   :  { %4319 = vlog2.f32 %v2322_v11 }
0x207e   :  { %v2301_v42 = vrot.slane %v2300_v40, 1 }
0x2080   :  { %v2302_v18 = vadd.f32 %v2301_v42, %v2300_v40  ;;  %v3825_v40 = vld [vmem:[%s5690_s15 + $0x10] sm:$0x7]  ;;  %v5581_v42 = vld [vmem:[%s5691_s16] sm:$0x7] }
0x2081   :  { %vm3148_vm7 = vcmp.gt.s32.totalorder %v5581_v42, 6  ;;  %vm3443_vm9 = vcmp.gt.s32.totalorder %v5581_v42, 7 }
0x2082   :  { %3982 = vpush %v2302_v18  ;;  %v5587_v18 = vld [vmem:[%s5692_s17] sm:$0x7] }
0x2083   :  { %v4320_v51 = vpop.eup %4319  ;;  %vm2856_vm5 = vcmp.gt.s32.totalorder %v5587_v18, 5  ;;  %vm3151_vm8 = vcmp.gt.s32.totalorder %v5587_v18, 6  ;;  %vm3446_vm10 = vcmp.gt.s32.totalorder %v5587_v18, 7 }
0x2084   :  { %v2324_v58 = vmul.f32 0.6931472, %v4320_v51  ;;  %v3853_v6 = vsel %vm2856_vm5, 1.0, %v4383_v25 }
0x2086   :  { %v2325_v34 = vsub.f32 %v2317_v12, %v2324_v58 }
0x2088   :  { %v2330_v4 = vsel %vm2329_vm3, %v2325_v34, 0.0  ;;  %v3854_v34 = vld [vmem:[%s5689_s14 + $0x14] sm:$0x7] }
0x2089   :  { %v2331_v17 = vsel %vm1392_vm14, %v2330_v4, 0.0 }
0x208a   :  { %2332 = vadd.xlane.f32.xlu0 %v2331_v17 }
0x208d   :  { %v3353_v50 = vpop.permute.xlu1 %3352 }
0x208e   :  { %v3355_v19 = vadd.f32 %v3353_v50, %v3345_v55 }
0x2090   :  { %4321 = vtanh.f32 %v3355_v19 }
0x2091   :  { %4323 = vtanh.f32 %v3392_v13 }
0x2095   :  { %v4032_v2 = vpop.permute.xlu1 %4031 }
0x2096   :  { %v4322_v21 = vpop.eup %4321  ;;  %v4033_v45 = vunpack.i.l.bf16 %v4032_v2  ;;  %v4034_v32 = vunpack.i.h.bf16 %v4032_v2 }
0x2097   :  { %3358 = vrot.lane.b32.xlu2 %v4322_v21, %s4381_s24  ;;  %v4324_v24 = vpop.eup %4323 }
0x2098   :  { %v2571_v14 = vmul.f32 %v4033_v45, %v5302_v61 }
0x209a   :  { %v2572_v47 = vsel %vm1392_vm14, %v2571_v14, -inf }
0x209b   :  { %2573 = vmax.xlane.f32.xlu1 %v2572_v47 }
0x209e   :  { %2585 = vperm.xlu0 %4024, %v3824_v35  }
0x209f   :  { %3395 = vrot.lane.b32.xlu2 %v4324_v24, %s4381_s24 }
0x20f1   :  { %v3359_v9 = vpop.permute.xlu2 %3358 }
0x20f2   :  { %v3361_v62 = vmul.f32 %v3359_v9, %v3342_v59 }
0x20f4   :  { %v3399_v60 = vpack.c.bf16 %v3361_v62, %v3361_v62 }
0x20f6   :  { %3401 = vrot.lane.b32.xlu1 %v3399_v60, %s4382_s7 }
0x20f9   :  { %v3396_v52 = vpop.permute.xlu2 %3395 }
0x20fa   :  { %v3398_v48 = vmul.f32 %v3396_v52, %v5539_v0  ;;  %v2608_v0 = vmul.f32 %v4034_v32, %v5295_v39 }
0x20fc   :  { %v3419_v61 = vpack.c.bf16 %v3398_v48, %v3398_v48  ;;  %v2609_v33 = vsel %vm1392_vm14, %v2608_v0, -inf }
0x20fd   :  { %v2333_v57 = vpop.xlane.xlu0 %2332 }
0x20fe   :  { %v2334_v12 = vrot.slane %v2333_v57, 4  ;;  %3421 = vrot.lane.b32.xlu0 %v3419_v61, %s4382_s7 }
0x2100   :  { %v2335_v41 = vadd.f32 %v2334_v12, %v2333_v57 }
0x2102   :  { %v2336_v23 = vrot.slane %v2335_v41, 2 }
0x2104   :  { %v2337_v28 = vadd.f32 %v2336_v23, %v2335_v41  ;;  %v3882_v41 = vsel %vm3148_vm7, 1.0, %v4383_v25  ;;  %v3883_v23 = vsel %vm3151_vm8, 1.0, %v4383_v25 }
0x2106   :  { %v2338_v36 = vrot.slane %v2337_v28, 1 }
0x2108   :  { %v2339_v44 = vadd.f32 %v2338_v36, %v2337_v28  ;;  %v4040_v28 = vpack.i.bf16 %v3883_v23, %v3882_v41 }
0x210a   :  { %3984 = vpush %v2339_v44 }
0x210e   :  { %v2574_v37 = vpop.xlane.xlu1 %2573 }
0x210f   :  { %v2575_v31 = vsub.f32 %v2571_v14, %v2574_v37 }
0x2110   :  { %v2586_v27 = vpop.permute.xlu0 %2585 }
0x2111   :  { %v2576_v5 = vmul.f32 1.442695, %v2575_v31  ;;  %vm2587_vm4 = vcmp.eq.s32.totalorder %v5416_v63, %v2586_v27 }
0x2113   :  { %4325 = vpow2.f32 %v2576_v5 }
0x2119   :  { %v4326_v15 = vpop.eup %4325 }
0x211a   :  { %v2578_v22 = vsel %vm1392_vm14, %v4326_v15, 0.0 }
0x211b   :  { %2579 = vadd.xlane.f32.xlu2 %v2578_v22 }
0x2120   :  { %2610 = vmax.xlane.f32.xlu1 %v2609_v33 }
0x2168   :  { %v3402_v43 = vpop.permute.xlu1 %3401 }
0x2169   :  { %3908 = vmatmul.msk.bf16.vlgmr.msrb.gmra.mxu0 %vm184_vm0, %v3402_v43 }
0x2170   :  { %v3422_v54 = vpop.permute.xlu0 %3421 }
0x2171   :  { %3909 = vmatmul.msk.bf16.vlgmr.msrb.gmra.mxu1 %vm184_vm0, %v3422_v54  ;;  %vm2853_vm0 = vcmp.gt.s32.totalorder %v5581_v42, 5 }
0x2172   :  { %v3852_v51 = vsel %vm2853_vm0, 1.0, %v4383_v25 }
0x2173   :  { %v4035_v58 = vpack.i.bf16 %v3853_v6, %v3852_v51 }
0x218e   :  { %v2580_v59 = vpop.xlane.xlu2 %2579 }
0x218f   :  { %4327 = vlog2.f32 %v2580_v59  ;;  %v3912_v59 = vsel %vm3443_vm9, 1.0, %v4383_v25 }
0x2193   :  { %v2611_v46 = vpop.xlane.xlu1 %2610 }
0x2194   :  { %v2612_v8 = vsub.f32 %v2608_v0, %v2611_v46  ;;  %v3913_v46 = vsel %vm3446_vm10, 1.0, %v4383_v25  ;;  %v3915_v25 = vld [vmem:[%s5690_s15 + $0x1c] sm:$0x7] }
0x2195   :  { %v4328_v30 = vpop.eup %4327 }
0x2196   :  { %v2582_v16 = vmul.f32 0.6931472, %v4328_v30  ;;  %v2613_v49 = vmul.f32 1.442695, %v2612_v8 }
0x2198   :  { %4329 = vpow2.f32 %v2613_v49  ;;  %v2583_v20 = vsub.f32 %v2575_v31, %v2582_v16  ;;  %v4045_v16 = vpack.i.bf16 %v3913_v46, %v3912_v59  ;;  %v3855_v49 = vld [vmem:[%s5690_s15 + $0x14] sm:$0x7] }
0x219a   :  { %v2588_v39 = vsel %vm2587_vm4, %v2583_v20, 0.0  ;;  %v3885_v20 = vld [vmem:[%s5690_s15 + $0x18] sm:$0x7] }
0x219b   :  { %v2589_v3 = vsel %vm1392_vm14, %v2588_v39, 0.0 }
0x219c   :  { %2590 = vadd.xlane.f32.xlu0 %v2589_v3 }
0x219e   :  { %v4330_v29 = vpop.eup %4329 }
0x219f   :  { %v2615_v11 = vsel %vm1392_vm14, %v4330_v29, 0.0 }
0x21a0   :  { %2616 = vadd.xlane.f32.xlu2 %v2615_v11 }
0x21b8   :  { %2622 = vperm.xlu2 %4007, %v3825_v40  }
0x21c0   :  { %4036 = vperm.xlu2 %4007, %v4035_v58  }
0x21c8   :  { %2880 = vperm.xlu2 %4007, %v3854_v34  }
0x21e6   :  { %v3415_v4 = vpop.f32.mrf.mxu0 }
0x21e7   :  { %v5596_v17 = vadd.f32 %v5390_v7, %v3415_v4 }
0x21e9   :  { %3910 = vst [vmem:[%s5693_s18 + $0x1c] sm:$0x7] %v5596_v17 }
0x21ee   :  { %v3417_v55 = vpop.f32.mrf.mxu0  ;;  %v3435_v50 = vpop.f32.mrf.mxu1 }
0x21ef   :  { %v5603_v19 = vadd.f32 %v5390_v7, %v3435_v50 }
0x21f1   :  { %3911 = vst [vmem:[%s5694_s19 + $0x1c] sm:$0x7] %v5603_v19 }
0x21f6   :  { %v3437_v1 = vpop.f32.mrf.mxu1 }
0x220f   :  { %v2591_v56 = vpop.xlane.xlu0 %2590 }
0x2210   :  { %v2592_v13 = vrot.slane %v2591_v56, 4 }
0x2212   :  { %v2593_v2 = vadd.f32 %v2592_v13, %v2591_v56 }
0x2213   :  { %v2617_v21 = vpop.xlane.xlu2 %2616 }
0x2214   :  { %v2594_v45 = vrot.slane %v2593_v2, 2  ;;  %4331 = vlog2.f32 %v2617_v21 }
0x2216   :  { %v2595_v14 = vadd.f32 %v2594_v45, %v2593_v2 }
0x2218   :  { %v2596_v47 = vrot.slane %v2595_v14, 1 }
0x221a   :  { %v4332_v35 = vpop.eup %4331  ;;  %v2597_v24 = vadd.f32 %v2596_v47, %v2595_v14 }
0x221b   :  { %v2619_v9 = vmul.f32 0.6931472, %v4332_v35  ;;  %v2623_v62 = vpop.permute.xlu2 %2622 }
0x221c   :  { %3986 = vpush %v2597_v24  ;;  %vm2624_vm6 = vcmp.eq.s32.totalorder %v5416_v63, %v2623_v62 }
0x221d   :  { %v2620_v7 = vsub.f32 %v2612_v8, %v2619_v9 }
0x221f   :  { %v2625_v60 = vsel %vm2624_vm6, %v2620_v7, 0.0 }
0x2220   :  { %v2626_v52 = vsel %vm1392_vm14, %v2625_v60, 0.0 }
0x2221   :  { %2627 = vadd.xlane.f32.xlu0 %v2626_v52 }
0x2223   :  { %v4037_v48 = vpop.permute.xlu2 %4036 }
0x2224   :  { %v4038_v61 = vunpack.i.l.bf16 %v4037_v48  ;;  %v4039_v39 = vunpack.i.h.bf16 %v4037_v48 }
0x2226   :  { %v2866_v57 = vmul.f32 %v4038_v61, %v5400_v53 }
0x2228   :  { %v2867_v12 = vsel %vm1392_vm14, %v2866_v57, -inf }
0x2229   :  { %2868 = vmax.xlane.f32.xlu1 %v2867_v12 }
0x222b   :  { %v2881_v40 = vpop.permute.xlu2 %2880 }
0x222c   :  { %vm2882_vm11 = vcmp.eq.s32.totalorder %v5416_v63, %v2881_v40 }
0x2242   :  { %4041 = vperm.xlu1 %4013, %v4040_v28  }
0x2294   :  { %v2628_v36 = vpop.xlane.xlu0 %2627 }
0x2295   :  { %v2629_v44 = vrot.slane %v2628_v36, 4 }
0x2297   :  { %v2630_v37 = vadd.f32 %v2629_v44, %v2628_v36 }
0x2299   :  { %v2631_v31 = vrot.slane %v2630_v37, 2 }
0x229b   :  { %v2632_v5 = vadd.f32 %v2631_v31, %v2630_v37  ;;  %v3884_v31 = vld [vmem:[%s5689_s14 + $0x18] sm:$0x7] }
0x229c   :  { %v2869_v32 = vpop.xlane.xlu1 %2868 }
0x229d   :  { %v2870_v53 = vsub.f32 %v2866_v57, %v2869_v32  ;;  %v2633_v15 = vrot.slane %v2632_v5, 1 }
0x229f   :  { %v2871_v22 = vmul.f32 1.442695, %v2870_v53  ;;  %v2634_v0 = vadd.f32 %v2633_v15, %v2632_v5 }
0x22a1   :  { %4333 = vpow2.f32 %v2871_v22  ;;  %3988 = vpush %v2634_v0 }
0x22a7   :  { %v4334_v33 = vpop.eup %4333 }
0x22a8   :  { %v2873_v27 = vsel %vm1392_vm14, %v4334_v33, 0.0 }
0x22a9   :  { %2874 = vadd.xlane.f32.xlu0 %v2873_v27 }
0x22b4   :  { %v4042_v43 = vpop.permute.xlu1 %4041 }
0x22b5   :  { %v4043_v54 = vunpack.i.l.bf16 %v4042_v43  ;;  %v4044_v6 = vunpack.i.h.bf16 %v4042_v43 }
0x22b7   :  { %v3161_v8 = vmul.f32 %v4043_v54, %v5500_v10  ;;  %v2903_v10 = vmul.f32 %v4039_v39, %v5393_v26  ;;  %v3198_v34 = vmul.f32 %v4044_v6, %v5507_v38 }
0x22b9   :  { %v3162_v30 = vsel %vm1392_vm14, %v3161_v8, -inf  ;;  %v2904_v3 = vsel %vm1392_vm14, %v2903_v10, -inf  ;;  %v3199_v55 = vsel %vm1392_vm14, %v3198_v34, -inf }
0x22ba   :  { %3163 = vmax.xlane.f32.xlu1 %v3162_v30 }
0x22bd   :  { %4046 = vperm.xlu0 %4024, %v4045_v16  }
0x22d3   :  { %2917 = vperm.xlu1 %4013, %v3855_v49   ;;  %v3914_v49 = vld [vmem:[%s5689_s14 + $0x1c] sm:$0x7]  ;;  %s3971_s14 = spop %3970 }
0x22d4   :  { %s3973_s1 = spop %3972  ;;  %s1420_s5 = ssub.f32 0.0, %s3971_s14 }
0x22d5   :  { %s1456_s22 = ssub.f32 0.0, %s3973_s1  ;;  %s3975_s2 = spop %3974 }
0x22d6   :  { %s3977_s9 = spop %3976  ;;  %s1714_s3 = ssub.f32 0.0, %s3975_s2 }
0x22d7   :  { %s1457_s12 = sadd.f32 %s1456_s22, %s1420_s5  ;;  %s3979_s7 = spop %3978 }
0x22d8   :  { %s1751_s24 = ssub.f32 0.0, %s3977_s9  ;;  %s3981_s25 = spop %3980 }
0x22d9   :  { %s1715_s6 = sadd.f32 %s1714_s3, %s1457_s12  ;;  %s3983_s10 = spop %3982 }
0x22da   :  { %s2009_s13 = ssub.f32 0.0, %s3979_s7  ;;  %s3985_s17 = spop %3984 }
0x22db   :  { %3212 = vperm.xlu1 %4013, %v3885_v20   ;;  %s1752_s27 = sadd.f32 %s1751_s24, %s1715_s6  ;;  %s3987_s19 = spop %3986 }
0x22dc   :  { %s2046_s28 = ssub.f32 0.0, %s3981_s25  ;;  %s3989_s30 = spop %3988 }
0x22dd   :  { %s2010_s16 = sadd.f32 %s2009_s13, %s1752_s27 }
0x22de   :  { %s2304_s26 = ssub.f32 0.0, %s3983_s10 }
0x22df   :  { %s2047_s4 = sadd.f32 %s2046_s28, %s2010_s16 }
0x22e0   :  { %s2341_s18 = ssub.f32 0.0, %s3985_s17  ;;  %s3534_s17 = sshll.u32 %s5695_s20, 4  ;;  %s3535_s17 = int_to_ptr.hbm [resolvable:$true] %s3534_s17 }
0x22e1   :  { %s2305_s29 = sadd.f32 %s2304_s26, %s2047_s4 }
0x22e2   :  { %s2599_s0 = ssub.f32 0.0, %s3987_s19 }
0x22e3   :  { %3507 = vperm.xlu1 %4013, %v3915_v25   ;;  %s2342_s11 = sadd.f32 %s2341_s18, %s2305_s29  ;;  %s4384_s18 = smov [#allocation2]  }
0x22e4   :  { %s2636_s15 = ssub.f32 0.0, %s3989_s30 }
0x22e5   :  { %s2600_s8 = sadd.f32 %s2599_s0, %s2342_s11 }
0x22e7   :  { %2905 = vmax.xlane.f32.xlu0 %v2904_v3  ;;  %s2637_s1 = sadd.f32 %s2636_s15, %s2600_s8 }
0x231c   :  { %v2875_v29 = vpop.xlane.xlu0 %2874 }
0x231d   :  { %4335 = vlog2.f32 %v2875_v29 }
0x2323   :  { %v4336_v11 = vpop.eup %4335 }
0x2324   :  { %v2877_v42 = vmul.f32 0.6931472, %v4336_v11 }
0x2326   :  { %v2878_v18 = vsub.f32 %v2870_v53, %v2877_v42 }
0x2328   :  { %v2883_v51 = vsel %vm2882_vm11, %v2878_v18, 0.0 }
0x2329   :  { %v2884_v58 = vsel %vm1392_vm14, %v2883_v51, 0.0 }
0x232a   :  { %2885 = vadd.xlane.f32.xlu2 %v2884_v58 }
0x232d   :  { %v3164_v21 = vpop.xlane.xlu1 %3163 }
0x232e   :  { %v5643_v38 = vsub.f32 %v3161_v8, %v3164_v21 }
0x232f   :  { %v4047_v26 = vpop.permute.xlu0 %4046 }
0x2330   :  { %v4049_v4 = vunpack.i.h.bf16 %v4047_v26  ;;  %v4048_v1 = vunpack.i.l.bf16 %v4047_v26  ;;  %v3166_v35 = vmul.f32 1.442695, %v5643_v38 }
0x2332   :  { %3200 = vmax.xlane.f32.xlu2 %v3199_v55  ;;  %v3493_v50 = vmul.f32 %v4049_v4, %v5603_v19  ;;  %v3456_v13 = vmul.f32 %v4048_v1, %v5596_v17 }
0x2334   :  { %v3494_v56 = vsel %vm1392_vm14, %v3493_v50, -inf  ;;  %v3457_v2 = vsel %vm1392_vm14, %v3456_v13, -inf }
0x233a   :  { %3495 = vmax.xlane.f32.xlu2 %v3494_v56 }
0x2342   :  { %3458 = vmax.xlane.f32.xlu2 %v3457_v2 }
0x2345   :  { %v2918_v15 = vpop.permute.xlu1 %2917 }
0x2346   :  { %vm2919_vm12 = vcmp.eq.s32.totalorder %v5416_v63, %v2918_v15 }
0x234d   :  { %v3213_v55 = vpop.permute.xlu1 %3212 }
0x234e   :  { %vm3214_vm15 = vcmp.eq.s32.totalorder %v5416_v63, %v3213_v55 }
0x235a   :  { %v2906_v45 = vpop.xlane.xlu0 %2905 }
0x235b   :  { %v2907_v14 = vsub.f32 %v2903_v10, %v2906_v45 }
0x235d   :  { %v2908_v47 = vmul.f32 1.442695, %v2907_v14 }
0x235f   :  { %4337 = vpow2.f32 %v2908_v47  ;;  %v3508_v47 = vpop.permute.xlu1 %3507 }
0x2360   :  { %4339 = vpow2.f32 %v3166_v35  ;;  %vm3509_vm2 = vcmp.eq.s32.totalorder %v5416_v63, %v3508_v47 }
0x2365   :  { %v4338_v24 = vpop.eup %4337 }
0x2366   :  { %v2910_v19 = vsel %vm1392_vm14, %v4338_v24, 0.0  ;;  %v4340_v9 = vpop.eup %4339 }
0x2367   :  { %2911 = vadd.xlane.f32.xlu0 %v2910_v19  ;;  %v3168_v17 = vsel %vm1392_vm14, %v4340_v9, 0.0 }
0x236f   :  { %3169 = vadd.xlane.f32.xlu0 %v3168_v17 }
0x239d   :  { %v2886_v62 = vpop.xlane.xlu2 %2885 }
0x239e   :  { %v2887_v7 = vrot.slane %v2886_v62, 4 }
0x23a0   :  { %v2888_v60 = vadd.f32 %v2887_v7, %v2886_v62 }
0x23a2   :  { %v2889_v52 = vrot.slane %v2888_v60, 2 }
0x23a4   :  { %v2890_v48 = vadd.f32 %v2889_v52, %v2888_v60 }
0x23a5   :  { %v3201_v61 = vpop.xlane.xlu2 %3200 }
0x23a6   :  { %v2891_v57 = vrot.slane %v2890_v48, 1  ;;  %v3202_v32 = vsub.f32 %v3198_v34, %v3201_v61 }
0x23a8   :  { %v2892_v12 = vadd.f32 %v2891_v57, %v2890_v48  ;;  %v3203_v22 = vmul.f32 1.442695, %v3202_v32 }
0x23aa   :  { %3990 = vpush %v2892_v12 }
0x23ad   :  { %v3496_v41 = vpop.xlane.xlu2 %3495 }
0x23ae   :  { %v3497_v27 = vsub.f32 %v3493_v50, %v3496_v41 }
0x23b0   :  { %v3498_v59 = vmul.f32 1.442695, %v3497_v27 }
0x23b5   :  { %v3459_v23 = vpop.xlane.xlu2 %3458 }
0x23b6   :  { %v5648_v28 = vsub.f32 %v3456_v13, %v3459_v23 }
0x23b8   :  { %v3461_v36 = vmul.f32 1.442695, %v5648_v28 }
0x23ba   :  { %4341 = vpow2.f32 %v3461_v36 }
0x23c0   :  { %v4342_v44 = vpop.eup %4341 }
0x23c1   :  { %v3463_v37 = vsel %vm1392_vm14, %v4342_v44, 0.0 }
0x23c2   :  { %3464 = vadd.xlane.f32.xlu0 %v3463_v37 }
0x23d6   :  { %3175 = vperm.xlu0 %4024, %v3884_v31  }
0x23da   :  { %v2912_v5 = vpop.xlane.xlu0 %2911 }
0x23db   :  { %4343 = vlog2.f32 %v2912_v5  ;;  %s3991_s21 = spop %3990 }
0x23dc   :  { %4345 = vpow2.f32 %v3203_v22  ;;  %s2894_s14 = ssub.f32 0.0, %s3991_s21 }
0x23dd   :  { %4347 = vpow2.f32 %v3498_v59 }
0x23de   :  { %s2895_s5 = sadd.f32 %s2894_s14, %s2637_s1 }
0x23e1   :  { %v4344_v53 = vpop.eup %4343 }
0x23e2   :  { %v2914_v0 = vmul.f32 0.6931472, %v4344_v53  ;;  %v4346_v46 = vpop.eup %4345  ;;  %v3170_v20 = vpop.xlane.xlu0 %3169 }
0x23e3   :  { %v3205_v8 = vsel %vm1392_vm14, %v4346_v46, 0.0  ;;  %v4348_v30 = vpop.eup %4347  ;;  %4349 = vlog2.f32 %v3170_v20 }
0x23e4   :  { %v2915_v33 = vsub.f32 %v2907_v14, %v2914_v0  ;;  %v3500_v16 = vsel %vm1392_vm14, %v4348_v30, 0.0 }
0x23e6   :  { %v2920_v43 = vsel %vm2919_vm12, %v2915_v33, 0.0 }
0x23e7   :  { %v2921_v54 = vsel %vm1392_vm14, %v2920_v43, 0.0 }
0x23e8   :  { %2922 = vadd.xlane.f32.xlu2 %v2921_v54 }
0x23e9   :  { %v4350_v25 = vpop.eup %4349 }
0x23ea   :  { %v3172_v10 = vmul.f32 0.6931472, %v4350_v25 }
0x23ec   :  { %v3173_v29 = vsub.f32 %v5643_v38, %v3172_v10 }
0x23f0   :  { %3206 = vadd.xlane.f32.xlu2 %v3205_v8 }
0x23f8   :  { %3501 = vadd.xlane.f32.xlu2 %v3500_v16 }
0x2410   :  { %3470 = vperm.xlu2 %4007, %v3914_v49  }
0x2435   :  { %v3465_v39 = vpop.xlane.xlu0 %3464 }
0x2448   :  { %v3176_v3 = vpop.permute.xlu0 %3175 }
0x2449   :  { %vm3177_vm13 = vcmp.eq.s32.totalorder %v5416_v63, %v3176_v3 }
0x244a   :  { %v3178_v11 = vsel %vm3177_vm13, %v3173_v29, 0.0 }
0x244b   :  { %v3179_v40 = vsel %vm1392_vm14, %v3178_v11, 0.0 }
0x244c   :  { %3180 = vadd.xlane.f32.xlu1 %v3179_v40 }
0x245b   :  { %v2923_v42 = vpop.xlane.xlu2 %2922 }
0x245c   :  { %v2924_v18 = vrot.slane %v2923_v42, 4 }
0x245e   :  { %v2925_v51 = vadd.f32 %v2924_v18, %v2923_v42 }
0x2460   :  { %v2926_v6 = vrot.slane %v2925_v51, 2 }
0x2462   :  { %v2927_v58 = vadd.f32 %v2926_v6, %v2925_v51 }
0x2463   :  { %v3207_v34 = vpop.xlane.xlu2 %3206 }
0x2464   :  { %4351 = vlog2.f32 %v3207_v34  ;;  %v2928_v26 = vrot.slane %v2927_v58, 1 }
0x2465   :  { %4353 = vlog2.f32 %v3465_v39 }
0x2466   :  { %v2929_v4 = vadd.f32 %v2928_v26, %v2927_v58 }
0x2468   :  { %3992 = vpush %v2929_v4 }
0x246a   :  { %v4352_v50 = vpop.eup %4351 }
0x246b   :  { %v3209_v1 = vmul.f32 0.6931472, %v4352_v50  ;;  %v3502_v56 = vpop.xlane.xlu2 %3501  ;;  %v4354_v13 = vpop.eup %4353 }
0x246c   :  { %4355 = vlog2.f32 %v3502_v56  ;;  %v3467_v21 = vmul.f32 0.6931472, %v4354_v13 }
0x246d   :  { %v3210_v2 = vsub.f32 %v3202_v32, %v3209_v1 }
0x246e   :  { %v3468_v24 = vsub.f32 %v5648_v28, %v3467_v21 }
0x246f   :  { %v3215_v45 = vsel %vm3214_vm15, %v3210_v2, 0.0 }
0x2470   :  { %v3216_v14 = vsel %vm1392_vm14, %v3215_v45, 0.0 }
0x2471   :  { %3217 = vadd.xlane.f32.xlu0 %v3216_v14 }
0x2472   :  { %v4356_v38 = vpop.eup %4355 }
0x2473   :  { %v3504_v35 = vmul.f32 0.6931472, %v4356_v38  ;;  %v3471_v19 = vpop.permute.xlu2 %3470 }
0x2474   :  { %vm3472_vm1 = vcmp.eq.s32.totalorder %v5416_v63, %v3471_v19 }
0x2475   :  { %v3473_v9 = vsel %vm3472_vm1, %v3468_v24, 0.0  ;;  %v3505_v17 = vsub.f32 %v3497_v27, %v3504_v35 }
0x2476   :  { %v3474_v62 = vsel %vm1392_vm14, %v3473_v9, 0.0 }
0x2477   :  { %3475 = vadd.xlane.f32.xlu2 %v3474_v62  ;;  %v3510_v7 = vsel %vm3509_vm2, %v3505_v17, 0.0 }
0x2478   :  { %v3511_v60 = vsel %vm1392_vm14, %v3510_v7, 0.0 }
0x2479   :  { %3512 = vadd.xlane.f32.xlu1 %v3511_v60 }
0x2499   :  { %s3993_s23 = spop %3992 }
0x249a   :  { %s2931_s22 = ssub.f32 0.0, %s3993_s23 }
0x249c   :  { %s2932_s12 = sadd.f32 %s2931_s22, %s2895_s5 }
0x24bf   :  { %v3181_v52 = vpop.xlane.xlu1 %3180 }
0x24c0   :  { %v3182_v48 = vrot.slane %v3181_v52, 4 }
0x24c2   :  { %v3183_v61 = vadd.f32 %v3182_v48, %v3181_v52 }
0x24c4   :  { %v3184_v57 = vrot.slane %v3183_v61, 2 }
0x24c6   :  { %v3185_v12 = vadd.f32 %v3184_v57, %v3183_v61 }
0x24c8   :  { %v3186_v41 = vrot.slane %v3185_v12, 1 }
0x24ca   :  { %v3187_v23 = vadd.f32 %v3186_v41, %v3185_v12 }
0x24cc   :  { %3994 = vpush %v3187_v23 }
0x24e4   :  { %v3218_v28 = vpop.xlane.xlu0 %3217 }
0x24e5   :  { %v3219_v36 = vrot.slane %v3218_v28, 4 }
0x24e7   :  { %v3220_v44 = vadd.f32 %v3219_v36, %v3218_v28 }
0x24e9   :  { %v3221_v37 = vrot.slane %v3220_v44, 2 }
0x24ea   :  { %v3476_v63 = vpop.xlane.xlu2 %3475 }
0x24eb   :  { %v3222_v31 = vadd.f32 %v3221_v37, %v3220_v44  ;;  %v3477_v5 = vrot.slane %v3476_v63, 4 }
0x24ec   :  { %v3513_v32 = vpop.xlane.xlu1 %3512 }
0x24ed   :  { %v3478_v53 = vadd.f32 %v3477_v5, %v3476_v63  ;;  %v3514_v15 = vrot.slane %v3513_v32, 4  ;;  %v3223_v22 = vrot.slane %v3222_v31, 1 }
0x24ef   :  { %v3479_v0 = vrot.slane %v3478_v53, 2  ;;  %v3515_v33 = vadd.f32 %v3514_v15, %v3513_v32  ;;  %v3224_v27 = vadd.f32 %v3223_v22, %v3222_v31 }
0x24f1   :  { %v3480_v43 = vadd.f32 %v3479_v0, %v3478_v53  ;;  %v3516_v54 = vrot.slane %v3515_v33, 2  ;;  %3996 = vpush %v3224_v27 }
0x24f3   :  { %v3517_v59 = vadd.f32 %v3516_v54, %v3515_v33  ;;  %v3481_v46 = vrot.slane %v3480_v43, 1 }
0x24f5   :  { %v3482_v8 = vadd.f32 %v3481_v46, %v3480_v43  ;;  %v3518_v30 = vrot.slane %v3517_v59, 1 }
0x24f7   :  { %3998 = vpush %v3482_v8  ;;  %v3519_v16 = vadd.f32 %v3518_v30, %v3517_v59 }
0x24f9   :  { %4000 = vpush %v3519_v16 }
0x24fd   :  { %s3995_s2 = spop %3994 }
0x24fe   :  { %s3189_s9 = ssub.f32 0.0, %s3995_s2 }
0x2500   :  { %s3190_s7 = sadd.f32 %s3189_s9, %s2932_s12 }
0x2522   :  { %s3997_s3 = spop %3996 }
0x2523   :  { %s3226_s24 = ssub.f32 0.0, %s3997_s3 }
0x2525   :  { %s3227_s6 = sadd.f32 %s3226_s24, %s3190_s7 }
0x2528   :  { %s3999_s25 = spop %3998 }
0x2529   :  { %s3484_s13 = ssub.f32 0.0, %s3999_s25 }
0x252a   :  { %s4001_s27 = spop %4000 }
0x252b   :  { %s3485_s28 = sadd.f32 %s3484_s13, %s3227_s6 }
0x252c   :  { %s3521_s26 = ssub.f32 0.0, %s4001_s27 }
0x252e   :  { %s3522_s4 = sadd.f32 %s3521_s26, %s3485_s28 }
0x2530   :  { %3524 = sst [smem:[#allocation2]] %s3522_s4 }
0x2531   :  { %3537 = dma.smem_to_hbm %s4384_s18, 16, %s3535_s17, [#allocation3]  }
0x2532   :  { %4378 = dma.done.wait [#allocation3], 16  }
0x2533   :  { %4379 = vsyncadd [#allocation3], 4294967280 }
0x2534   :  { %3546 = sfence }
0x2535   :  { %3547 = vsyncpa [#allocation3], 1 }

</bundles_post_ra>
